<compile_context>
chip_gen: v5e
topology: v5e:2x2
jax: 0.10.0
libtpu: 0.0.40
codegen_flags: <defaults>
</compile_context>

<pallas_src>
import math
import functools

import jax
import jax.numpy as jnp
from jax import lax
from jax.experimental import pallas as pl
from jax.experimental.pallas import tpu as pltpu

LANE = 128  # every channel dimension is padded to this (all real widths <= 128)


def _round_up(x, m):
    return ((x + m - 1) // m) * m


def _row_tile(nrows, cap, min_tiles=2):
    """Pick an 8-aligned row tile and the padded row count.

    Always returns (tile, padded_rows) with tile % 8 == 0 and
    padded_rows % tile == 0.  When the row count allows, prefer >= 2 grid
    steps (megacore-friendliness on v7x)."""
    cap = max(8, (cap // 8) * 8)
    rp = _round_up(max(nrows, 1), 8)
    tile = min(cap, rp)
    if rp // tile < min_tiles and rp >= 16:
        tile = max(8, _round_up(rp // min_tiles, 8))
    padded = _round_up(rp, tile)
    return tile, padded


# ----------------------------------------------------------------------------
# Kernel: fused pairwise distance + ball query (first `nsample` within radius)
# ----------------------------------------------------------------------------

def _ball_query_kernel(q_ref, st_ref, s2_ref, o_ref, *, radius, nsample, m_real):
    q = q_ref[...]                                    # (tq, 3) f32
    st = st_ref[...]                                  # (3, Mp) f32
    s2 = s2_ref[...]                                  # (1, Mp) f32
    qx, qy, qz = q[:, 0:1], q[:, 1:2], q[:, 2:3]
    q2 = qx * qx + qy * qy + qz * qz                  # (tq, 1)
    ab = qx * st[0:1, :] + qy * st[1:2, :] + qz * st[2:3, :]
    d2 = jnp.maximum(q2 + s2 - 2.0 * ab, 0.0)         # (tq, Mp), clamp cancellation

    lanes = lax.broadcasted_iota(jnp.int32, d2.shape, 1).astype(jnp.float32)
    big = jnp.float32(1e9)
    valid = (lanes < m_real) & (d2 < radius * radius)  # mask padded source lanes
    keys = jnp.where(valid, lanes, big)                # smallest key == smallest index
    cnt = jnp.sum(valid.astype(jnp.float32), axis=1, keepdims=True)   # (tq, 1)

    tq = q.shape[0]
    pos = lax.broadcasted_iota(jnp.int32, (tq, nsample), 1).astype(jnp.float32)
    sel = jnp.zeros((tq, nsample), jnp.float32)
    cur = keys
    first_hit = None
    for j in range(nsample):                           # static unroll (nsample small)
        mn = jnp.min(cur, axis=1, keepdims=True)       # smallest remaining index
        if j == 0:
            first_hit = mn
        sel = jnp.where(pos == float(j), mn, sel)
        cur = jnp.where(lanes == mn, big, cur)         # exclude the selected lane

    # TODO(synk): CUDA ball_query leaves slots uninitialized when cnt == 0;
    # here they deterministically fall back to index 0 / the first hit.
    first = jnp.where(cnt > 0.0, first_hit, 0.0)
    out = jnp.where(pos < cnt, sel, first)
    o_ref[...] = out.astype(jnp.int32)


def pallas_ball_query(new_xyz, xyz, radius, nsample):
    """new_xyz (B,P,3), xyz (B,N,3) -> (B,P,nsample) int32 neighbor indices."""
    B, P, _ = new_xyz.shape
    N = xyz.shape[1]
    Mp = _round_up(N, LANE)
    st = jnp.swapaxes(xyz, 1, 2)                                   # (B, 3, N)
    st = jnp.pad(st, ((0, 0), (0, 0), (0, Mp - N)))
    s2 = jnp.pad(jnp.sum(xyz * xyz, axis=-1), ((0, 0), (0, Mp - N)))[:, None, :]

    tq, Pp = _row_tile(P, 512)
    q = jnp.pad(new_xyz, ((0, 0), (0, Pp - P), (0, 0))) if Pp != P else new_xyz

    out = pl.pallas_call(
        functools.partial(_ball_query_kernel, radius=float(radius),
                          nsample=int(nsample), m_real=float(N)),
        out_shape=jax.ShapeDtypeStruct((B, Pp, nsample), jnp.int32),
        grid=(B, Pp // tq),
        in_specs=[
            pl.BlockSpec((None, tq, 3), lambda b, i: (b, i, 0)),
            pl.BlockSpec((None, 3, Mp), lambda b, i: (b, 0, 0)),
            pl.BlockSpec((None, 1, Mp), lambda b, i: (b, 0, 0)),
        ],
        out_specs=pl.BlockSpec((None, tq, nsample), lambda b, i: (b, i, 0)),
        compiler_params=pltpu.CompilerParams(
            dimension_semantics=("parallel", "parallel")),
    )(q, st, s2)
    return out[:, :P, :]


# ----------------------------------------------------------------------------
# Kernel: fused SA shared-MLP (+ relative-xyz correction) + neighborhood maxpool
# ----------------------------------------------------------------------------

def _sa_group_kernel(g_ref, c_ref, *rest, n_layers):
    # rest = [w0, b0, w1, b1, ..., o_ref]
    o_ref = rest[-1]
    g = g_ref[...]                                    # (tg, S, 128) bf16
    tg, S, C = g.shape
    x = g.reshape(tg * S, C)

    w0 = rest[0][...]                                 # (128,128) bf16 resident
    b0 = rest[1][...]                                 # (1,128)   f32 resident
    y = jnp.dot(x, w0, preferred_element_type=jnp.float32) + b0

    # Linear correction for grouped_xyz - center:
    #   MLP1([g_xyz - c, feat]) = MLP1([g_xyz, feat]) - c @ W1[0:3, :]
    c = c_ref[...]                                    # (tg, 3) f32
    w0f = w0.astype(jnp.float32)
    corr = (c[:, 0:1] * w0f[0:1, :] + c[:, 1:2] * w0f[1:2, :]
            + c[:, 2:3] * w0f[2:3, :])                # (tg, 128)
    y = y.reshape(tg, S, C) - corr[:, None, :]
    y = jnp.maximum(y, 0.0)
    x = y.reshape(tg * S, C)

    for l in range(1, n_layers):
        w = rest[2 * l][...]
        b = rest[2 * l + 1][...]
        y = jnp.dot(x.astype(jnp.bfloat16), w,
                    preferred_element_type=jnp.float32) + b
        x = jnp.maximum(y, 0.0)

    pooled = jnp.max(x.reshape(tg, S, C), axis=1)     # maxpool over the S neighbors
    o_ref[...] = pooled.astype(o_ref.dtype)


def sa_group_mlp(g, centers, layers):
    """g (G,S,128) bf16 slabs (abs xyz @ lanes 0:3), centers (G,3) f32 -> (G,128) bf16."""
    G, S, _ = g.shape
    cap = max(8, (2048 // S) // 8 * 8)
    tg, Gp = _row_tile(G, cap)
    if Gp != G:
        g = jnp.pad(g, ((0, Gp - G), (0, 0), (0, 0)))
        centers = jnp.pad(centers, ((0, Gp - G), (0, 0)))

    in_specs = [pl.BlockSpec((tg, S, LANE), lambda i: (i, 0, 0)),
                pl.BlockSpec((tg, 3), lambda i: (i, 0))]
    operands = [g, centers]
    for (w, b, _) in layers:
        in_specs.append(pl.BlockSpec((LANE, LANE), lambda i: (0, 0)))
        in_specs.append(pl.BlockSpec((1, LANE), lambda i: (0, 0)))
        operands.extend([w, b])

    out = pl.pallas_call(
        functools.partial(_sa_group_kernel, n_layers=len(layers)),
        out_shape=jax.ShapeDtypeStruct((Gp, LANE), jnp.bfloat16),
        grid=(Gp // tg,),
        in_specs=in_specs,
        out_specs=pl.BlockSpec((tg, LANE), lambda i: (i, 0)),
        compiler_params=pltpu.CompilerParams(dimension_semantics=("parallel",)),
    )(*operands)
    return out[:G] if Gp != G else out


# ----------------------------------------------------------------------------
# Kernel: fused FP module (distances + 3-NN interpolation + concat + MLP)
# ----------------------------------------------------------------------------

def _fp_fused_kernel(uq_ref, kt_ref, k2_ref, kf_ref, sk_ref,
                     wa_ref, wb_ref, b0_ref, *rest, n_layers, m_real):
    # rest = [w1, b1, ..., o_ref]
    o_ref = rest[-1]
    uq = uq_ref[...]                                  # (tn, 3) f32
    kt = kt_ref[...]                                  # (3, Mp) f32
    k2 = k2_ref[...]                                  # (1, Mp) f32
    ux, uy, uz = uq[:, 0:1], uq[:, 1:2], uq[:, 2:3]
    u2 = ux * ux + uy * uy + uz * uz
    ab = ux * kt[0:1, :] + uy * kt[1:2, :] + uz * kt[2:3, :]
    d2 = jnp.maximum(u2 + k2 - 2.0 * ab, 0.0)         # (tn, Mp) f32

    lanes = lax.broadcasted_iota(jnp.int32, d2.shape, 1).astype(jnp.float32)
    big = jnp.float32(1e30)
    d2 = jnp.where(lanes < m_real, d2, big)           # mask padded known lanes

    # 3-NN inverse-squared-distance weights, kept fully f32 (as in reference).
    W = jnp.zeros_like(d2)
    wsum = jnp.zeros_like(u2)
    cur = d2
    for _ in range(3):
        mn = jnp.min(cur, axis=1, keepdims=True)
        sel_lane = jnp.min(jnp.where(cur <= mn, lanes, big), axis=1, keepdims=True)
        onehot = (lanes == sel_lane).astype(jnp.float32)
        wk = 1.0 / (mn + 1e-8)
        W = W + onehot * wk
        wsum = wsum + wk
        cur = jnp.where(onehot > 0.0, big, cur)
    W = W / wsum

    # Interpolation as a dense (tn,Mp) x (Mp,128) matmul (padded rows are 0).
    kf = kf_ref[...].astype(jnp.float32)              # (Mp, 128)
    interp = jnp.dot(W, kf, preferred_element_type=jnp.float32)   # (tn, 128)

    # Layer 0 over concat([interp, skip]) via split weights (no lane surgery).
    sk = sk_ref[...]                                  # (tn, 128) bf16
    y = (jnp.dot(interp.astype(jnp.bfloat16), wa_ref[...],
                 preferred_element_type=jnp.float32)
         + jnp.dot(sk, wb_ref[...], preferred_element_type=jnp.float32)
         + b0_ref[...])
    x = jnp.maximum(y, 0.0)

    for l in range(1, n_layers):
        w = rest[2 * (l - 1)][...]
        b = rest[2 * (l - 1) + 1][...]
        y = jnp.dot(x.astype(jnp.bfloat16), w,
                    preferred_element_type=jnp.float32) + b
        x = jnp.maximum(y, 0.0)

    o_ref[...] = x.astype(o_ref.dtype)


def fp_module(unknown_xyz, known_xyz, unknown_slab, known_slab, fp_params):
    B, n, _ = unknown_xyz.shape
    m = known_xyz.shape[1]
    Mp = _round_up(m, LANE)
    kt = jnp.swapaxes(known_xyz, 1, 2)
    kt = jnp.pad(kt, ((0, 0), (0, 0), (0, Mp - m)))
    k2 = jnp.pad(jnp.sum(known_xyz * known_xyz, axis=-1),
                 ((0, 0), (0, Mp - m)))[:, None, :]
    kf = jnp.pad(known_slab, ((0, 0), (0, Mp - m), (0, 0)))        # (B,Mp,128) bf16

    if unknown_slab is None:
        unknown_slab = jnp.zeros((B, n, LANE), jnp.bfloat16)

    tn, Np = _row_tile(n, 1024)
    uq, sk = unknown_xyz, unknown_slab
    if Np != n:
        uq = jnp.pad(uq, ((0, 0), (0, Np - n), (0, 0)))
        sk = jnp.pad(sk, ((0, 0), (0, Np - n), (0, 0)))

    wa, wb, b0 = fp_params['l0']
    operands = [uq, kt, k2, kf, sk, wa, wb, b0]
    in_specs = [
        pl.BlockSpec((None, tn, 3), lambda b, i: (b, i, 0)),
        pl.BlockSpec((None, 3, Mp), lambda b, i: (b, 0, 0)),
        pl.BlockSpec((None, 1, Mp), lambda b, i: (b, 0, 0)),
        pl.BlockSpec((None, Mp, LANE), lambda b, i: (b, 0, 0)),
        pl.BlockSpec((None, tn, LANE), lambda b, i: (b, i, 0)),
        pl.BlockSpec((LANE, LANE), lambda b, i: (0, 0)),
        pl.BlockSpec((LANE, LANE), lambda b, i: (0, 0)),
        pl.BlockSpec((1, LANE), lambda b, i: (0, 0)),
    ]
    for (w, b) in fp_params['rest']:
        operands.extend([w, b])
        in_specs.append(pl.BlockSpec((LANE, LANE), lambda bb, i: (0, 0)))
        in_specs.append(pl.BlockSpec((1, LANE), lambda bb, i: (0, 0)))

    n_layers = 1 + len(fp_params['rest'])
    out = pl.pallas_call(
        functools.partial(_fp_fused_kernel, n_layers=n_layers, m_real=float(m)),
        out_shape=jax.ShapeDtypeStruct((B, Np, LANE), jnp.bfloat16),
        grid=(B, Np // tn),
        in_specs=in_specs,
        out_specs=pl.BlockSpec((None, tn, LANE), lambda b, i: (b, i, 0)),
        compiler_params=pltpu.CompilerParams(
            dimension_semantics=("parallel", "parallel")),
    )(*operands)
    return out[:, :n, :] if Np != n else out


# ----------------------------------------------------------------------------
# Kernel: fused point-wise MLP (classification head)
# ----------------------------------------------------------------------------

def _pointwise_mlp_kernel(x_ref, *rest, n_layers, relu_flags):
    o_ref = rest[-1]
    x = x_ref[...]                                    # (tm, 128) bf16
    for l in range(n_layers):
        w = rest[2 * l][...]
        b = rest[2 * l + 1][...]
        y = jnp.dot(x.astype(jnp.bfloat16), w,
                    preferred_element_type=jnp.float32) + b
        if relu_flags[l]:
            y = jnp.maximum(y, 0.0)
        x = y
    o_ref[...] = x.astype(o_ref.dtype)


def cls_head(feat_slab, layers, num_class):
    B, N, _ = feat_slab.shape
    M = B * N
    x = feat_slab.reshape(M, LANE)
    tm, Mp = _row_tile(M, 2048)
    if Mp != M:
        x = jnp.pad(x, ((0, Mp - M), (0, 0)))

    relu_flags = [True] * (len(layers) - 1) + [False]   # Dropout(0.5) = identity (eval)
    in_specs = [pl.BlockSpec((tm, LANE), lambda i: (i, 0))]
    operands = [x]
    for (w, b, _) in layers:
        in_specs.append(pl.BlockSpec((LANE, LANE), lambda i: (0, 0)))
        in_specs.append(pl.BlockSpec((1, LANE), lambda i: (0, 0)))
        operands.extend([w, b])

    out = pl.pallas_call(
        functools.partial(_pointwise_mlp_kernel, n_layers=len(layers),
                          relu_flags=tuple(relu_flags)),
        out_shape=jax.ShapeDtypeStruct((Mp, LANE), jnp.float32),
        grid=(Mp // tm,),
        in_specs=in_specs,
        out_specs=pl.BlockSpec((tm, LANE), lambda i: (i, 0)),
        compiler_params=pltpu.CompilerParams(dimension_semantics=("parallel",)),
    )(*operands)
    return out[:M, :num_class].reshape(B, N, num_class)


# ----------------------------------------------------------------------------
# Plain-JAX glue (data-dependent sampling / gathering)
# ----------------------------------------------------------------------------

def fps_single(xyz, npoint):
    """Furthest point sampling, starts at index 0 (matches CUDA kernel).

    TODO(synk): move FPS into a VMEM-resident Pallas kernel (serial argmax
    chain currently runs as an XLA fori_loop)."""
    N = xyz.shape[0]

    def body(i, carry):
        idx, dist = carry
        last = xyz[idx[i - 1]]
        d = jnp.sum((xyz - last) ** 2, axis=-1)
        dist = jnp.minimum(dist, d)
        nxt = jnp.argmax(dist).astype(jnp.int32)
        return idx.at[i].set(nxt), dist

    idx0 = jnp.zeros((npoint,), jnp.int32)
    dist0 = jnp.full((N,), 1e10, jnp.float32)
    idx, _ = jax.lax.fori_loop(1, npoint, body, (idx0, dist0))
    return idx


# ----------------------------------------------------------------------------
# Model blocks
# ----------------------------------------------------------------------------

def sa_module(xyz, feat_slab, npoint, radius, nsample, layers):
    B, N, _ = xyz.shape
    idx_fps = jax.vmap(lambda p: fps_single(p, npoint))(xyz)            # (B, P)
    new_xyz = jnp.take_along_axis(xyz, idx_fps[:, :, None], axis=1)     # (B, P, 3)

    idx = pallas_ball_query(new_xyz, xyz, radius, nsample)              # (B, P, S)

    # Combined bf16 point slab: lanes [0:3) = abs xyz, [3:3+Cin) = features.
    if feat_slab is not None:
        slab = jnp.concatenate([xyz.astype(jnp.bfloat16),
                                feat_slab[..., :LANE - 3]], axis=-1)
    else:
        slab = jnp.pad(xyz.astype(jnp.bfloat16), ((0, 0), (0, 0), (0, LANE - 3)))

    # TODO(synk): fold this gather into the group kernel (scalar-prefetch idx +
    # per-row DMA) to avoid materializing (B, P*S, 128) in HBM at realistic N.
    P, S = npoint, nsample
    g = jnp.take_along_axis(slab, idx.reshape(B, P * S)[:, :, None], axis=1)
    g = g.reshape(B * P, S, LANE)

    pooled = sa_group_mlp(g, new_xyz.reshape(B * P, 3), layers)         # (B*P,128) bf16
    return new_xyz, pooled.reshape(B, P, LANE)


# ----------------------------------------------------------------------------
# Parameter init (deterministic, BN folded, channel-padded to 128) & forward
# ----------------------------------------------------------------------------

BN_EVAL_SCALE = 1.0 / math.sqrt(1.0 + 1e-5)   # gamma=1, beta=0, mean=0, var=1

CFG = dict(
    NPOINTS=[8, 4],
    RADIUS=[0.9, 1.8],
    NSAMPLE=[8, 8],
    MLPS=[[16, 16, 32], [32, 32, 64]],
    FP_MLPS=[[32, 32], [32, 32]],
    CLS_FC=[32],
    num_class=3,
    extra_channels=1,
    use_bn=False,
)


def _raw_linear(key, cin, cout, bn_fold):
    kw, kb = jax.random.split(key)
    w = jax.random.normal(kw, (cin, cout), jnp.float32) / math.sqrt(cin)
    if bn_fold:                       # conv has no bias; BN (eval) folded in
        w = w * BN_EVAL_SCALE
        b = jnp.zeros((cout,), jnp.float32)
    else:
        b = jax.random.normal(kb, (cout,), jnp.float32) * 0.02
    return w, b


def make_linear(key, cin, cout, bn_fold):
    w, b = _raw_linear(key, cin, cout, bn_fold)
    w_pad = jnp.zeros((LANE, LANE), jnp.float32).at[:cin, :cout].set(w)
    b_pad = jnp.zeros((1, LANE), jnp.float32).at[0, :cout].set(b)
    return (w_pad.astype(jnp.bfloat16), b_pad, cout)


def make_linear_split(key, ca, cb, cout, bn_fold):
    """First FP layer over concat([interp(ca), skip(cb)]): split into two slabs."""
    w, b = _raw_linear(key, ca + cb, cout, bn_fold)
    wa = jnp.zeros((LANE, LANE), jnp.float32).at[:ca, :cout].set(w[:ca])
    wb = jnp.zeros((LANE, LANE), jnp.float32)
    if cb > 0:
        wb = wb.at[:cb, :cout].set(w[ca:])
    b_pad = jnp.zeros((1, LANE), jnp.float32).at[0, :cout].set(b)
    return (wa.astype(jnp.bfloat16), wb.astype(jnp.bfloat16), b_pad)


def init_params(cfg, key):
    keys = iter(jax.random.split(key, 64))
    params = {'sa': [], 'fp': [], 'cls': []}

    # SA modules (use_xyz=True adds +3 to the first channel count, xyz first)
    channel_in = cfg['extra_channels']
    skip = [cfg['extra_channels']]
    for k in range(len(cfg['NPOINTS'])):
        chans = [channel_in + 3] + cfg['MLPS'][k]
        layers = [make_linear(next(keys), chans[i], chans[i + 1],
                              bn_fold=cfg['use_bn'])
                  for i in range(len(chans) - 1)]
        params['sa'].append(layers)
        channel_in = chans[-1]
        skip.append(channel_in)

    # FP modules (bn=True by default in PointnetFPModule)
    for k in range(len(cfg['FP_MLPS'])):
        pre = (cfg['FP_MLPS'][k + 1][-1]
               if k + 1 < len(cfg['FP_MLPS']) else channel_in)
        c_skip = skip[k]
        chans = [pre + c_skip] + cfg['FP_MLPS'][k]
        l0 = make_linear_split(next(keys), pre, c_skip, chans[1], bn_fold=True)
        rest = []
        for i in range(1, len(chans) - 1):
            w, b, _ = make_linear(next(keys), chans[i], chans[i + 1], bn_fold=True)
            rest.append((w, b))
        params['fp'].append({'l0': l0, 'rest': rest})

    # Classification head
    pre = cfg['FP_MLPS'][0][-1]
    for c in cfg['CLS_FC']:
        params['cls'].append(make_linear(next(keys), pre, c, bn_fold=True))
        pre = c
    params['cls'].append(make_linear(next(keys), pre, cfg['num_class'],
                                     bn_fold=False))
    return params


def pointnet2_forward(params, pointcloud, cfg):
    # _break_up_pc (channels-last feature layout, 128-lane bf16 slabs)
    xyz = pointcloud[..., 0:3]
    extra = pointcloud.shape[-1] - 3
    if extra > 0:
        feat0 = jnp.pad(pointcloud[..., 3:].astype(jnp.bfloat16),
                        ((0, 0), (0, 0), (0, LANE - extra)))
    else:
        feat0 = None

    l_xyz, l_slab = [xyz], [feat0]
    for k in range(len(cfg['NPOINTS'])):
        nx, nslab = sa_module(l_xyz[k], l_slab[k], cfg['NPOINTS'][k],
                              cfg['RADIUS'][k], cfg['NSAMPLE'][k],
                              params['sa'][k])
        l_xyz.append(nx)
        l_slab.append(nslab)

    n_fp = len(params['fp'])
    for i in range(-1, -(n_fp + 1), -1):
        l_slab[i - 1] = fp_module(l_xyz[i - 1], l_xyz[i],
                                  l_slab[i - 1], l_slab[i],
                                  params['fp'][i])

    pred_cls = cls_head(l_slab[0], params['cls'], cfg['num_class'])   # (B,N,num_class)
    return {'pred_cls': pred_cls}


# ----------------------------------------------------------------------------

if __name__ == "__main__":
    key = jax.random.PRNGKey(0)
    k_param, k_data = jax.random.split(key)

    B, N = 2, 32
    pointcloud = jax.random.uniform(
        k_data, (B, N, 3 + CFG['extra_channels']),
        minval=-1.0, maxval=1.0, dtype=jnp.float32)

    params = init_params(CFG, k_param)

    fwd = jax.jit(lambda p, pc: pointnet2_forward(p, pc, CFG))
    out = fwd(params, pointcloud)
    jax.block_until_ready(out)

    pred = out['pred_cls']
    assert pred.shape == (B, N, CFG['num_class']), pred.shape
    assert bool(jnp.all(jnp.isfinite(pred)))
    print("KERNEL_OK")
</pallas_src>

<mosaic_0001>
module attributes {stable_mosaic.version = 11 : i64} {
  func.func @_ball_query_kernel(%arg0: i32, %arg1: i32, %arg2: memref<1x8x3xf32, #tpu.memory_space<vmem>>, %arg3: memref<1x3x128xf32, #tpu.memory_space<vmem>>, %arg4: memref<1x1x128xf32, #tpu.memory_space<vmem>>, %arg5: memref<1x8x8xi32, #tpu.memory_space<vmem>>) attributes {dimension_semantics = [#tpu.dimension_semantics<parallel>, #tpu.dimension_semantics<parallel>], iteration_bounds = array<i64: 2, 1>, scalar_prefetch = 0 : i64, scratch_operands = 0 : i64, tpu.core_type = #tpu.core_type<tc>, window_params = [{transform_indices = @transform_0, window_bounds = array<i64: 1, 8, 3>}, {transform_indices = @transform_1, window_bounds = array<i64: 1, 3, 128>}, {transform_indices = @transform_2, window_bounds = array<i64: 1, 1, 128>}, {transform_indices = @transform_3, window_bounds = array<i64: 1, 8, 8>}]} {
    %c0 = arith.constant 0 : index
    %c0_0 = arith.constant 0 : index
    %c0_1 = arith.constant 0 : index
    %0 = vector.load %arg2[%c0, %c0_0, %c0_1] : memref<1x8x3xf32, #tpu.memory_space<vmem>>, vector<1x8x3xf32>
    %1 = vector.shape_cast %0 : vector<1x8x3xf32> to vector<8x3xf32>
    %c0_2 = arith.constant 0 : index
    %c0_3 = arith.constant 0 : index
    %c0_4 = arith.constant 0 : index
    %2 = vector.load %arg3[%c0_2, %c0_3, %c0_4] : memref<1x3x128xf32, #tpu.memory_space<vmem>>, vector<1x3x128xf32>
    %3 = vector.shape_cast %2 : vector<1x3x128xf32> to vector<3x128xf32>
    %c0_5 = arith.constant 0 : index
    %c0_6 = arith.constant 0 : index
    %c0_7 = arith.constant 0 : index
    %4 = vector.load %arg4[%c0_5, %c0_6, %c0_7] : memref<1x1x128xf32, #tpu.memory_space<vmem>>, vector<1x1x128xf32>
    %5 = vector.shape_cast %4 : vector<1x1x128xf32> to vector<1x128xf32>
    %6 = vector.extract_strided_slice %1 {offsets = [0, 0], sizes = [8, 1], strides = [1, 1]} : vector<8x3xf32> to vector<8x1xf32>
    %7 = vector.extract_strided_slice %1 {offsets = [0, 1], sizes = [8, 1], strides = [1, 1]} : vector<8x3xf32> to vector<8x1xf32>
    %8 = vector.extract_strided_slice %1 {offsets = [0, 2], sizes = [8, 1], strides = [1, 1]} : vector<8x3xf32> to vector<8x1xf32>
    %9 = arith.mulf %6, %6 : vector<8x1xf32>
    %10 = arith.mulf %7, %7 : vector<8x1xf32>
    %11 = arith.addf %9, %10 : vector<8x1xf32>
    %12 = arith.mulf %8, %8 : vector<8x1xf32>
    %13 = arith.addf %11, %12 : vector<8x1xf32>
    %14 = vector.extract_strided_slice %3 {offsets = [0, 0], sizes = [1, 128], strides = [1, 1]} : vector<3x128xf32> to vector<1x128xf32>
    %15 = vector.broadcast %6 : vector<8x1xf32> to vector<8x128xf32>
    %16 = vector.broadcast %14 : vector<1x128xf32> to vector<8x128xf32>
    %17 = arith.mulf %15, %16 : vector<8x128xf32>
    %18 = vector.extract_strided_slice %3 {offsets = [1, 0], sizes = [1, 128], strides = [1, 1]} : vector<3x128xf32> to vector<1x128xf32>
    %19 = vector.broadcast %7 : vector<8x1xf32> to vector<8x128xf32>
    %20 = vector.broadcast %18 : vector<1x128xf32> to vector<8x128xf32>
    %21 = arith.mulf %19, %20 : vector<8x128xf32>
    %22 = arith.addf %17, %21 : vector<8x128xf32>
    %23 = vector.extract_strided_slice %3 {offsets = [2, 0], sizes = [1, 128], strides = [1, 1]} : vector<3x128xf32> to vector<1x128xf32>
    %24 = vector.broadcast %8 : vector<8x1xf32> to vector<8x128xf32>
    %25 = vector.broadcast %23 : vector<1x128xf32> to vector<8x128xf32>
    %26 = arith.mulf %24, %25 : vector<8x128xf32>
    %27 = arith.addf %22, %26 : vector<8x128xf32>
    %28 = vector.broadcast %13 : vector<8x1xf32> to vector<8x128xf32>
    %29 = vector.broadcast %5 : vector<1x128xf32> to vector<8x128xf32>
    %30 = arith.addf %28, %29 : vector<8x128xf32>
    %cst = arith.constant 2.000000e+00 : f32
    %31 = vector.broadcast %cst : f32 to vector<8x128xf32>
    %32 = arith.mulf %31, %27 : vector<8x128xf32>
    %33 = arith.subf %30, %32 : vector<8x128xf32>
    %cst_8 = arith.constant 0.000000e+00 : f32
    %34 = vector.broadcast %cst_8 : f32 to vector<8x128xf32>
    %35 = arith.maximumf %33, %34 : vector<8x128xf32>
    %36 = tpu.iota {dimensions = array<i32: 1>} : vector<8x128xi32>
    %37 = arith.sitofp %36 : vector<8x128xi32> to vector<8x128xf32>
    %cst_9 = arith.constant 3.200000e+01 : f32
    %38 = vector.broadcast %cst_9 : f32 to vector<8x128xf32>
    %39 = arith.cmpf olt, %37, %38 : vector<8x128xf32>
    %cst_10 = arith.constant 8.100000e-01 : f32
    %40 = vector.broadcast %cst_10 : f32 to vector<8x128xf32>
    %41 = arith.cmpf olt, %35, %40 : vector<8x128xf32>
    %42 = arith.andi %39, %41 : vector<8x128xi1>
    %cst_11 = arith.constant 1.000000e+09 : f32
    %43 = vector.broadcast %cst_11 : f32 to vector<8x128xf32>
    %44 = arith.select %42, %37, %43 : vector<8x128xi1>, vector<8x128xf32>
    %45 = arith.extui %42 : vector<8x128xi1> to vector<8x128xi32>
    %46 = arith.sitofp %45 : vector<8x128xi32> to vector<8x128xf32>
    %cst_12 = arith.constant dense<0.000000e+00> : vector<8xf32>
    %47 = vector.multi_reduction <add>, %46, %cst_12 [1] : vector<8x128xf32> to vector<8xf32>
    %48 = vector.shape_cast %47 : vector<8xf32> to vector<8x1xf32>
    %49 = tpu.iota {dimensions = array<i32: 1>} : vector<8x8xi32>
    %50 = arith.sitofp %49 : vector<8x8xi32> to vector<8x8xf32>
    %cst_13 = arith.constant 0.000000e+00 : f32
    %51 = vector.broadcast %cst_13 : f32 to vector<8x8xf32>
    %cst_14 = arith.constant dense<0x7F800000> : vector<8xf32>
    %52 = vector.multi_reduction <minimumf>, %44, %cst_14 [1] : vector<8x128xf32> to vector<8xf32>
    %53 = vector.shape_cast %52 : vector<8xf32> to vector<8x1xf32>
    %cst_15 = arith.constant 0.000000e+00 : f32
    %54 = vector.broadcast %cst_15 : f32 to vector<8x8xf32>
    %55 = arith.cmpf oeq, %50, %54 : vector<8x8xf32>
    %56 = vector.shape_cast %53 : vector<8x1xf32> to vector<8x1xf32>
    %57 = vector.broadcast %56 : vector<8x1xf32> to vector<8x8xf32>
    %58 = arith.select %55, %57, %51 : vector<8x8xi1>, vector<8x8xf32>
    %59 = vector.broadcast %53 : vector<8x1xf32> to vector<8x128xf32>
    %60 = arith.cmpf oeq, %37, %59 : vector<8x128xf32>
    %cst_16 = arith.constant 1.000000e+09 : f32
    %61 = vector.broadcast %cst_16 : f32 to vector<8x128xf32>
    %62 = arith.select %60, %61, %44 : vector<8x128xi1>, vector<8x128xf32>
    %cst_17 = arith.constant dense<0x7F800000> : vector<8xf32>
    %63 = vector.multi_reduction <minimumf>, %62, %cst_17 [1] : vector<8x128xf32> to vector<8xf32>
    %64 = vector.shape_cast %63 : vector<8xf32> to vector<8x1xf32>
    %cst_18 = arith.constant 1.000000e+00 : f32
    %65 = vector.broadcast %cst_18 : f32 to vector<8x8xf32>
    %66 = arith.cmpf oeq, %50, %65 : vector<8x8xf32>
    %67 = vector.shape_cast %64 : vector<8x1xf32> to vector<8x1xf32>
    %68 = vector.broadcast %67 : vector<8x1xf32> to vector<8x8xf32>
    %69 = arith.select %66, %68, %58 : vector<8x8xi1>, vector<8x8xf32>
    %70 = vector.broadcast %64 : vector<8x1xf32> to vector<8x128xf32>
    %71 = arith.cmpf oeq, %37, %70 : vector<8x128xf32>
    %cst_19 = arith.constant 1.000000e+09 : f32
    %72 = vector.broadcast %cst_19 : f32 to vector<8x128xf32>
    %73 = arith.select %71, %72, %62 : vector<8x128xi1>, vector<8x128xf32>
    %cst_20 = arith.constant dense<0x7F800000> : vector<8xf32>
    %74 = vector.multi_reduction <minimumf>, %73, %cst_20 [1] : vector<8x128xf32> to vector<8xf32>
    %75 = vector.shape_cast %74 : vector<8xf32> to vector<8x1xf32>
    %cst_21 = arith.constant 2.000000e+00 : f32
    %76 = vector.broadcast %cst_21 : f32 to vector<8x8xf32>
    %77 = arith.cmpf oeq, %50, %76 : vector<8x8xf32>
    %78 = vector.shape_cast %75 : vector<8x1xf32> to vector<8x1xf32>
    %79 = vector.broadcast %78 : vector<8x1xf32> to vector<8x8xf32>
    %80 = arith.select %77, %79, %69 : vector<8x8xi1>, vector<8x8xf32>
    %81 = vector.broadcast %75 : vector<8x1xf32> to vector<8x128xf32>
    %82 = arith.cmpf oeq, %37, %81 : vector<8x128xf32>
    %cst_22 = arith.constant 1.000000e+09 : f32
    %83 = vector.broadcast %cst_22 : f32 to vector<8x128xf32>
    %84 = arith.select %82, %83, %73 : vector<8x128xi1>, vector<8x128xf32>
    %cst_23 = arith.constant dense<0x7F800000> : vector<8xf32>
    %85 = vector.multi_reduction <minimumf>, %84, %cst_23 [1] : vector<8x128xf32> to vector<8xf32>
    %86 = vector.shape_cast %85 : vector<8xf32> to vector<8x1xf32>
    %cst_24 = arith.constant 3.000000e+00 : f32
    %87 = vector.broadcast %cst_24 : f32 to vector<8x8xf32>
    %88 = arith.cmpf oeq, %50, %87 : vector<8x8xf32>
    %89 = vector.shape_cast %86 : vector<8x1xf32> to vector<8x1xf32>
    %90 = vector.broadcast %89 : vector<8x1xf32> to vector<8x8xf32>
    %91 = arith.select %88, %90, %80 : vector<8x8xi1>, vector<8x8xf32>
    %92 = vector.broadcast %86 : vector<8x1xf32> to vector<8x128xf32>
    %93 = arith.cmpf oeq, %37, %92 : vector<8x128xf32>
    %cst_25 = arith.constant 1.000000e+09 : f32
    %94 = vector.broadcast %cst_25 : f32 to vector<8x128xf32>
    %95 = arith.select %93, %94, %84 : vector<8x128xi1>, vector<8x128xf32>
    %cst_26 = arith.constant dense<0x7F800000> : vector<8xf32>
    %96 = vector.multi_reduction <minimumf>, %95, %cst_26 [1] : vector<8x128xf32> to vector<8xf32>
    %97 = vector.shape_cast %96 : vector<8xf32> to vector<8x1xf32>
    %cst_27 = arith.constant 4.000000e+00 : f32
    %98 = vector.broadcast %cst_27 : f32 to vector<8x8xf32>
    %99 = arith.cmpf oeq, %50, %98 : vector<8x8xf32>
    %100 = vector.shape_cast %97 : vector<8x1xf32> to vector<8x1xf32>
    %101 = vector.broadcast %100 : vector<8x1xf32> to vector<8x8xf32>
    %102 = arith.select %99, %101, %91 : vector<8x8xi1>, vector<8x8xf32>
    %103 = vector.broadcast %97 : vector<8x1xf32> to vector<8x128xf32>
    %104 = arith.cmpf oeq, %37, %103 : vector<8x128xf32>
    %cst_28 = arith.constant 1.000000e+09 : f32
    %105 = vector.broadcast %cst_28 : f32 to vector<8x128xf32>
    %106 = arith.select %104, %105, %95 : vector<8x128xi1>, vector<8x128xf32>
    %cst_29 = arith.constant dense<0x7F800000> : vector<8xf32>
    %107 = vector.multi_reduction <minimumf>, %106, %cst_29 [1] : vector<8x128xf32> to vector<8xf32>
    %108 = vector.shape_cast %107 : vector<8xf32> to vector<8x1xf32>
    %cst_30 = arith.constant 5.000000e+00 : f32
    %109 = vector.broadcast %cst_30 : f32 to vector<8x8xf32>
    %110 = arith.cmpf oeq, %50, %109 : vector<8x8xf32>
    %111 = vector.shape_cast %108 : vector<8x1xf32> to vector<8x1xf32>
    %112 = vector.broadcast %111 : vector<8x1xf32> to vector<8x8xf32>
    %113 = arith.select %110, %112, %102 : vector<8x8xi1>, vector<8x8xf32>
    %114 = vector.broadcast %108 : vector<8x1xf32> to vector<8x128xf32>
    %115 = arith.cmpf oeq, %37, %114 : vector<8x128xf32>
    %cst_31 = arith.constant 1.000000e+09 : f32
    %116 = vector.broadcast %cst_31 : f32 to vector<8x128xf32>
    %117 = arith.select %115, %116, %106 : vector<8x128xi1>, vector<8x128xf32>
    %cst_32 = arith.constant dense<0x7F800000> : vector<8xf32>
    %118 = vector.multi_reduction <minimumf>, %117, %cst_32 [1] : vector<8x128xf32> to vector<8xf32>
    %119 = vector.shape_cast %118 : vector<8xf32> to vector<8x1xf32>
    %cst_33 = arith.constant 6.000000e+00 : f32
    %120 = vector.broadcast %cst_33 : f32 to vector<8x8xf32>
    %121 = arith.cmpf oeq, %50, %120 : vector<8x8xf32>
    %122 = vector.shape_cast %119 : vector<8x1xf32> to vector<8x1xf32>
    %123 = vector.broadcast %122 : vector<8x1xf32> to vector<8x8xf32>
    %124 = arith.select %121, %123, %113 : vector<8x8xi1>, vector<8x8xf32>
    %125 = vector.broadcast %119 : vector<8x1xf32> to vector<8x128xf32>
    %126 = arith.cmpf oeq, %37, %125 : vector<8x128xf32>
    %cst_34 = arith.constant 1.000000e+09 : f32
    %127 = vector.broadcast %cst_34 : f32 to vector<8x128xf32>
    %128 = arith.select %126, %127, %117 : vector<8x128xi1>, vector<8x128xf32>
    %cst_35 = arith.constant dense<0x7F800000> : vector<8xf32>
    %129 = vector.multi_reduction <minimumf>, %128, %cst_35 [1] : vector<8x128xf32> to vector<8xf32>
    %130 = vector.shape_cast %129 : vector<8xf32> to vector<8x1xf32>
    %cst_36 = arith.constant 7.000000e+00 : f32
    %131 = vector.broadcast %cst_36 : f32 to vector<8x8xf32>
    %132 = arith.cmpf oeq, %50, %131 : vector<8x8xf32>
    %133 = vector.shape_cast %130 : vector<8x1xf32> to vector<8x1xf32>
    %134 = vector.broadcast %133 : vector<8x1xf32> to vector<8x8xf32>
    %135 = arith.select %132, %134, %124 : vector<8x8xi1>, vector<8x8xf32>
    %cst_37 = arith.constant 0.000000e+00 : f32
    %136 = vector.broadcast %cst_37 : f32 to vector<8x1xf32>
    %137 = arith.cmpf ogt, %48, %136 : vector<8x1xf32>
    %cst_38 = arith.constant 0.000000e+00 : f32
    %138 = vector.broadcast %cst_38 : f32 to vector<8x1xf32>
    %139 = arith.select %137, %53, %138 : vector<8x1xi1>, vector<8x1xf32>
    %140 = vector.broadcast %48 : vector<8x1xf32> to vector<8x8xf32>
    %141 = arith.cmpf olt, %50, %140 : vector<8x8xf32>
    %142 = vector.shape_cast %139 : vector<8x1xf32> to vector<8x1xf32>
    %143 = vector.broadcast %142 : vector<8x1xf32> to vector<8x8xf32>
    %144 = arith.select %141, %135, %143 : vector<8x8xi1>, vector<8x8xf32>
    %145 = arith.fptosi %144 : vector<8x8xf32> to vector<8x8xi32>
    %c0_39 = arith.constant 0 : index
    %c0_40 = arith.constant 0 : index
    %c0_41 = arith.constant 0 : index
    %146 = vector.load %arg5[%c0_39, %c0_40, %c0_41] : memref<1x8x8xi32, #tpu.memory_space<vmem>>, vector<1x8x8xi32>
    %147 = vector.shape_cast %146 : vector<1x8x8xi32> to vector<8x8xi32>
    %148 = vector.shape_cast %145 : vector<8x8xi32> to vector<1x8x8xi32>
    tpu.vector_store %arg5[%c0_39, %c0_40, %c0_41], %148 {strides = array<i32>} : memref<1x8x8xi32, #tpu.memory_space<vmem>>, vector<1x8x8xi32>,
    return
  }
  func.func @transform_0(%arg0: i32, %arg1: i32) -> (i32, i32, i32) {
    %c0_i32 = arith.constant 0 : i32
    %c0_i32_0 = arith.constant 0 : i32
    return %arg0, %arg1, %c0_i32 : i32, i32, i32
  }
  func.func @transform_1(%arg0: i32, %arg1: i32) -> (i32, i32, i32) {
    %c0_i32 = arith.constant 0 : i32
    %c0_i32_0 = arith.constant 0 : i32
    %c0_i32_1 = arith.constant 0 : i32
    return %arg0, %c0_i32, %c0_i32_0 : i32, i32, i32
  }
  func.func @transform_2(%arg0: i32, %arg1: i32) -> (i32, i32, i32) {
    %c0_i32 = arith.constant 0 : i32
    %c0_i32_0 = arith.constant 0 : i32
    %c0_i32_1 = arith.constant 0 : i32
    return %arg0, %c0_i32, %c0_i32_0 : i32, i32, i32
  }
  func.func @transform_3(%arg0: i32, %arg1: i32) -> (i32, i32, i32) {
    %c0_i32 = arith.constant 0 : i32
    %c0_i32_0 = arith.constant 0 : i32
    return %arg0, %arg1, %c0_i32 : i32, i32, i32
  }
}

module attributes {stable_mosaic.version = 11 : i64} {
  func.func @_ball_query_kernel(%arg0: i32, %arg1: i32, %arg2: memref<1x8x3xf32, #tpu.memory_space<vmem>>, %arg3: memref<1x3x128xf32, #tpu.memory_space<vmem>>, %arg4: memref<1x1x128xf32, #tpu.memory_space<vmem>>, %arg5: memref<1x8x8xi32, #tpu.memory_space<vmem>>) attributes {dimension_semantics = [#tpu.dimension_semantics<parallel>, #tpu.dimension_semantics<parallel>], iteration_bounds = array<i64: 2, 1>, scalar_prefetch = 0 : i64, scratch_operands = 0 : i64, tpu.core_type = #tpu.core_type<tc>, window_params = [{transform_indices = @transform_0, window_bounds = array<i64: 1, 8, 3>}, {transform_indices = @transform_1, window_bounds = array<i64: 1, 3, 128>}, {transform_indices = @transform_2, window_bounds = array<i64: 1, 1, 128>}, {transform_indices = @transform_3, window_bounds = array<i64: 1, 8, 8>}]} {
    %c0 = arith.constant 0 : index
    %c0_0 = arith.constant 0 : index
    %c0_1 = arith.constant 0 : index
    %0 = vector.load %arg2[%c0, %c0_0, %c0_1] : memref<1x8x3xf32, #tpu.memory_space<vmem>>, vector<1x8x3xf32>
    %1 = vector.shape_cast %0 : vector<1x8x3xf32> to vector<8x3xf32>
    %c0_2 = arith.constant 0 : index
    %c0_3 = arith.constant 0 : index
    %c0_4 = arith.constant 0 : index
    %2 = vector.load %arg3[%c0_2, %c0_3, %c0_4] : memref<1x3x128xf32, #tpu.memory_space<vmem>>, vector<1x3x128xf32>
    %3 = vector.shape_cast %2 : vector<1x3x128xf32> to vector<3x128xf32>
    %c0_5 = arith.constant 0 : index
    %c0_6 = arith.constant 0 : index
    %c0_7 = arith.constant 0 : index
    %4 = vector.load %arg4[%c0_5, %c0_6, %c0_7] : memref<1x1x128xf32, #tpu.memory_space<vmem>>, vector<1x1x128xf32>
    %5 = vector.shape_cast %4 : vector<1x1x128xf32> to vector<1x128xf32>
    %6 = vector.extract_strided_slice %1 {offsets = [0, 0], sizes = [8, 1], strides = [1, 1]} : vector<8x3xf32> to vector<8x1xf32>
    %7 = vector.extract_strided_slice %1 {offsets = [0, 1], sizes = [8, 1], strides = [1, 1]} : vector<8x3xf32> to vector<8x1xf32>
    %8 = vector.extract_strided_slice %1 {offsets = [0, 2], sizes = [8, 1], strides = [1, 1]} : vector<8x3xf32> to vector<8x1xf32>
    %9 = arith.mulf %6, %6 : vector<8x1xf32>
    %10 = arith.mulf %7, %7 : vector<8x1xf32>
    %11 = arith.addf %9, %10 : vector<8x1xf32>
    %12 = arith.mulf %8, %8 : vector<8x1xf32>
    %13 = arith.addf %11, %12 : vector<8x1xf32>
    %14 = vector.extract_strided_slice %3 {offsets = [0, 0], sizes = [1, 128], strides = [1, 1]} : vector<3x128xf32> to vector<1x128xf32>
    %15 = vector.broadcast %6 : vector<8x1xf32> to vector<8x128xf32>
    %16 = vector.broadcast %14 : vector<1x128xf32> to vector<8x128xf32>
    %17 = arith.mulf %15, %16 : vector<8x128xf32>
    %18 = vector.extract_strided_slice %3 {offsets = [1, 0], sizes = [1, 128], strides = [1, 1]} : vector<3x128xf32> to vector<1x128xf32>
    %19 = vector.broadcast %7 : vector<8x1xf32> to vector<8x128xf32>
    %20 = vector.broadcast %18 : vector<1x128xf32> to vector<8x128xf32>
    %21 = arith.mulf %19, %20 : vector<8x128xf32>
    %22 = arith.addf %17, %21 : vector<8x128xf32>
    %23 = vector.extract_strided_slice %3 {offsets = [2, 0], sizes = [1, 128], strides = [1, 1]} : vector<3x128xf32> to vector<1x128xf32>
    %24 = vector.broadcast %8 : vector<8x1xf32> to vector<8x128xf32>
    %25 = vector.broadcast %23 : vector<1x128xf32> to vector<8x128xf32>
    %26 = arith.mulf %24, %25 : vector<8x128xf32>
    %27 = arith.addf %22, %26 : vector<8x128xf32>
    %28 = vector.broadcast %13 : vector<8x1xf32> to vector<8x128xf32>
    %29 = vector.broadcast %5 : vector<1x128xf32> to vector<8x128xf32>
    %30 = arith.addf %28, %29 : vector<8x128xf32>
    %cst = arith.constant 2.000000e+00 : f32
    %31 = vector.broadcast %cst : f32 to vector<8x128xf32>
    %32 = arith.mulf %31, %27 : vector<8x128xf32>
    %33 = arith.subf %30, %32 : vector<8x128xf32>
    %cst_8 = arith.constant 0.000000e+00 : f32
    %34 = vector.broadcast %cst_8 : f32 to vector<8x128xf32>
    %35 = arith.maximumf %33, %34 : vector<8x128xf32>
    %36 = tpu.iota {dimensions = array<i32: 1>} : vector<8x128xi32>
    %37 = arith.sitofp %36 : vector<8x128xi32> to vector<8x128xf32>
    %cst_9 = arith.constant 8.000000e+00 : f32
    %38 = vector.broadcast %cst_9 : f32 to vector<8x128xf32>
    %39 = arith.cmpf olt, %37, %38 : vector<8x128xf32>
    %cst_10 = arith.constant 3.240000e+00 : f32
    %40 = vector.broadcast %cst_10 : f32 to vector<8x128xf32>
    %41 = arith.cmpf olt, %35, %40 : vector<8x128xf32>
    %42 = arith.andi %39, %41 : vector<8x128xi1>
    %cst_11 = arith.constant 1.000000e+09 : f32
    %43 = vector.broadcast %cst_11 : f32 to vector<8x128xf32>
    %44 = arith.select %42, %37, %43 : vector<8x128xi1>, vector<8x128xf32>
    %45 = arith.extui %42 : vector<8x128xi1> to vector<8x128xi32>
    %46 = arith.sitofp %45 : vector<8x128xi32> to vector<8x128xf32>
    %cst_12 = arith.constant dense<0.000000e+00> : vector<8xf32>
    %47 = vector.multi_reduction <add>, %46, %cst_12 [1] : vector<8x128xf32> to vector<8xf32>
    %48 = vector.shape_cast %47 : vector<8xf32> to vector<8x1xf32>
    %49 = tpu.iota {dimensions = array<i32: 1>} : vector<8x8xi32>
    %50 = arith.sitofp %49 : vector<8x8xi32> to vector<8x8xf32>
    %cst_13 = arith.constant 0.000000e+00 : f32
    %51 = vector.broadcast %cst_13 : f32 to vector<8x8xf32>
    %cst_14 = arith.constant dense<0x7F800000> : vector<8xf32>
    %52 = vector.multi_reduction <minimumf>, %44, %cst_14 [1] : vector<8x128xf32> to vector<8xf32>
    %53 = vector.shape_cast %52 : vector<8xf32> to vector<8x1xf32>
    %cst_15 = arith.constant 0.000000e+00 : f32
    %54 = vector.broadcast %cst_15 : f32 to vector<8x8xf32>
    %55 = arith.cmpf oeq, %50, %54 : vector<8x8xf32>
    %56 = vector.shape_cast %53 : vector<8x1xf32> to vector<8x1xf32>
    %57 = vector.broadcast %56 : vector<8x1xf32> to vector<8x8xf32>
    %58 = arith.select %55, %57, %51 : vector<8x8xi1>, vector<8x8xf32>
    %59 = vector.broadcast %53 : vector<8x1xf32> to vector<8x128xf32>
    %60 = arith.cmpf oeq, %37, %59 : vector<8x128xf32>
    %cst_16 = arith.constant 1.000000e+09 : f32
    %61 = vector.broadcast %cst_16 : f32 to vector<8x128xf32>
    %62 = arith.select %60, %61, %44 : vector<8x128xi1>, vector<8x128xf32>
    %cst_17 = arith.constant dense<0x7F800000> : vector<8xf32>
    %63 = vector.multi_reduction <minimumf>, %62, %cst_17 [1] : vector<8x128xf32> to vector<8xf32>
    %64 = vector.shape_cast %63 : vector<8xf32> to vector<8x1xf32>
    %cst_18 = arith.constant 1.000000e+00 : f32
    %65 = vector.broadcast %cst_18 : f32 to vector<8x8xf32>
    %66 = arith.cmpf oeq, %50, %65 : vector<8x8xf32>
    %67 = vector.shape_cast %64 : vector<8x1xf32> to vector<8x1xf32>
    %68 = vector.broadcast %67 : vector<8x1xf32> to vector<8x8xf32>
    %69 = arith.select %66, %68, %58 : vector<8x8xi1>, vector<8x8xf32>
    %70 = vector.broadcast %64 : vector<8x1xf32> to vector<8x128xf32>
    %71 = arith.cmpf oeq, %37, %70 : vector<8x128xf32>
    %cst_19 = arith.constant 1.000000e+09 : f32
    %72 = vector.broadcast %cst_19 : f32 to vector<8x128xf32>
    %73 = arith.select %71, %72, %62 : vector<8x128xi1>, vector<8x128xf32>
    %cst_20 = arith.constant dense<0x7F800000> : vector<8xf32>
    %74 = vector.multi_reduction <minimumf>, %73, %cst_20 [1] : vector<8x128xf32> to vector<8xf32>
    %75 = vector.shape_cast %74 : vector<8xf32> to vector<8x1xf32>
    %cst_21 = arith.constant 2.000000e+00 : f32
    %76 = vector.broadcast %cst_21 : f32 to vector<8x8xf32>
    %77 = arith.cmpf oeq, %50, %76 : vector<8x8xf32>
    %78 = vector.shape_cast %75 : vector<8x1xf32> to vector<8x1xf32>
    %79 = vector.broadcast %78 : vector<8x1xf32> to vector<8x8xf32>
    %80 = arith.select %77, %79, %69 : vector<8x8xi1>, vector<8x8xf32>
    %81 = vector.broadcast %75 : vector<8x1xf32> to vector<8x128xf32>
    %82 = arith.cmpf oeq, %37, %81 : vector<8x128xf32>
    %cst_22 = arith.constant 1.000000e+09 : f32
    %83 = vector.broadcast %cst_22 : f32 to vector<8x128xf32>
    %84 = arith.select %82, %83, %73 : vector<8x128xi1>, vector<8x128xf32>
    %cst_23 = arith.constant dense<0x7F800000> : vector<8xf32>
    %85 = vector.multi_reduction <minimumf>, %84, %cst_23 [1] : vector<8x128xf32> to vector<8xf32>
    %86 = vector.shape_cast %85 : vector<8xf32> to vector<8x1xf32>
    %cst_24 = arith.constant 3.000000e+00 : f32
    %87 = vector.broadcast %cst_24 : f32 to vector<8x8xf32>
    %88 = arith.cmpf oeq, %50, %87 : vector<8x8xf32>
    %89 = vector.shape_cast %86 : vector<8x1xf32> to vector<8x1xf32>
    %90 = vector.broadcast %89 : vector<8x1xf32> to vector<8x8xf32>
    %91 = arith.select %88, %90, %80 : vector<8x8xi1>, vector<8x8xf32>
    %92 = vector.broadcast %86 : vector<8x1xf32> to vector<8x128xf32>
    %93 = arith.cmpf oeq, %37, %92 : vector<8x128xf32>
    %cst_25 = arith.constant 1.000000e+09 : f32
    %94 = vector.broadcast %cst_25 : f32 to vector<8x128xf32>
    %95 = arith.select %93, %94, %84 : vector<8x128xi1>, vector<8x128xf32>
    %cst_26 = arith.constant dense<0x7F800000> : vector<8xf32>
    %96 = vector.multi_reduction <minimumf>, %95, %cst_26 [1] : vector<8x128xf32> to vector<8xf32>
    %97 = vector.shape_cast %96 : vector<8xf32> to vector<8x1xf32>
    %cst_27 = arith.constant 4.000000e+00 : f32
    %98 = vector.broadcast %cst_27 : f32 to vector<8x8xf32>
    %99 = arith.cmpf oeq, %50, %98 : vector<8x8xf32>
    %100 = vector.shape_cast %97 : vector<8x1xf32> to vector<8x1xf32>
    %101 = vector.broadcast %100 : vector<8x1xf32> to vector<8x8xf32>
    %102 = arith.select %99, %101, %91 : vector<8x8xi1>, vector<8x8xf32>
    %103 = vector.broadcast %97 : vector<8x1xf32> to vector<8x128xf32>
    %104 = arith.cmpf oeq, %37, %103 : vector<8x128xf32>
    %cst_28 = arith.constant 1.000000e+09 : f32
    %105 = vector.broadcast %cst_28 : f32 to vector<8x128xf32>
    %106 = arith.select %104, %105, %95 : vector<8x128xi1>, vector<8x128xf32>
    %cst_29 = arith.constant dense<0x7F800000> : vector<8xf32>
    %107 = vector.multi_reduction <minimumf>, %106, %cst_29 [1] : vector<8x128xf32> to vector<8xf32>
    %108 = vector.shape_cast %107 : vector<8xf32> to vector<8x1xf32>
    %cst_30 = arith.constant 5.000000e+00 : f32
    %109 = vector.broadcast %cst_30 : f32 to vector<8x8xf32>
    %110 = arith.cmpf oeq, %50, %109 : vector<8x8xf32>
    %111 = vector.shape_cast %108 : vector<8x1xf32> to vector<8x1xf32>
    %112 = vector.broadcast %111 : vector<8x1xf32> to vector<8x8xf32>
    %113 = arith.select %110, %112, %102 : vector<8x8xi1>, vector<8x8xf32>
    %114 = vector.broadcast %108 : vector<8x1xf32> to vector<8x128xf32>
    %115 = arith.cmpf oeq, %37, %114 : vector<8x128xf32>
    %cst_31 = arith.constant 1.000000e+09 : f32
    %116 = vector.broadcast %cst_31 : f32 to vector<8x128xf32>
    %117 = arith.select %115, %116, %106 : vector<8x128xi1>, vector<8x128xf32>
    %cst_32 = arith.constant dense<0x7F800000> : vector<8xf32>
    %118 = vector.multi_reduction <minimumf>, %117, %cst_32 [1] : vector<8x128xf32> to vector<8xf32>
    %119 = vector.shape_cast %118 : vector<8xf32> to vector<8x1xf32>
    %cst_33 = arith.constant 6.000000e+00 : f32
    %120 = vector.broadcast %cst_33 : f32 to vector<8x8xf32>
    %121 = arith.cmpf oeq, %50, %120 : vector<8x8xf32>
    %122 = vector.shape_cast %119 : vector<8x1xf32> to vector<8x1xf32>
    %123 = vector.broadcast %122 : vector<8x1xf32> to vector<8x8xf32>
    %124 = arith.select %121, %123, %113 : vector<8x8xi1>, vector<8x8xf32>
    %125 = vector.broadcast %119 : vector<8x1xf32> to vector<8x128xf32>
    %126 = arith.cmpf oeq, %37, %125 : vector<8x128xf32>
    %cst_34 = arith.constant 1.000000e+09 : f32
    %127 = vector.broadcast %cst_34 : f32 to vector<8x128xf32>
    %128 = arith.select %126, %127, %117 : vector<8x128xi1>, vector<8x128xf32>
    %cst_35 = arith.constant dense<0x7F800000> : vector<8xf32>
    %129 = vector.multi_reduction <minimumf>, %128, %cst_35 [1] : vector<8x128xf32> to vector<8xf32>
    %130 = vector.shape_cast %129 : vector<8xf32> to vector<8x1xf32>
    %cst_36 = arith.constant 7.000000e+00 : f32
    %131 = vector.broadcast %cst_36 : f32 to vector<8x8xf32>
    %132 = arith.cmpf oeq, %50, %131 : vector<8x8xf32>
    %133 = vector.shape_cast %130 : vector<8x1xf32> to vector<8x1xf32>
    %134 = vector.broadcast %133 : vector<8x1xf32> to vector<8x8xf32>
    %135 = arith.select %132, %134, %124 : vector<8x8xi1>, vector<8x8xf32>
    %cst_37 = arith.constant 0.000000e+00 : f32
    %136 = vector.broadcast %cst_37 : f32 to vector<8x1xf32>
    %137 = arith.cmpf ogt, %48, %136 : vector<8x1xf32>
    %cst_38 = arith.constant 0.000000e+00 : f32
    %138 = vector.broadcast %cst_38 : f32 to vector<8x1xf32>
    %139 = arith.select %137, %53, %138 : vector<8x1xi1>, vector<8x1xf32>
    %140 = vector.broadcast %48 : vector<8x1xf32> to vector<8x8xf32>
    %141 = arith.cmpf olt, %50, %140 : vector<8x8xf32>
    %142 = vector.shape_cast %139 : vector<8x1xf32> to vector<8x1xf32>
    %143 = vector.broadcast %142 : vector<8x1xf32> to vector<8x8xf32>
    %144 = arith.select %141, %135, %143 : vector<8x8xi1>, vector<8x8xf32>
    %145 = arith.fptosi %144 : vector<8x8xf32> to vector<8x8xi32>
    %c0_39 = arith.constant 0 : index
    %c0_40 = arith.constant 0 : index
    %c0_41 = arith.constant 0 : index
    %146 = vector.load %arg5[%c0_39, %c0_40, %c0_41] : memref<1x8x8xi32, #tpu.memory_space<vmem>>, vector<1x8x8xi32>
    %147 = vector.shape_cast %146 : vector<1x8x8xi32> to vector<8x8xi32>
    %148 = vector.shape_cast %145 : vector<8x8xi32> to vector<1x8x8xi32>
    tpu.vector_store %arg5[%c0_39, %c0_40, %c0_41], %148 {strides = array<i32>} : memref<1x8x8xi32, #tpu.memory_space<vmem>>, vector<1x8x8xi32>,
    return
  }
  func.func @transform_0(%arg0: i32, %arg1: i32) -> (i32, i32, i32) {
    %c0_i32 = arith.constant 0 : i32
    %c0_i32_0 = arith.constant 0 : i32
    return %arg0, %arg1, %c0_i32 : i32, i32, i32
  }
  func.func @transform_1(%arg0: i32, %arg1: i32) -> (i32, i32, i32) {
    %c0_i32 = arith.constant 0 : i32
    %c0_i32_0 = arith.constant 0 : i32
    %c0_i32_1 = arith.constant 0 : i32
    return %arg0, %c0_i32, %c0_i32_0 : i32, i32, i32
  }
  func.func @transform_2(%arg0: i32, %arg1: i32) -> (i32, i32, i32) {
    %c0_i32 = arith.constant 0 : i32
    %c0_i32_0 = arith.constant 0 : i32
    %c0_i32_1 = arith.constant 0 : i32
    return %arg0, %c0_i32, %c0_i32_0 : i32, i32, i32
  }
  func.func @transform_3(%arg0: i32, %arg1: i32) -> (i32, i32, i32) {
    %c0_i32 = arith.constant 0 : i32
    %c0_i32_0 = arith.constant 0 : i32
    return %arg0, %arg1, %c0_i32 : i32, i32, i32
  }
}

module attributes {stable_mosaic.version = 11 : i64} {
  func.func @_sa_group_kernel(%arg0: i32, %arg1: memref<8x8x128xbf16, #tpu.memory_space<vmem>>, %arg2: memref<8x3xf32, #tpu.memory_space<vmem>>, %arg3: memref<128x128xbf16, #tpu.memory_space<vmem>>, %arg4: memref<1x128xf32, #tpu.memory_space<vmem>>, %arg5: memref<128x128xbf16, #tpu.memory_space<vmem>>, %arg6: memref<1x128xf32, #tpu.memory_space<vmem>>, %arg7: memref<128x128xbf16, #tpu.memory_space<vmem>>, %arg8: memref<1x128xf32, #tpu.memory_space<vmem>>, %arg9: memref<8x128xbf16, #tpu.memory_space<vmem>>) attributes {dimension_semantics = [#tpu.dimension_semantics<parallel>], iteration_bounds = array<i64: 2>, scalar_prefetch = 0 : i64, scratch_operands = 0 : i64, tpu.core_type = #tpu.core_type<tc>, window_params = [{transform_indices = @transform_0, window_bounds = array<i64: 8, 8, 128>}, {transform_indices = @transform_1, window_bounds = array<i64: 8, 3>}, {pipeline_mode = #tpu.pipeline_mode<synchronous>, transform_indices = @transform_2, window_bounds = array<i64: 128, 128>}, {pipeline_mode = #tpu.pipeline_mode<synchronous>, transform_indices = @transform_3, window_bounds = array<i64: 1, 128>}, {pipeline_mode = #tpu.pipeline_mode<synchronous>, transform_indices = @transform_4, window_bounds = array<i64: 128, 128>}, {pipeline_mode = #tpu.pipeline_mode<synchronous>, transform_indices = @transform_5, window_bounds = array<i64: 1, 128>}, {pipeline_mode = #tpu.pipeline_mode<synchronous>, transform_indices = @transform_6, window_bounds = array<i64: 128, 128>}, {pipeline_mode = #tpu.pipeline_mode<synchronous>, transform_indices = @transform_7, window_bounds = array<i64: 1, 128>}, {transform_indices = @transform_8, window_bounds = array<i64: 8, 128>}]} {
    %c0 = arith.constant 0 : index
    %c0_0 = arith.constant 0 : index
    %c0_1 = arith.constant 0 : index
    %0 = vector.load %arg1[%c0, %c0_0, %c0_1] : memref<8x8x128xbf16, #tpu.memory_space<vmem>>, vector<8x8x128xbf16>
    %1 = vector.shape_cast %0 : vector<8x8x128xbf16> to vector<64x128xbf16>
    %c0_2 = arith.constant 0 : index
    %c0_3 = arith.constant 0 : index
    %2 = vector.load %arg3[%c0_2, %c0_3] : memref<128x128xbf16, #tpu.memory_space<vmem>>, vector<128x128xbf16>
    %c0_4 = arith.constant 0 : index
    %c0_5 = arith.constant 0 : index
    %3 = vector.load %arg4[%c0_4, %c0_5] : memref<1x128xf32, #tpu.memory_space<vmem>>, vector<1x128xf32>
    %cst = arith.constant dense<0.000000e+00> : vector<64x128xf32>
    %4 = tpu.matmul %1, %2, %cst {dimension_numbers = #tpu.dot_dimension_numbers<[1], [0], [0], [1], [0, 0, 1, 1], [], []>} : vector<64x128xbf16>, vector<128x128xbf16>, vector<64x128xf32> -> vector<64x128xf32>
    %5 = vector.broadcast %3 : vector<1x128xf32> to vector<64x128xf32>
    %6 = arith.addf %4, %5 : vector<64x128xf32>
    %c0_6 = arith.constant 0 : index
    %c0_7 = arith.constant 0 : index
    %7 = vector.load %arg2[%c0_6, %c0_7] : memref<8x3xf32, #tpu.memory_space<vmem>>, vector<8x3xf32>
    %8 = arith.extf %2 : vector<128x128xbf16> to vector<128x128xf32>
    %9 = vector.extract_strided_slice %7 {offsets = [0, 0], sizes = [8, 1], strides = [1, 1]} : vector<8x3xf32> to vector<8x1xf32>
    %10 = vector.extract_strided_slice %8 {offsets = [0, 0], sizes = [1, 128], strides = [1, 1]} : vector<128x128xf32> to vector<1x128xf32>
    %11 = vector.broadcast %9 : vector<8x1xf32> to vector<8x128xf32>
    %12 = vector.broadcast %10 : vector<1x128xf32> to vector<8x128xf32>
    %13 = arith.mulf %11, %12 : vector<8x128xf32>
    %14 = vector.extract_strided_slice %7 {offsets = [0, 1], sizes = [8, 1], strides = [1, 1]} : vector<8x3xf32> to vector<8x1xf32>
    %15 = vector.extract_strided_slice %8 {offsets = [1, 0], sizes = [1, 128], strides = [1, 1]} : vector<128x128xf32> to vector<1x128xf32>
    %16 = vector.broadcast %14 : vector<8x1xf32> to vector<8x128xf32>
    %17 = vector.broadcast %15 : vector<1x128xf32> to vector<8x128xf32>
    %18 = arith.mulf %16, %17 : vector<8x128xf32>
    %19 = arith.addf %13, %18 : vector<8x128xf32>
    %20 = vector.extract_strided_slice %7 {offsets = [0, 2], sizes = [8, 1], strides = [1, 1]} : vector<8x3xf32> to vector<8x1xf32>
    %21 = vector.extract_strided_slice %8 {offsets = [2, 0], sizes = [1, 128], strides = [1, 1]} : vector<128x128xf32> to vector<1x128xf32>
    %22 = vector.broadcast %20 : vector<8x1xf32> to vector<8x128xf32>
    %23 = vector.broadcast %21 : vector<1x128xf32> to vector<8x128xf32>
    %24 = arith.mulf %22, %23 : vector<8x128xf32>
    %25 = arith.addf %19, %24 : vector<8x128xf32>
    %26 = vector.shape_cast %6 : vector<64x128xf32> to vector<8x8x128xf32>
    %27 = vector.shape_cast %25 : vector<8x128xf32> to vector<8x1x128xf32>
    %28 = vector.broadcast %27 : vector<8x1x128xf32> to vector<8x8x128xf32>
    %29 = arith.subf %26, %28 : vector<8x8x128xf32>
    %cst_8 = arith.constant 0.000000e+00 : f32
    %30 = vector.broadcast %cst_8 : f32 to vector<8x8x128xf32>
    %31 = arith.maximumf %29, %30 : vector<8x8x128xf32>
    %32 = vector.shape_cast %31 : vector<8x8x128xf32> to vector<64x128xf32>
    %c0_9 = arith.constant 0 : index
    %c0_10 = arith.constant 0 : index
    %33 = vector.load %arg5[%c0_9, %c0_10] : memref<128x128xbf16, #tpu.memory_space<vmem>>, vector<128x128xbf16>
    %c0_11 = arith.constant 0 : index
    %c0_12 = arith.constant 0 : index
    %34 = vector.load %arg6[%c0_11, %c0_12] : memref<1x128xf32, #tpu.memory_space<vmem>>, vector<1x128xf32>
    %35 = arith.truncf %32 : vector<64x128xf32> to vector<64x128xbf16>
    %cst_13 = arith.constant dense<0.000000e+00> : vector<64x128xf32>
    %36 = tpu.matmul %35, %33, %cst_13 {dimension_numbers = #tpu.dot_dimension_numbers<[1], [0], [0], [1], [0, 0, 1, 1], [], []>} : vector<64x128xbf16>, vector<128x128xbf16>, vector<64x128xf32> -> vector<64x128xf32>
    %37 = vector.broadcast %34 : vector<1x128xf32> to vector<64x128xf32>
    %38 = arith.addf %36, %37 : vector<64x128xf32>
    %cst_14 = arith.constant 0.000000e+00 : f32
    %39 = vector.broadcast %cst_14 : f32 to vector<64x128xf32>
    %40 = arith.maximumf %38, %39 : vector<64x128xf32>
    %c0_15 = arith.constant 0 : index
    %c0_16 = arith.constant 0 : index
    %41 = vector.load %arg7[%c0_15, %c0_16] : memref<128x128xbf16, #tpu.memory_space<vmem>>, vector<128x128xbf16>
    %c0_17 = arith.constant 0 : index
    %c0_18 = arith.constant 0 : index
    %42 = vector.load %arg8[%c0_17, %c0_18] : memref<1x128xf32, #tpu.memory_space<vmem>>, vector<1x128xf32>
    %43 = arith.truncf %40 : vector<64x128xf32> to vector<64x128xbf16>
    %cst_19 = arith.constant dense<0.000000e+00> : vector<64x128xf32>
    %44 = tpu.matmul %43, %41, %cst_19 {dimension_numbers = #tpu.dot_dimension_numbers<[1], [0], [0], [1], [0, 0, 1, 1], [], []>} : vector<64x128xbf16>, vector<128x128xbf16>, vector<64x128xf32> -> vector<64x128xf32>
    %45 = vector.broadcast %42 : vector<1x128xf32> to vector<64x128xf32>
    %46 = arith.addf %44, %45 : vector<64x128xf32>
    %cst_20 = arith.constant 0.000000e+00 : f32
    %47 = vector.broadcast %cst_20 : f32 to vector<64x128xf32>
    %48 = arith.maximumf %46, %47 : vector<64x128xf32>
    %49 = vector.shape_cast %48 : vector<64x128xf32> to vector<8x8x128xf32>
    %cst_21 = arith.constant dense<0xFF800000> : vector<8x128xf32>
    %50 = vector.multi_reduction <maximumf>, %49, %cst_21 [1] : vector<8x8x128xf32> to vector<8x128xf32>
    %51 = arith.truncf %50 : vector<8x128xf32> to vector<8x128xbf16>
    %c0_22 = arith.constant 0 : index
    %c0_23 = arith.constant 0 : index
    %52 = vector.load %arg9[%c0_22, %c0_23] : memref<8x128xbf16, #tpu.memory_space<vmem>>, vector<8x128xbf16>
    tpu.vector_store %arg9[%c0_22, %c0_23], %51 {strides = array<i32>} : memref<8x128xbf16, #tpu.memory_space<vmem>>, vector<8x128xbf16>,
    return
  }
  func.func @transform_0(%arg0: i32) -> (i32, i32, i32) {
    %c0_i32 = arith.constant 0 : i32
    %c0_i32_0 = arith.constant 0 : i32
    %c0_i32_1 = arith.constant 0 : i32
    return %arg0, %c0_i32, %c0_i32_0 : i32, i32, i32
  }
  func.func @transform_1(%arg0: i32) -> (i32, i32) {
    %c0_i32 = arith.constant 0 : i32
    %c0_i32_0 = arith.constant 0 : i32
    return %arg0, %c0_i32 : i32, i32
  }
  func.func @transform_2(%arg0: i32) -> (i32, i32) {
    %c0_i32 = arith.constant 0 : i32
    %c0_i32_0 = arith.constant 0 : i32
    %c0_i32_1 = arith.constant 0 : i32
    return %c0_i32, %c0_i32_0 : i32, i32
  }
  func.func @transform_3(%arg0: i32) -> (i32, i32) {
    %c0_i32 = arith.constant 0 : i32
    %c0_i32_0 = arith.constant 0 : i32
    %c0_i32_1 = arith.constant 0 : i32
    return %c0_i32, %c0_i32_0 : i32, i32
  }
  func.func @transform_4(%arg0: i32) -> (i32, i32) {
    %c0_i32 = arith.constant 0 : i32
    %c0_i32_0 = arith.constant 0 : i32
    %c0_i32_1 = arith.constant 0 : i32
    return %c0_i32, %c0_i32_0 : i32, i32
  }
  func.func @transform_5(%arg0: i32) -> (i32, i32) {
    %c0_i32 = arith.constant 0 : i32
    %c0_i32_0 = arith.constant 0 : i32
    %c0_i32_1 = arith.constant 0 : i32
    return %c0_i32, %c0_i32_0 : i32, i32
  }
  func.func @transform_6(%arg0: i32) -> (i32, i32) {
    %c0_i32 = arith.constant 0 : i32
    %c0_i32_0 = arith.constant 0 : i32
    %c0_i32_1 = arith.constant 0 : i32
    return %c0_i32, %c0_i32_0 : i32, i32
  }
  func.func @transform_7(%arg0: i32) -> (i32, i32) {
    %c0_i32 = arith.constant 0 : i32
    %c0_i32_0 = arith.constant 0 : i32
    %c0_i32_1 = arith.constant 0 : i32
    return %c0_i32, %c0_i32_0 : i32, i32
  }
  func.func @transform_8(%arg0: i32) -> (i32, i32) {
    %c0_i32 = arith.constant 0 : i32
    %c0_i32_0 = arith.constant 0 : i32
    return %arg0, %c0_i32 : i32, i32
  }
}

module attributes {stable_mosaic.version = 11 : i64} {
  func.func @_sa_group_kernel(%arg0: i32, %arg1: memref<8x8x128xbf16, #tpu.memory_space<vmem>>, %arg2: memref<8x3xf32, #tpu.memory_space<vmem>>, %arg3: memref<128x128xbf16, #tpu.memory_space<vmem>>, %arg4: memref<1x128xf32, #tpu.memory_space<vmem>>, %arg5: memref<128x128xbf16, #tpu.memory_space<vmem>>, %arg6: memref<1x128xf32, #tpu.memory_space<vmem>>, %arg7: memref<128x128xbf16, #tpu.memory_space<vmem>>, %arg8: memref<1x128xf32, #tpu.memory_space<vmem>>, %arg9: memref<8x128xbf16, #tpu.memory_space<vmem>>) attributes {dimension_semantics = [#tpu.dimension_semantics<parallel>], iteration_bounds = array<i64: 1>, scalar_prefetch = 0 : i64, scratch_operands = 0 : i64, tpu.core_type = #tpu.core_type<tc>, window_params = [{transform_indices = @transform_0, window_bounds = array<i64: 8, 8, 128>}, {transform_indices = @transform_1, window_bounds = array<i64: 8, 3>}, {pipeline_mode = #tpu.pipeline_mode<synchronous>, transform_indices = @transform_2, window_bounds = array<i64: 128, 128>}, {pipeline_mode = #tpu.pipeline_mode<synchronous>, transform_indices = @transform_3, window_bounds = array<i64: 1, 128>}, {pipeline_mode = #tpu.pipeline_mode<synchronous>, transform_indices = @transform_4, window_bounds = array<i64: 128, 128>}, {pipeline_mode = #tpu.pipeline_mode<synchronous>, transform_indices = @transform_5, window_bounds = array<i64: 1, 128>}, {pipeline_mode = #tpu.pipeline_mode<synchronous>, transform_indices = @transform_6, window_bounds = array<i64: 128, 128>}, {pipeline_mode = #tpu.pipeline_mode<synchronous>, transform_indices = @transform_7, window_bounds = array<i64: 1, 128>}, {transform_indices = @transform_8, window_bounds = array<i64: 8, 128>}]} {
    %c0 = arith.constant 0 : index
    %c0_0 = arith.constant 0 : index
    %c0_1 = arith.constant 0 : index
    %0 = vector.load %arg1[%c0, %c0_0, %c0_1] : memref<8x8x128xbf16, #tpu.memory_space<vmem>>, vector<8x8x128xbf16>
    %1 = vector.shape_cast %0 : vector<8x8x128xbf16> to vector<64x128xbf16>
    %c0_2 = arith.constant 0 : index
    %c0_3 = arith.constant 0 : index
    %2 = vector.load %arg3[%c0_2, %c0_3] : memref<128x128xbf16, #tpu.memory_space<vmem>>, vector<128x128xbf16>
    %c0_4 = arith.constant 0 : index
    %c0_5 = arith.constant 0 : index
    %3 = vector.load %arg4[%c0_4, %c0_5] : memref<1x128xf32, #tpu.memory_space<vmem>>, vector<1x128xf32>
    %cst = arith.constant dense<0.000000e+00> : vector<64x128xf32>
    %4 = tpu.matmul %1, %2, %cst {dimension_numbers = #tpu.dot_dimension_numbers<[1], [0], [0], [1], [0, 0, 1, 1], [], []>} : vector<64x128xbf16>, vector<128x128xbf16>, vector<64x128xf32> -> vector<64x128xf32>
    %5 = vector.broadcast %3 : vector<1x128xf32> to vector<64x128xf32>
    %6 = arith.addf %4, %5 : vector<64x128xf32>
    %c0_6 = arith.constant 0 : index
    %c0_7 = arith.constant 0 : index
    %7 = vector.load %arg2[%c0_6, %c0_7] : memref<8x3xf32, #tpu.memory_space<vmem>>, vector<8x3xf32>
    %8 = arith.extf %2 : vector<128x128xbf16> to vector<128x128xf32>
    %9 = vector.extract_strided_slice %7 {offsets = [0, 0], sizes = [8, 1], strides = [1, 1]} : vector<8x3xf32> to vector<8x1xf32>
    %10 = vector.extract_strided_slice %8 {offsets = [0, 0], sizes = [1, 128], strides = [1, 1]} : vector<128x128xf32> to vector<1x128xf32>
    %11 = vector.broadcast %9 : vector<8x1xf32> to vector<8x128xf32>
    %12 = vector.broadcast %10 : vector<1x128xf32> to vector<8x128xf32>
    %13 = arith.mulf %11, %12 : vector<8x128xf32>
    %14 = vector.extract_strided_slice %7 {offsets = [0, 1], sizes = [8, 1], strides = [1, 1]} : vector<8x3xf32> to vector<8x1xf32>
    %15 = vector.extract_strided_slice %8 {offsets = [1, 0], sizes = [1, 128], strides = [1, 1]} : vector<128x128xf32> to vector<1x128xf32>
    %16 = vector.broadcast %14 : vector<8x1xf32> to vector<8x128xf32>
    %17 = vector.broadcast %15 : vector<1x128xf32> to vector<8x128xf32>
    %18 = arith.mulf %16, %17 : vector<8x128xf32>
    %19 = arith.addf %13, %18 : vector<8x128xf32>
    %20 = vector.extract_strided_slice %7 {offsets = [0, 2], sizes = [8, 1], strides = [1, 1]} : vector<8x3xf32> to vector<8x1xf32>
    %21 = vector.extract_strided_slice %8 {offsets = [2, 0], sizes = [1, 128], strides = [1, 1]} : vector<128x128xf32> to vector<1x128xf32>
    %22 = vector.broadcast %20 : vector<8x1xf32> to vector<8x128xf32>
    %23 = vector.broadcast %21 : vector<1x128xf32> to vector<8x128xf32>
    %24 = arith.mulf %22, %23 : vector<8x128xf32>
    %25 = arith.addf %19, %24 : vector<8x128xf32>
    %26 = vector.shape_cast %6 : vector<64x128xf32> to vector<8x8x128xf32>
    %27 = vector.shape_cast %25 : vector<8x128xf32> to vector<8x1x128xf32>
    %28 = vector.broadcast %27 : vector<8x1x128xf32> to vector<8x8x128xf32>
    %29 = arith.subf %26, %28 : vector<8x8x128xf32>
    %cst_8 = arith.constant 0.000000e+00 : f32
    %30 = vector.broadcast %cst_8 : f32 to vector<8x8x128xf32>
    %31 = arith.maximumf %29, %30 : vector<8x8x128xf32>
    %32 = vector.shape_cast %31 : vector<8x8x128xf32> to vector<64x128xf32>
    %c0_9 = arith.constant 0 : index
    %c0_10 = arith.constant 0 : index
    %33 = vector.load %arg5[%c0_9, %c0_10] : memref<128x128xbf16, #tpu.memory_space<vmem>>, vector<128x128xbf16>
    %c0_11 = arith.constant 0 : index
    %c0_12 = arith.constant 0 : index
    %34 = vector.load %arg6[%c0_11, %c0_12] : memref<1x128xf32, #tpu.memory_space<vmem>>, vector<1x128xf32>
    %35 = arith.truncf %32 : vector<64x128xf32> to vector<64x128xbf16>
    %cst_13 = arith.constant dense<0.000000e+00> : vector<64x128xf32>
    %36 = tpu.matmul %35, %33, %cst_13 {dimension_numbers = #tpu.dot_dimension_numbers<[1], [0], [0], [1], [0, 0, 1, 1], [], []>} : vector<64x128xbf16>, vector<128x128xbf16>, vector<64x128xf32> -> vector<64x128xf32>
    %37 = vector.broadcast %34 : vector<1x128xf32> to vector<64x128xf32>
    %38 = arith.addf %36, %37 : vector<64x128xf32>
    %cst_14 = arith.constant 0.000000e+00 : f32
    %39 = vector.broadcast %cst_14 : f32 to vector<64x128xf32>
    %40 = arith.maximumf %38, %39 : vector<64x128xf32>
    %c0_15 = arith.constant 0 : index
    %c0_16 = arith.constant 0 : index
    %41 = vector.load %arg7[%c0_15, %c0_16] : memref<128x128xbf16, #tpu.memory_space<vmem>>, vector<128x128xbf16>
    %c0_17 = arith.constant 0 : index
    %c0_18 = arith.constant 0 : index
    %42 = vector.load %arg8[%c0_17, %c0_18] : memref<1x128xf32, #tpu.memory_space<vmem>>, vector<1x128xf32>
    %43 = arith.truncf %40 : vector<64x128xf32> to vector<64x128xbf16>
    %cst_19 = arith.constant dense<0.000000e+00> : vector<64x128xf32>
    %44 = tpu.matmul %43, %41, %cst_19 {dimension_numbers = #tpu.dot_dimension_numbers<[1], [0], [0], [1], [0, 0, 1, 1], [], []>} : vector<64x128xbf16>, vector<128x128xbf16>, vector<64x128xf32> -> vector<64x128xf32>
    %45 = vector.broadcast %42 : vector<1x128xf32> to vector<64x128xf32>
    %46 = arith.addf %44, %45 : vector<64x128xf32>
    %cst_20 = arith.constant 0.000000e+00 : f32
    %47 = vector.broadcast %cst_20 : f32 to vector<64x128xf32>
    %48 = arith.maximumf %46, %47 : vector<64x128xf32>
    %49 = vector.shape_cast %48 : vector<64x128xf32> to vector<8x8x128xf32>
    %cst_21 = arith.constant dense<0xFF800000> : vector<8x128xf32>
    %50 = vector.multi_reduction <maximumf>, %49, %cst_21 [1] : vector<8x8x128xf32> to vector<8x128xf32>
    %51 = arith.truncf %50 : vector<8x128xf32> to vector<8x128xbf16>
    %c0_22 = arith.constant 0 : index
    %c0_23 = arith.constant 0 : index
    %52 = vector.load %arg9[%c0_22, %c0_23] : memref<8x128xbf16, #tpu.memory_space<vmem>>, vector<8x128xbf16>
    tpu.vector_store %arg9[%c0_22, %c0_23], %51 {strides = array<i32>} : memref<8x128xbf16, #tpu.memory_space<vmem>>, vector<8x128xbf16>,
    return
  }
  func.func @transform_0(%arg0: i32) -> (i32, i32, i32) {
    %c0_i32 = arith.constant 0 : i32
    %c0_i32_0 = arith.constant 0 : i32
    %c0_i32_1 = arith.constant 0 : i32
    return %arg0, %c0_i32, %c0_i32_0 : i32, i32, i32
  }
  func.func @transform_1(%arg0: i32) -> (i32, i32) {
    %c0_i32 = arith.constant 0 : i32
    %c0_i32_0 = arith.constant 0 : i32
    return %arg0, %c0_i32 : i32, i32
  }
  func.func @transform_2(%arg0: i32) -> (i32, i32) {
    %c0_i32 = arith.constant 0 : i32
    %c0_i32_0 = arith.constant 0 : i32
    %c0_i32_1 = arith.constant 0 : i32
    return %c0_i32, %c0_i32_0 : i32, i32
  }
  func.func @transform_3(%arg0: i32) -> (i32, i32) {
    %c0_i32 = arith.constant 0 : i32
    %c0_i32_0 = arith.constant 0 : i32
    %c0_i32_1 = arith.constant 0 : i32
    return %c0_i32, %c0_i32_0 : i32, i32
  }
  func.func @transform_4(%arg0: i32) -> (i32, i32) {
    %c0_i32 = arith.constant 0 : i32
    %c0_i32_0 = arith.constant 0 : i32
    %c0_i32_1 = arith.constant 0 : i32
    return %c0_i32, %c0_i32_0 : i32, i32
  }
  func.func @transform_5(%arg0: i32) -> (i32, i32) {
    %c0_i32 = arith.constant 0 : i32
    %c0_i32_0 = arith.constant 0 : i32
    %c0_i32_1 = arith.constant 0 : i32
    return %c0_i32, %c0_i32_0 : i32, i32
  }
  func.func @transform_6(%arg0: i32) -> (i32, i32) {
    %c0_i32 = arith.constant 0 : i32
    %c0_i32_0 = arith.constant 0 : i32
    %c0_i32_1 = arith.constant 0 : i32
    return %c0_i32, %c0_i32_0 : i32, i32
  }
  func.func @transform_7(%arg0: i32) -> (i32, i32) {
    %c0_i32 = arith.constant 0 : i32
    %c0_i32_0 = arith.constant 0 : i32
    %c0_i32_1 = arith.constant 0 : i32
    return %c0_i32, %c0_i32_0 : i32, i32
  }
  func.func @transform_8(%arg0: i32) -> (i32, i32) {
    %c0_i32 = arith.constant 0 : i32
    %c0_i32_0 = arith.constant 0 : i32
    return %arg0, %c0_i32 : i32, i32
  }
}

module attributes {stable_mosaic.version = 11 : i64} {
  func.func @_fp_fused_kernel(%arg0: i32, %arg1: i32, %arg2: memref<1x16x3xf32, #tpu.memory_space<vmem>>, %arg3: memref<1x3x128xf32, #tpu.memory_space<vmem>>, %arg4: memref<1x1x128xf32, #tpu.memory_space<vmem>>, %arg5: memref<1x128x128xbf16, #tpu.memory_space<vmem>>, %arg6: memref<1x16x128xbf16, #tpu.memory_space<vmem>>, %arg7: memref<128x128xbf16, #tpu.memory_space<vmem>>, %arg8: memref<128x128xbf16, #tpu.memory_space<vmem>>, %arg9: memref<1x128xf32, #tpu.memory_space<vmem>>, %arg10: memref<128x128xbf16, #tpu.memory_space<vmem>>, %arg11: memref<1x128xf32, #tpu.memory_space<vmem>>, %arg12: memref<1x16x128xbf16, #tpu.memory_space<vmem>>) attributes {dimension_semantics = [#tpu.dimension_semantics<parallel>, #tpu.dimension_semantics<parallel>], iteration_bounds = array<i64: 2, 2>, scalar_prefetch = 0 : i64, scratch_operands = 0 : i64, tpu.core_type = #tpu.core_type<tc>, window_params = [{transform_indices = @transform_0, window_bounds = array<i64: 1, 16, 3>}, {transform_indices = @transform_1, window_bounds = array<i64: 1, 3, 128>}, {transform_indices = @transform_2, window_bounds = array<i64: 1, 1, 128>}, {transform_indices = @transform_3, window_bounds = array<i64: 1, 128, 128>}, {transform_indices = @transform_4, window_bounds = array<i64: 1, 16, 128>}, {pipeline_mode = #tpu.pipeline_mode<synchronous>, transform_indices = @transform_5, window_bounds = array<i64: 128, 128>}, {pipeline_mode = #tpu.pipeline_mode<synchronous>, transform_indices = @transform_6, window_bounds = array<i64: 128, 128>}, {pipeline_mode = #tpu.pipeline_mode<synchronous>, transform_indices = @transform_7, window_bounds = array<i64: 1, 128>}, {pipeline_mode = #tpu.pipeline_mode<synchronous>, transform_indices = @transform_8, window_bounds = array<i64: 128, 128>}, {pipeline_mode = #tpu.pipeline_mode<synchronous>, transform_indices = @transform_9, window_bounds = array<i64: 1, 128>}, {transform_indices = @transform_10, window_bounds = array<i64: 1, 16, 128>}]} {
    %c0 = arith.constant 0 : index
    %c0_0 = arith.constant 0 : index
    %c0_1 = arith.constant 0 : index
    %0 = vector.load %arg2[%c0, %c0_0, %c0_1] : memref<1x16x3xf32, #tpu.memory_space<vmem>>, vector<1x16x3xf32>
    %1 = vector.shape_cast %0 : vector<1x16x3xf32> to vector<16x3xf32>
    %c0_2 = arith.constant 0 : index
    %c0_3 = arith.constant 0 : index
    %c0_4 = arith.constant 0 : index
    %2 = vector.load %arg3[%c0_2, %c0_3, %c0_4] : memref<1x3x128xf32, #tpu.memory_space<vmem>>, vector<1x3x128xf32>
    %3 = vector.shape_cast %2 : vector<1x3x128xf32> to vector<3x128xf32>
    %c0_5 = arith.constant 0 : index
    %c0_6 = arith.constant 0 : index
    %c0_7 = arith.constant 0 : index
    %4 = vector.load %arg4[%c0_5, %c0_6, %c0_7] : memref<1x1x128xf32, #tpu.memory_space<vmem>>, vector<1x1x128xf32>
    %5 = vector.shape_cast %4 : vector<1x1x128xf32> to vector<1x128xf32>
    %6 = vector.extract_strided_slice %1 {offsets = [0, 0], sizes = [16, 1], strides = [1, 1]} : vector<16x3xf32> to vector<16x1xf32>
    %7 = vector.extract_strided_slice %1 {offsets = [0, 1], sizes = [16, 1], strides = [1, 1]} : vector<16x3xf32> to vector<16x1xf32>
    %8 = vector.extract_strided_slice %1 {offsets = [0, 2], sizes = [16, 1], strides = [1, 1]} : vector<16x3xf32> to vector<16x1xf32>
    %9 = arith.mulf %6, %6 : vector<16x1xf32>
    %10 = arith.mulf %7, %7 : vector<16x1xf32>
    %11 = arith.addf %9, %10 : vector<16x1xf32>
    %12 = arith.mulf %8, %8 : vector<16x1xf32>
    %13 = arith.addf %11, %12 : vector<16x1xf32>
    %14 = vector.extract_strided_slice %3 {offsets = [0, 0], sizes = [1, 128], strides = [1, 1]} : vector<3x128xf32> to vector<1x128xf32>
    %15 = vector.broadcast %6 : vector<16x1xf32> to vector<16x128xf32>
    %16 = vector.broadcast %14 : vector<1x128xf32> to vector<16x128xf32>
    %17 = arith.mulf %15, %16 : vector<16x128xf32>
    %18 = vector.extract_strided_slice %3 {offsets = [1, 0], sizes = [1, 128], strides = [1, 1]} : vector<3x128xf32> to vector<1x128xf32>
    %19 = vector.broadcast %7 : vector<16x1xf32> to vector<16x128xf32>
    %20 = vector.broadcast %18 : vector<1x128xf32> to vector<16x128xf32>
    %21 = arith.mulf %19, %20 : vector<16x128xf32>
    %22 = arith.addf %17, %21 : vector<16x128xf32>
    %23 = vector.extract_strided_slice %3 {offsets = [2, 0], sizes = [1, 128], strides = [1, 1]} : vector<3x128xf32> to vector<1x128xf32>
    %24 = vector.broadcast %8 : vector<16x1xf32> to vector<16x128xf32>
    %25 = vector.broadcast %23 : vector<1x128xf32> to vector<16x128xf32>
    %26 = arith.mulf %24, %25 : vector<16x128xf32>
    %27 = arith.addf %22, %26 : vector<16x128xf32>
    %28 = vector.broadcast %13 : vector<16x1xf32> to vector<16x128xf32>
    %29 = vector.broadcast %5 : vector<1x128xf32> to vector<16x128xf32>
    %30 = arith.addf %28, %29 : vector<16x128xf32>
    %cst = arith.constant 2.000000e+00 : f32
    %31 = vector.broadcast %cst : f32 to vector<16x128xf32>
    %32 = arith.mulf %31, %27 : vector<16x128xf32>
    %33 = arith.subf %30, %32 : vector<16x128xf32>
    %cst_8 = arith.constant 0.000000e+00 : f32
    %34 = vector.broadcast %cst_8 : f32 to vector<16x128xf32>
    %35 = arith.maximumf %33, %34 : vector<16x128xf32>
    %36 = tpu.iota {dimensions = array<i32: 1>} : vector<16x128xi32>
    %37 = arith.sitofp %36 : vector<16x128xi32> to vector<16x128xf32>
    %cst_9 = arith.constant 8.000000e+00 : f32
    %38 = vector.broadcast %cst_9 : f32 to vector<16x128xf32>
    %39 = arith.cmpf olt, %37, %38 : vector<16x128xf32>
    %cst_10 = arith.constant 1.000000e+30 : f32
    %40 = vector.broadcast %cst_10 : f32 to vector<16x128xf32>
    %41 = arith.select %39, %35, %40 : vector<16x128xi1>, vector<16x128xf32>
    %cst_11 = arith.constant 0.000000e+00 : f32
    %42 = vector.broadcast %cst_11 : f32 to vector<16x128xf32>
    %cst_12 = arith.constant 0.000000e+00 : f32
    %43 = vector.broadcast %cst_12 : f32 to vector<16x1xf32>
    %cst_13 = arith.constant dense<0x7F800000> : vector<16xf32>
    %44 = vector.multi_reduction <minimumf>, %41, %cst_13 [1] : vector<16x128xf32> to vector<16xf32>
    %45 = vector.shape_cast %44 : vector<16xf32> to vector<16x1xf32>
    %46 = vector.broadcast %45 : vector<16x1xf32> to vector<16x128xf32>
    %47 = arith.cmpf ole, %41, %46 : vector<16x128xf32>
    %cst_14 = arith.constant 1.000000e+30 : f32
    %48 = vector.broadcast %cst_14 : f32 to vector<16x128xf32>
    %49 = arith.select %47, %37, %48 : vector<16x128xi1>, vector<16x128xf32>
    %cst_15 = arith.constant dense<0x7F800000> : vector<16xf32>
    %50 = vector.multi_reduction <minimumf>, %49, %cst_15 [1] : vector<16x128xf32> to vector<16xf32>
    %51 = vector.shape_cast %50 : vector<16xf32> to vector<16x1xf32>
    %52 = vector.broadcast %51 : vector<16x1xf32> to vector<16x128xf32>
    %53 = arith.cmpf oeq, %37, %52 : vector<16x128xf32>
    %54 = arith.extui %53 : vector<16x128xi1> to vector<16x128xi32>
    %55 = arith.sitofp %54 : vector<16x128xi32> to vector<16x128xf32>
    %cst_16 = arith.constant 9.99999993E-9 : f32
    %56 = vector.broadcast %cst_16 : f32 to vector<16x1xf32>
    %57 = arith.addf %45, %56 : vector<16x1xf32>
    %cst_17 = arith.constant 1.000000e+00 : f32
    %58 = vector.broadcast %cst_17 : f32 to vector<16x1xf32>
    %59 = arith.divf %58, %57 : vector<16x1xf32>
    %60 = vector.broadcast %59 : vector<16x1xf32> to vector<16x128xf32>
    %61 = arith.mulf %55, %60 : vector<16x128xf32>
    %62 = arith.addf %42, %61 : vector<16x128xf32>
    %63 = arith.addf %43, %59 : vector<16x1xf32>
    %cst_18 = arith.constant 0.000000e+00 : f32
    %64 = vector.broadcast %cst_18 : f32 to vector<16x128xf32>
    %65 = arith.cmpf ogt, %55, %64 : vector<16x128xf32>
    %cst_19 = arith.constant 1.000000e+30 : f32
    %66 = vector.broadcast %cst_19 : f32 to vector<16x128xf32>
    %67 = arith.select %65, %66, %41 : vector<16x128xi1>, vector<16x128xf32>
    %cst_20 = arith.constant dense<0x7F800000> : vector<16xf32>
    %68 = vector.multi_reduction <minimumf>, %67, %cst_20 [1] : vector<16x128xf32> to vector<16xf32>
    %69 = vector.shape_cast %68 : vector<16xf32> to vector<16x1xf32>
    %70 = vector.broadcast %69 : vector<16x1xf32> to vector<16x128xf32>
    %71 = arith.cmpf ole, %67, %70 : vector<16x128xf32>
    %cst_21 = arith.constant 1.000000e+30 : f32
    %72 = vector.broadcast %cst_21 : f32 to vector<16x128xf32>
    %73 = arith.select %71, %37, %72 : vector<16x128xi1>, vector<16x128xf32>
    %cst_22 = arith.constant dense<0x7F800000> : vector<16xf32>
    %74 = vector.multi_reduction <minimumf>, %73, %cst_22 [1] : vector<16x128xf32> to vector<16xf32>
    %75 = vector.shape_cast %74 : vector<16xf32> to vector<16x1xf32>
    %76 = vector.broadcast %75 : vector<16x1xf32> to vector<16x128xf32>
    %77 = arith.cmpf oeq, %37, %76 : vector<16x128xf32>
    %78 = arith.extui %77 : vector<16x128xi1> to vector<16x128xi32>
    %79 = arith.sitofp %78 : vector<16x128xi32> to vector<16x128xf32>
    %cst_23 = arith.constant 9.99999993E-9 : f32
    %80 = vector.broadcast %cst_23 : f32 to vector<16x1xf32>
    %81 = arith.addf %69, %80 : vector<16x1xf32>
    %cst_24 = arith.constant 1.000000e+00 : f32
    %82 = vector.broadcast %cst_24 : f32 to vector<16x1xf32>
    %83 = arith.divf %82, %81 : vector<16x1xf32>
    %84 = vector.broadcast %83 : vector<16x1xf32> to vector<16x128xf32>
    %85 = arith.mulf %79, %84 : vector<16x128xf32>
    %86 = arith.addf %62, %85 : vector<16x128xf32>
    %87 = arith.addf %63, %83 : vector<16x1xf32>
    %cst_25 = arith.constant 0.000000e+00 : f32
    %88 = vector.broadcast %cst_25 : f32 to vector<16x128xf32>
    %89 = arith.cmpf ogt, %79, %88 : vector<16x128xf32>
    %cst_26 = arith.constant 1.000000e+30 : f32
    %90 = vector.broadcast %cst_26 : f32 to vector<16x128xf32>
    %91 = arith.select %89, %90, %67 : vector<16x128xi1>, vector<16x128xf32>
    %cst_27 = arith.constant dense<0x7F800000> : vector<16xf32>
    %92 = vector.multi_reduction <minimumf>, %91, %cst_27 [1] : vector<16x128xf32> to vector<16xf32>
    %93 = vector.shape_cast %92 : vector<16xf32> to vector<16x1xf32>
    %94 = vector.broadcast %93 : vector<16x1xf32> to vector<16x128xf32>
    %95 = arith.cmpf ole, %91, %94 : vector<16x128xf32>
    %cst_28 = arith.constant 1.000000e+30 : f32
    %96 = vector.broadcast %cst_28 : f32 to vector<16x128xf32>
    %97 = arith.select %95, %37, %96 : vector<16x128xi1>, vector<16x128xf32>
    %cst_29 = arith.constant dense<0x7F800000> : vector<16xf32>
    %98 = vector.multi_reduction <minimumf>, %97, %cst_29 [1] : vector<16x128xf32> to vector<16xf32>
    %99 = vector.shape_cast %98 : vector<16xf32> to vector<16x1xf32>
    %100 = vector.broadcast %99 : vector<16x1xf32> to vector<16x128xf32>
    %101 = arith.cmpf oeq, %37, %100 : vector<16x128xf32>
    %102 = arith.extui %101 : vector<16x128xi1> to vector<16x128xi32>
    %103 = arith.sitofp %102 : vector<16x128xi32> to vector<16x128xf32>
    %cst_30 = arith.constant 9.99999993E-9 : f32
    %104 = vector.broadcast %cst_30 : f32 to vector<16x1xf32>
    %105 = arith.addf %93, %104 : vector<16x1xf32>
    %cst_31 = arith.constant 1.000000e+00 : f32
    %106 = vector.broadcast %cst_31 : f32 to vector<16x1xf32>
    %107 = arith.divf %106, %105 : vector<16x1xf32>
    %108 = vector.broadcast %107 : vector<16x1xf32> to vector<16x128xf32>
    %109 = arith.mulf %103, %108 : vector<16x128xf32>
    %110 = arith.addf %86, %109 : vector<16x128xf32>
    %111 = arith.addf %87, %107 : vector<16x1xf32>
    %112 = vector.broadcast %111 : vector<16x1xf32> to vector<16x128xf32>
    %113 = arith.divf %110, %112 : vector<16x128xf32>
    %c0_32 = arith.constant 0 : index
    %c0_33 = arith.constant 0 : index
    %c0_34 = arith.constant 0 : index
    %114 = vector.load %arg5[%c0_32, %c0_33, %c0_34] : memref<1x128x128xbf16, #tpu.memory_space<vmem>>, vector<1x128x128xbf16>
    %115 = vector.shape_cast %114 : vector<1x128x128xbf16> to vector<128x128xbf16>
    %116 = arith.extf %115 : vector<128x128xbf16> to vector<128x128xf32>
    %cst_35 = arith.constant dense<0.000000e+00> : vector<16x128xf32>
    %117 = tpu.matmul %113, %116, %cst_35 {dimension_numbers = #tpu.dot_dimension_numbers<[1], [0], [0], [1], [0, 0, 1, 1], [], []>} : vector<16x128xf32>, vector<128x128xf32>, vector<16x128xf32> -> vector<16x128xf32>
    %c0_36 = arith.constant 0 : index
    %c0_37 = arith.constant 0 : index
    %c0_38 = arith.constant 0 : index
    %118 = vector.load %arg6[%c0_36, %c0_37, %c0_38] : memref<1x16x128xbf16, #tpu.memory_space<vmem>>, vector<1x16x128xbf16>
    %119 = vector.shape_cast %118 : vector<1x16x128xbf16> to vector<16x128xbf16>
    %120 = arith.truncf %117 : vector<16x128xf32> to vector<16x128xbf16>
    %c0_39 = arith.constant 0 : index
    %c0_40 = arith.constant 0 : index
    %121 = vector.load %arg7[%c0_39, %c0_40] : memref<128x128xbf16, #tpu.memory_space<vmem>>, vector<128x128xbf16>
    %cst_41 = arith.constant dense<0.000000e+00> : vector<16x128xf32>
    %122 = tpu.matmul %120, %121, %cst_41 {dimension_numbers = #tpu.dot_dimension_numbers<[1], [0], [0], [1], [0, 0, 1, 1], [], []>} : vector<16x128xbf16>, vector<128x128xbf16>, vector<16x128xf32> -> vector<16x128xf32>
    %c0_42 = arith.constant 0 : index
    %c0_43 = arith.constant 0 : index
    %123 = vector.load %arg8[%c0_42, %c0_43] : memref<128x128xbf16, #tpu.memory_space<vmem>>, vector<128x128xbf16>
    %cst_44 = arith.constant dense<0.000000e+00> : vector<16x128xf32>
    %124 = tpu.matmul %119, %123, %cst_44 {dimension_numbers = #tpu.dot_dimension_numbers<[1], [0], [0], [1], [0, 0, 1, 1], [], []>} : vector<16x128xbf16>, vector<128x128xbf16>, vector<16x128xf32> -> vector<16x128xf32>
    %125 = arith.addf %122, %124 : vector<16x128xf32>
    %c0_45 = arith.constant 0 : index
    %c0_46 = arith.constant 0 : index
    %126 = vector.load %arg9[%c0_45, %c0_46] : memref<1x128xf32, #tpu.memory_space<vmem>>, vector<1x128xf32>
    %127 = vector.broadcast %126 : vector<1x128xf32> to vector<16x128xf32>
    %128 = arith.addf %125, %127 : vector<16x128xf32>
    %cst_47 = arith.constant 0.000000e+00 : f32
    %129 = vector.broadcast %cst_47 : f32 to vector<16x128xf32>
    %130 = arith.maximumf %128, %129 : vector<16x128xf32>
    %c0_48 = arith.constant 0 : index
    %c0_49 = arith.constant 0 : index
    %131 = vector.load %arg10[%c0_48, %c0_49] : memref<128x128xbf16, #tpu.memory_space<vmem>>, vector<128x128xbf16>
    %c0_50 = arith.constant 0 : index
    %c0_51 = arith.constant 0 : index
    %132 = vector.load %arg11[%c0_50, %c0_51] : memref<1x128xf32, #tpu.memory_space<vmem>>, vector<1x128xf32>
    %133 = arith.truncf %130 : vector<16x128xf32> to vector<16x128xbf16>
    %cst_52 = arith.constant dense<0.000000e+00> : vector<16x128xf32>
    %134 = tpu.matmul %133, %131, %cst_52 {dimension_numbers = #tpu.dot_dimension_numbers<[1], [0], [0], [1], [0, 0, 1, 1], [], []>} : vector<16x128xbf16>, vector<128x128xbf16>, vector<16x128xf32> -> vector<16x128xf32>
    %135 = vector.broadcast %132 : vector<1x128xf32> to vector<16x128xf32>
    %136 = arith.addf %134, %135 : vector<16x128xf32>
    %cst_53 = arith.constant 0.000000e+00 : f32
    %137 = vector.broadcast %cst_53 : f32 to vector<16x128xf32>
    %138 = arith.maximumf %136, %137 : vector<16x128xf32>
    %139 = arith.truncf %138 : vector<16x128xf32> to vector<16x128xbf16>
    %c0_54 = arith.constant 0 : index
    %c0_55 = arith.constant 0 : index
    %c0_56 = arith.constant 0 : index
    %140 = vector.load %arg12[%c0_54, %c0_55, %c0_56] : memref<1x16x128xbf16, #tpu.memory_space<vmem>>, vector<1x16x128xbf16>
    %141 = vector.shape_cast %140 : vector<1x16x128xbf16> to vector<16x128xbf16>
    %142 = vector.shape_cast %139 : vector<16x128xbf16> to vector<1x16x128xbf16>
    tpu.vector_store %arg12[%c0_54, %c0_55, %c0_56], %142 {strides = array<i32>} : memref<1x16x128xbf16, #tpu.memory_space<vmem>>, vector<1x16x128xbf16>,
    return
  }
  func.func @transform_0(%arg0: i32, %arg1: i32) -> (i32, i32, i32) {
    %c0_i32 = arith.constant 0 : i32
    %c0_i32_0 = arith.constant 0 : i32
    return %arg0, %arg1, %c0_i32 : i32, i32, i32
  }
  func.func @transform_1(%arg0: i32, %arg1: i32) -> (i32, i32, i32) {
    %c0_i32 = arith.constant 0 : i32
    %c0_i32_0 = arith.constant 0 : i32
    %c0_i32_1 = arith.constant 0 : i32
    return %arg0, %c0_i32, %c0_i32_0 : i32, i32, i32
  }
  func.func @transform_2(%arg0: i32, %arg1: i32) -> (i32, i32, i32) {
    %c0_i32 = arith.constant 0 : i32
    %c0_i32_0 = arith.constant 0 : i32
    %c0_i32_1 = arith.constant 0 : i32
    return %arg0, %c0_i32, %c0_i32_0 : i32, i32, i32
  }
  func.func @transform_3(%arg0: i32, %arg1: i32) -> (i32, i32, i32) {
    %c0_i32 = arith.constant 0 : i32
    %c0_i32_0 = arith.constant 0 : i32
    %c0_i32_1 = arith.constant 0 : i32
    return %arg0, %c0_i32, %c0_i32_0 : i32, i32, i32
  }
  func.func @transform_4(%arg0: i32, %arg1: i32) -> (i32, i32, i32) {
    %c0_i32 = arith.constant 0 : i32
    %c0_i32_0 = arith.constant 0 : i32
    return %arg0, %arg1, %c0_i32 : i32, i32, i32
  }
  func.func @transform_5(%arg0: i32, %arg1: i32) -> (i32, i32) {
    %c0_i32 = arith.constant 0 : i32
    %c0_i32_0 = arith.constant 0 : i32
    %c0_i32_1 = arith.constant 0 : i32
    return %c0_i32, %c0_i32_0 : i32, i32
  }
  func.func @transform_6(%arg0: i32, %arg1: i32) -> (i32, i32) {
    %c0_i32 = arith.constant 0 : i32
    %c0_i32_0 = arith.constant 0 : i32
    %c0_i32_1 = arith.constant 0 : i32
    return %c0_i32, %c0_i32_0 : i32, i32
  }
  func.func @transform_7(%arg0: i32, %arg1: i32) -> (i32, i32) {
    %c0_i32 = arith.constant 0 : i32
    %c0_i32_0 = arith.constant 0 : i32
    %c0_i32_1 = arith.constant 0 : i32
    return %c0_i32, %c0_i32_0 : i32, i32
  }
  func.func @transform_8(%arg0: i32, %arg1: i32) -> (i32, i32) {
    %c0_i32 = arith.constant 0 : i32
    %c0_i32_0 = arith.constant 0 : i32
    %c0_i32_1 = arith.constant 0 : i32
    return %c0_i32, %c0_i32_0 : i32, i32
  }
  func.func @transform_9(%arg0: i32, %arg1: i32) -> (i32, i32) {
    %c0_i32 = arith.constant 0 : i32
    %c0_i32_0 = arith.constant 0 : i32
    %c0_i32_1 = arith.constant 0 : i32
    return %c0_i32, %c0_i32_0 : i32, i32
  }
  func.func @transform_10(%arg0: i32, %arg1: i32) -> (i32, i32, i32) {
    %c0_i32 = arith.constant 0 : i32
    %c0_i32_0 = arith.constant 0 : i32
    return %arg0, %arg1, %c0_i32 : i32, i32, i32
  }
}

module attributes {stable_mosaic.version = 11 : i64} {
  func.func @_fp_fused_kernel(%arg0: i32, %arg1: i32, %arg2: memref<1x8x3xf32, #tpu.memory_space<vmem>>, %arg3: memref<1x3x128xf32, #tpu.memory_space<vmem>>, %arg4: memref<1x1x128xf32, #tpu.memory_space<vmem>>, %arg5: memref<1x128x128xbf16, #tpu.memory_space<vmem>>, %arg6: memref<1x8x128xbf16, #tpu.memory_space<vmem>>, %arg7: memref<128x128xbf16, #tpu.memory_space<vmem>>, %arg8: memref<128x128xbf16, #tpu.memory_space<vmem>>, %arg9: memref<1x128xf32, #tpu.memory_space<vmem>>, %arg10: memref<128x128xbf16, #tpu.memory_space<vmem>>, %arg11: memref<1x128xf32, #tpu.memory_space<vmem>>, %arg12: memref<1x8x128xbf16, #tpu.memory_space<vmem>>) attributes {dimension_semantics = [#tpu.dimension_semantics<parallel>, #tpu.dimension_semantics<parallel>], iteration_bounds = array<i64: 2, 1>, scalar_prefetch = 0 : i64, scratch_operands = 0 : i64, tpu.core_type = #tpu.core_type<tc>, window_params = [{transform_indices = @transform_0, window_bounds = array<i64: 1, 8, 3>}, {transform_indices = @transform_1, window_bounds = array<i64: 1, 3, 128>}, {transform_indices = @transform_2, window_bounds = array<i64: 1, 1, 128>}, {transform_indices = @transform_3, window_bounds = array<i64: 1, 128, 128>}, {transform_indices = @transform_4, window_bounds = array<i64: 1, 8, 128>}, {pipeline_mode = #tpu.pipeline_mode<synchronous>, transform_indices = @transform_5, window_bounds = array<i64: 128, 128>}, {pipeline_mode = #tpu.pipeline_mode<synchronous>, transform_indices = @transform_6, window_bounds = array<i64: 128, 128>}, {pipeline_mode = #tpu.pipeline_mode<synchronous>, transform_indices = @transform_7, window_bounds = array<i64: 1, 128>}, {pipeline_mode = #tpu.pipeline_mode<synchronous>, transform_indices = @transform_8, window_bounds = array<i64: 128, 128>}, {pipeline_mode = #tpu.pipeline_mode<synchronous>, transform_indices = @transform_9, window_bounds = array<i64: 1, 128>}, {transform_indices = @transform_10, window_bounds = array<i64: 1, 8, 128>}]} {
    %c0 = arith.constant 0 : index
    %c0_0 = arith.constant 0 : index
    %c0_1 = arith.constant 0 : index
    %0 = vector.load %arg2[%c0, %c0_0, %c0_1] : memref<1x8x3xf32, #tpu.memory_space<vmem>>, vector<1x8x3xf32>
    %1 = vector.shape_cast %0 : vector<1x8x3xf32> to vector<8x3xf32>
    %c0_2 = arith.constant 0 : index
    %c0_3 = arith.constant 0 : index
    %c0_4 = arith.constant 0 : index
    %2 = vector.load %arg3[%c0_2, %c0_3, %c0_4] : memref<1x3x128xf32, #tpu.memory_space<vmem>>, vector<1x3x128xf32>
    %3 = vector.shape_cast %2 : vector<1x3x128xf32> to vector<3x128xf32>
    %c0_5 = arith.constant 0 : index
    %c0_6 = arith.constant 0 : index
    %c0_7 = arith.constant 0 : index
    %4 = vector.load %arg4[%c0_5, %c0_6, %c0_7] : memref<1x1x128xf32, #tpu.memory_space<vmem>>, vector<1x1x128xf32>
    %5 = vector.shape_cast %4 : vector<1x1x128xf32> to vector<1x128xf32>
    %6 = vector.extract_strided_slice %1 {offsets = [0, 0], sizes = [8, 1], strides = [1, 1]} : vector<8x3xf32> to vector<8x1xf32>
    %7 = vector.extract_strided_slice %1 {offsets = [0, 1], sizes = [8, 1], strides = [1, 1]} : vector<8x3xf32> to vector<8x1xf32>
    %8 = vector.extract_strided_slice %1 {offsets = [0, 2], sizes = [8, 1], strides = [1, 1]} : vector<8x3xf32> to vector<8x1xf32>
    %9 = arith.mulf %6, %6 : vector<8x1xf32>
    %10 = arith.mulf %7, %7 : vector<8x1xf32>
    %11 = arith.addf %9, %10 : vector<8x1xf32>
    %12 = arith.mulf %8, %8 : vector<8x1xf32>
    %13 = arith.addf %11, %12 : vector<8x1xf32>
    %14 = vector.extract_strided_slice %3 {offsets = [0, 0], sizes = [1, 128], strides = [1, 1]} : vector<3x128xf32> to vector<1x128xf32>
    %15 = vector.broadcast %6 : vector<8x1xf32> to vector<8x128xf32>
    %16 = vector.broadcast %14 : vector<1x128xf32> to vector<8x128xf32>
    %17 = arith.mulf %15, %16 : vector<8x128xf32>
    %18 = vector.extract_strided_slice %3 {offsets = [1, 0], sizes = [1, 128], strides = [1, 1]} : vector<3x128xf32> to vector<1x128xf32>
    %19 = vector.broadcast %7 : vector<8x1xf32> to vector<8x128xf32>
    %20 = vector.broadcast %18 : vector<1x128xf32> to vector<8x128xf32>
    %21 = arith.mulf %19, %20 : vector<8x128xf32>
    %22 = arith.addf %17, %21 : vector<8x128xf32>
    %23 = vector.extract_strided_slice %3 {offsets = [2, 0], sizes = [1, 128], strides = [1, 1]} : vector<3x128xf32> to vector<1x128xf32>
    %24 = vector.broadcast %8 : vector<8x1xf32> to vector<8x128xf32>
    %25 = vector.broadcast %23 : vector<1x128xf32> to vector<8x128xf32>
    %26 = arith.mulf %24, %25 : vector<8x128xf32>
    %27 = arith.addf %22, %26 : vector<8x128xf32>
    %28 = vector.broadcast %13 : vector<8x1xf32> to vector<8x128xf32>
    %29 = vector.broadcast %5 : vector<1x128xf32> to vector<8x128xf32>
    %30 = arith.addf %28, %29 : vector<8x128xf32>
    %cst = arith.constant 2.000000e+00 : f32
    %31 = vector.broadcast %cst : f32 to vector<8x128xf32>
    %32 = arith.mulf %31, %27 : vector<8x128xf32>
    %33 = arith.subf %30, %32 : vector<8x128xf32>
    %cst_8 = arith.constant 0.000000e+00 : f32
    %34 = vector.broadcast %cst_8 : f32 to vector<8x128xf32>
    %35 = arith.maximumf %33, %34 : vector<8x128xf32>
    %36 = tpu.iota {dimensions = array<i32: 1>} : vector<8x128xi32>
    %37 = arith.sitofp %36 : vector<8x128xi32> to vector<8x128xf32>
    %cst_9 = arith.constant 4.000000e+00 : f32
    %38 = vector.broadcast %cst_9 : f32 to vector<8x128xf32>
    %39 = arith.cmpf olt, %37, %38 : vector<8x128xf32>
    %cst_10 = arith.constant 1.000000e+30 : f32
    %40 = vector.broadcast %cst_10 : f32 to vector<8x128xf32>
    %41 = arith.select %39, %35, %40 : vector<8x128xi1>, vector<8x128xf32>
    %cst_11 = arith.constant 0.000000e+00 : f32
    %42 = vector.broadcast %cst_11 : f32 to vector<8x128xf32>
    %cst_12 = arith.constant 0.000000e+00 : f32
    %43 = vector.broadcast %cst_12 : f32 to vector<8x1xf32>
    %cst_13 = arith.constant dense<0x7F800000> : vector<8xf32>
    %44 = vector.multi_reduction <minimumf>, %41, %cst_13 [1] : vector<8x128xf32> to vector<8xf32>
    %45 = vector.shape_cast %44 : vector<8xf32> to vector<8x1xf32>
    %46 = vector.broadcast %45 : vector<8x1xf32> to vector<8x128xf32>
    %47 = arith.cmpf ole, %41, %46 : vector<8x128xf32>
    %cst_14 = arith.constant 1.000000e+30 : f32
    %48 = vector.broadcast %cst_14 : f32 to vector<8x128xf32>
    %49 = arith.select %47, %37, %48 : vector<8x128xi1>, vector<8x128xf32>
    %cst_15 = arith.constant dense<0x7F800000> : vector<8xf32>
    %50 = vector.multi_reduction <minimumf>, %49, %cst_15 [1] : vector<8x128xf32> to vector<8xf32>
    %51 = vector.shape_cast %50 : vector<8xf32> to vector<8x1xf32>
    %52 = vector.broadcast %51 : vector<8x1xf32> to vector<8x128xf32>
    %53 = arith.cmpf oeq, %37, %52 : vector<8x128xf32>
    %54 = arith.extui %53 : vector<8x128xi1> to vector<8x128xi32>
    %55 = arith.sitofp %54 : vector<8x128xi32> to vector<8x128xf32>
    %cst_16 = arith.constant 9.99999993E-9 : f32
    %56 = vector.broadcast %cst_16 : f32 to vector<8x1xf32>
    %57 = arith.addf %45, %56 : vector<8x1xf32>
    %cst_17 = arith.constant 1.000000e+00 : f32
    %58 = vector.broadcast %cst_17 : f32 to vector<8x1xf32>
    %59 = arith.divf %58, %57 : vector<8x1xf32>
    %60 = vector.broadcast %59 : vector<8x1xf32> to vector<8x128xf32>
    %61 = arith.mulf %55, %60 : vector<8x128xf32>
    %62 = arith.addf %42, %61 : vector<8x128xf32>
    %63 = arith.addf %43, %59 : vector<8x1xf32>
    %cst_18 = arith.constant 0.000000e+00 : f32
    %64 = vector.broadcast %cst_18 : f32 to vector<8x128xf32>
    %65 = arith.cmpf ogt, %55, %64 : vector<8x128xf32>
    %cst_19 = arith.constant 1.000000e+30 : f32
    %66 = vector.broadcast %cst_19 : f32 to vector<8x128xf32>
    %67 = arith.select %65, %66, %41 : vector<8x128xi1>, vector<8x128xf32>
    %cst_20 = arith.constant dense<0x7F800000> : vector<8xf32>
    %68 = vector.multi_reduction <minimumf>, %67, %cst_20 [1] : vector<8x128xf32> to vector<8xf32>
    %69 = vector.shape_cast %68 : vector<8xf32> to vector<8x1xf32>
    %70 = vector.broadcast %69 : vector<8x1xf32> to vector<8x128xf32>
    %71 = arith.cmpf ole, %67, %70 : vector<8x128xf32>
    %cst_21 = arith.constant 1.000000e+30 : f32
    %72 = vector.broadcast %cst_21 : f32 to vector<8x128xf32>
    %73 = arith.select %71, %37, %72 : vector<8x128xi1>, vector<8x128xf32>
    %cst_22 = arith.constant dense<0x7F800000> : vector<8xf32>
    %74 = vector.multi_reduction <minimumf>, %73, %cst_22 [1] : vector<8x128xf32> to vector<8xf32>
    %75 = vector.shape_cast %74 : vector<8xf32> to vector<8x1xf32>
    %76 = vector.broadcast %75 : vector<8x1xf32> to vector<8x128xf32>
    %77 = arith.cmpf oeq, %37, %76 : vector<8x128xf32>
    %78 = arith.extui %77 : vector<8x128xi1> to vector<8x128xi32>
    %79 = arith.sitofp %78 : vector<8x128xi32> to vector<8x128xf32>
    %cst_23 = arith.constant 9.99999993E-9 : f32
    %80 = vector.broadcast %cst_23 : f32 to vector<8x1xf32>
    %81 = arith.addf %69, %80 : vector<8x1xf32>
    %cst_24 = arith.constant 1.000000e+00 : f32
    %82 = vector.broadcast %cst_24 : f32 to vector<8x1xf32>
    %83 = arith.divf %82, %81 : vector<8x1xf32>
    %84 = vector.broadcast %83 : vector<8x1xf32> to vector<8x128xf32>
    %85 = arith.mulf %79, %84 : vector<8x128xf32>
    %86 = arith.addf %62, %85 : vector<8x128xf32>
    %87 = arith.addf %63, %83 : vector<8x1xf32>
    %cst_25 = arith.constant 0.000000e+00 : f32
    %88 = vector.broadcast %cst_25 : f32 to vector<8x128xf32>
    %89 = arith.cmpf ogt, %79, %88 : vector<8x128xf32>
    %cst_26 = arith.constant 1.000000e+30 : f32
    %90 = vector.broadcast %cst_26 : f32 to vector<8x128xf32>
    %91 = arith.select %89, %90, %67 : vector<8x128xi1>, vector<8x128xf32>
    %cst_27 = arith.constant dense<0x7F800000> : vector<8xf32>
    %92 = vector.multi_reduction <minimumf>, %91, %cst_27 [1] : vector<8x128xf32> to vector<8xf32>
    %93 = vector.shape_cast %92 : vector<8xf32> to vector<8x1xf32>
    %94 = vector.broadcast %93 : vector<8x1xf32> to vector<8x128xf32>
    %95 = arith.cmpf ole, %91, %94 : vector<8x128xf32>
    %cst_28 = arith.constant 1.000000e+30 : f32
    %96 = vector.broadcast %cst_28 : f32 to vector<8x128xf32>
    %97 = arith.select %95, %37, %96 : vector<8x128xi1>, vector<8x128xf32>
    %cst_29 = arith.constant dense<0x7F800000> : vector<8xf32>
    %98 = vector.multi_reduction <minimumf>, %97, %cst_29 [1] : vector<8x128xf32> to vector<8xf32>
    %99 = vector.shape_cast %98 : vector<8xf32> to vector<8x1xf32>
    %100 = vector.broadcast %99 : vector<8x1xf32> to vector<8x128xf32>
    %101 = arith.cmpf oeq, %37, %100 : vector<8x128xf32>
    %102 = arith.extui %101 : vector<8x128xi1> to vector<8x128xi32>
    %103 = arith.sitofp %102 : vector<8x128xi32> to vector<8x128xf32>
    %cst_30 = arith.constant 9.99999993E-9 : f32
    %104 = vector.broadcast %cst_30 : f32 to vector<8x1xf32>
    %105 = arith.addf %93, %104 : vector<8x1xf32>
    %cst_31 = arith.constant 1.000000e+00 : f32
    %106 = vector.broadcast %cst_31 : f32 to vector<8x1xf32>
    %107 = arith.divf %106, %105 : vector<8x1xf32>
    %108 = vector.broadcast %107 : vector<8x1xf32> to vector<8x128xf32>
    %109 = arith.mulf %103, %108 : vector<8x128xf32>
    %110 = arith.addf %86, %109 : vector<8x128xf32>
    %111 = arith.addf %87, %107 : vector<8x1xf32>
    %112 = vector.broadcast %111 : vector<8x1xf32> to vector<8x128xf32>
    %113 = arith.divf %110, %112 : vector<8x128xf32>
    %c0_32 = arith.constant 0 : index
    %c0_33 = arith.constant 0 : index
    %c0_34 = arith.constant 0 : index
    %114 = vector.load %arg5[%c0_32, %c0_33, %c0_34] : memref<1x128x128xbf16, #tpu.memory_space<vmem>>, vector<1x128x128xbf16>
    %115 = vector.shape_cast %114 : vector<1x128x128xbf16> to vector<128x128xbf16>
    %116 = arith.extf %115 : vector<128x128xbf16> to vector<128x128xf32>
    %cst_35 = arith.constant dense<0.000000e+00> : vector<8x128xf32>
    %117 = tpu.matmul %113, %116, %cst_35 {dimension_numbers = #tpu.dot_dimension_numbers<[1], [0], [0], [1], [0, 0, 1, 1], [], []>} : vector<8x128xf32>, vector<128x128xf32>, vector<8x128xf32> -> vector<8x128xf32>
    %c0_36 = arith.constant 0 : index
    %c0_37 = arith.constant 0 : index
    %c0_38 = arith.constant 0 : index
    %118 = vector.load %arg6[%c0_36, %c0_37, %c0_38] : memref<1x8x128xbf16, #tpu.memory_space<vmem>>, vector<1x8x128xbf16>
    %119 = vector.shape_cast %118 : vector<1x8x128xbf16> to vector<8x128xbf16>
    %120 = arith.truncf %117 : vector<8x128xf32> to vector<8x128xbf16>
    %c0_39 = arith.constant 0 : index
    %c0_40 = arith.constant 0 : index
    %121 = vector.load %arg7[%c0_39, %c0_40] : memref<128x128xbf16, #tpu.memory_space<vmem>>, vector<128x128xbf16>
    %cst_41 = arith.constant dense<0.000000e+00> : vector<8x128xf32>
    %122 = tpu.matmul %120, %121, %cst_41 {dimension_numbers = #tpu.dot_dimension_numbers<[1], [0], [0], [1], [0, 0, 1, 1], [], []>} : vector<8x128xbf16>, vector<128x128xbf16>, vector<8x128xf32> -> vector<8x128xf32>
    %c0_42 = arith.constant 0 : index
    %c0_43 = arith.constant 0 : index
    %123 = vector.load %arg8[%c0_42, %c0_43] : memref<128x128xbf16, #tpu.memory_space<vmem>>, vector<128x128xbf16>
    %cst_44 = arith.constant dense<0.000000e+00> : vector<8x128xf32>
    %124 = tpu.matmul %119, %123, %cst_44 {dimension_numbers = #tpu.dot_dimension_numbers<[1], [0], [0], [1], [0, 0, 1, 1], [], []>} : vector<8x128xbf16>, vector<128x128xbf16>, vector<8x128xf32> -> vector<8x128xf32>
    %125 = arith.addf %122, %124 : vector<8x128xf32>
    %c0_45 = arith.constant 0 : index
    %c0_46 = arith.constant 0 : index
    %126 = vector.load %arg9[%c0_45, %c0_46] : memref<1x128xf32, #tpu.memory_space<vmem>>, vector<1x128xf32>
    %127 = vector.broadcast %126 : vector<1x128xf32> to vector<8x128xf32>
    %128 = arith.addf %125, %127 : vector<8x128xf32>
    %cst_47 = arith.constant 0.000000e+00 : f32
    %129 = vector.broadcast %cst_47 : f32 to vector<8x128xf32>
    %130 = arith.maximumf %128, %129 : vector<8x128xf32>
    %c0_48 = arith.constant 0 : index
    %c0_49 = arith.constant 0 : index
    %131 = vector.load %arg10[%c0_48, %c0_49] : memref<128x128xbf16, #tpu.memory_space<vmem>>, vector<128x128xbf16>
    %c0_50 = arith.constant 0 : index
    %c0_51 = arith.constant 0 : index
    %132 = vector.load %arg11[%c0_50, %c0_51] : memref<1x128xf32, #tpu.memory_space<vmem>>, vector<1x128xf32>
    %133 = arith.truncf %130 : vector<8x128xf32> to vector<8x128xbf16>
    %cst_52 = arith.constant dense<0.000000e+00> : vector<8x128xf32>
    %134 = tpu.matmul %133, %131, %cst_52 {dimension_numbers = #tpu.dot_dimension_numbers<[1], [0], [0], [1], [0, 0, 1, 1], [], []>} : vector<8x128xbf16>, vector<128x128xbf16>, vector<8x128xf32> -> vector<8x128xf32>
    %135 = vector.broadcast %132 : vector<1x128xf32> to vector<8x128xf32>
    %136 = arith.addf %134, %135 : vector<8x128xf32>
    %cst_53 = arith.constant 0.000000e+00 : f32
    %137 = vector.broadcast %cst_53 : f32 to vector<8x128xf32>
    %138 = arith.maximumf %136, %137 : vector<8x128xf32>
    %139 = arith.truncf %138 : vector<8x128xf32> to vector<8x128xbf16>
    %c0_54 = arith.constant 0 : index
    %c0_55 = arith.constant 0 : index
    %c0_56 = arith.constant 0 : index
    %140 = vector.load %arg12[%c0_54, %c0_55, %c0_56] : memref<1x8x128xbf16, #tpu.memory_space<vmem>>, vector<1x8x128xbf16>
    %141 = vector.shape_cast %140 : vector<1x8x128xbf16> to vector<8x128xbf16>
    %142 = vector.shape_cast %139 : vector<8x128xbf16> to vector<1x8x128xbf16>
    tpu.vector_store %arg12[%c0_54, %c0_55, %c0_56], %142 {strides = array<i32>} : memref<1x8x128xbf16, #tpu.memory_space<vmem>>, vector<1x8x128xbf16>,
    return
  }
  func.func @transform_0(%arg0: i32, %arg1: i32) -> (i32, i32, i32) {
    %c0_i32 = arith.constant 0 : i32
    %c0_i32_0 = arith.constant 0 : i32
    return %arg0, %arg1, %c0_i32 : i32, i32, i32
  }
  func.func @transform_1(%arg0: i32, %arg1: i32) -> (i32, i32, i32) {
    %c0_i32 = arith.constant 0 : i32
    %c0_i32_0 = arith.constant 0 : i32
    %c0_i32_1 = arith.constant 0 : i32
    return %arg0, %c0_i32, %c0_i32_0 : i32, i32, i32
  }
  func.func @transform_2(%arg0: i32, %arg1: i32) -> (i32, i32, i32) {
    %c0_i32 = arith.constant 0 : i32
    %c0_i32_0 = arith.constant 0 : i32
    %c0_i32_1 = arith.constant 0 : i32
    return %arg0, %c0_i32, %c0_i32_0 : i32, i32, i32
  }
  func.func @transform_3(%arg0: i32, %arg1: i32) -> (i32, i32, i32) {
    %c0_i32 = arith.constant 0 : i32
    %c0_i32_0 = arith.constant 0 : i32
    %c0_i32_1 = arith.constant 0 : i32
    return %arg0, %c0_i32, %c0_i32_0 : i32, i32, i32
  }
  func.func @transform_4(%arg0: i32, %arg1: i32) -> (i32, i32, i32) {
    %c0_i32 = arith.constant 0 : i32
    %c0_i32_0 = arith.constant 0 : i32
    return %arg0, %arg1, %c0_i32 : i32, i32, i32
  }
  func.func @transform_5(%arg0: i32, %arg1: i32) -> (i32, i32) {
    %c0_i32 = arith.constant 0 : i32
    %c0_i32_0 = arith.constant 0 : i32
    %c0_i32_1 = arith.constant 0 : i32
    return %c0_i32, %c0_i32_0 : i32, i32
  }
  func.func @transform_6(%arg0: i32, %arg1: i32) -> (i32, i32) {
    %c0_i32 = arith.constant 0 : i32
    %c0_i32_0 = arith.constant 0 : i32
    %c0_i32_1 = arith.constant 0 : i32
    return %c0_i32, %c0_i32_0 : i32, i32
  }
  func.func @transform_7(%arg0: i32, %arg1: i32) -> (i32, i32) {
    %c0_i32 = arith.constant 0 : i32
    %c0_i32_0 = arith.constant 0 : i32
    %c0_i32_1 = arith.constant 0 : i32
    return %c0_i32, %c0_i32_0 : i32, i32
  }
  func.func @transform_8(%arg0: i32, %arg1: i32) -> (i32, i32) {
    %c0_i32 = arith.constant 0 : i32
    %c0_i32_0 = arith.constant 0 : i32
    %c0_i32_1 = arith.constant 0 : i32
    return %c0_i32, %c0_i32_0 : i32, i32
  }
  func.func @transform_9(%arg0: i32, %arg1: i32) -> (i32, i32) {
    %c0_i32 = arith.constant 0 : i32
    %c0_i32_0 = arith.constant 0 : i32
    %c0_i32_1 = arith.constant 0 : i32
    return %c0_i32, %c0_i32_0 : i32, i32
  }
  func.func @transform_10(%arg0: i32, %arg1: i32) -> (i32, i32, i32) {
    %c0_i32 = arith.constant 0 : i32
    %c0_i32_0 = arith.constant 0 : i32
    return %arg0, %arg1, %c0_i32 : i32, i32, i32
  }
}

module attributes {stable_mosaic.version = 11 : i64} {
  func.func @_pointwise_mlp_kernel(%arg0: i32, %arg1: memref<32x128xbf16, #tpu.memory_space<vmem>>, %arg2: memref<128x128xbf16, #tpu.memory_space<vmem>>, %arg3: memref<1x128xf32, #tpu.memory_space<vmem>>, %arg4: memref<128x128xbf16, #tpu.memory_space<vmem>>, %arg5: memref<1x128xf32, #tpu.memory_space<vmem>>, %arg6: memref<32x128xf32, #tpu.memory_space<vmem>>) attributes {dimension_semantics = [#tpu.dimension_semantics<parallel>], iteration_bounds = array<i64: 2>, scalar_prefetch = 0 : i64, scratch_operands = 0 : i64, tpu.core_type = #tpu.core_type<tc>, window_params = [{transform_indices = @transform_0, window_bounds = array<i64: 32, 128>}, {pipeline_mode = #tpu.pipeline_mode<synchronous>, transform_indices = @transform_1, window_bounds = array<i64: 128, 128>}, {pipeline_mode = #tpu.pipeline_mode<synchronous>, transform_indices = @transform_2, window_bounds = array<i64: 1, 128>}, {pipeline_mode = #tpu.pipeline_mode<synchronous>, transform_indices = @transform_3, window_bounds = array<i64: 128, 128>}, {pipeline_mode = #tpu.pipeline_mode<synchronous>, transform_indices = @transform_4, window_bounds = array<i64: 1, 128>}, {transform_indices = @transform_5, window_bounds = array<i64: 32, 128>}]} {
    %c0 = arith.constant 0 : index
    %c0_0 = arith.constant 0 : index
    %0 = vector.load %arg1[%c0, %c0_0] : memref<32x128xbf16, #tpu.memory_space<vmem>>, vector<32x128xbf16>
    %c0_1 = arith.constant 0 : index
    %c0_2 = arith.constant 0 : index
    %1 = vector.load %arg2[%c0_1, %c0_2] : memref<128x128xbf16, #tpu.memory_space<vmem>>, vector<128x128xbf16>
    %c0_3 = arith.constant 0 : index
    %c0_4 = arith.constant 0 : index
    %2 = vector.load %arg3[%c0_3, %c0_4] : memref<1x128xf32, #tpu.memory_space<vmem>>, vector<1x128xf32>
    %cst = arith.constant dense<0.000000e+00> : vector<32x128xf32>
    %3 = tpu.matmul %0, %1, %cst {dimension_numbers = #tpu.dot_dimension_numbers<[1], [0], [0], [1], [0, 0, 1, 1], [], []>} : vector<32x128xbf16>, vector<128x128xbf16>, vector<32x128xf32> -> vector<32x128xf32>
    %4 = vector.broadcast %2 : vector<1x128xf32> to vector<32x128xf32>
    %5 = arith.addf %3, %4 : vector<32x128xf32>
    %cst_5 = arith.constant 0.000000e+00 : f32
    %6 = vector.broadcast %cst_5 : f32 to vector<32x128xf32>
    %7 = arith.maximumf %5, %6 : vector<32x128xf32>
    %c0_6 = arith.constant 0 : index
    %c0_7 = arith.constant 0 : index
    %8 = vector.load %arg4[%c0_6, %c0_7] : memref<128x128xbf16, #tpu.memory_space<vmem>>, vector<128x128xbf16>
    %c0_8 = arith.constant 0 : index
    %c0_9 = arith.constant 0 : index
    %9 = vector.load %arg5[%c0_8, %c0_9] : memref<1x128xf32, #tpu.memory_space<vmem>>, vector<1x128xf32>
    %10 = arith.truncf %7 : vector<32x128xf32> to vector<32x128xbf16>
    %cst_10 = arith.constant dense<0.000000e+00> : vector<32x128xf32>
    %11 = tpu.matmul %10, %8, %cst_10 {dimension_numbers = #tpu.dot_dimension_numbers<[1], [0], [0], [1], [0, 0, 1, 1], [], []>} : vector<32x128xbf16>, vector<128x128xbf16>, vector<32x128xf32> -> vector<32x128xf32>
    %12 = vector.broadcast %9 : vector<1x128xf32> to vector<32x128xf32>
    %13 = arith.addf %11, %12 : vector<32x128xf32>
    %c0_11 = arith.constant 0 : index
    %c0_12 = arith.constant 0 : index
    %14 = vector.load %arg6[%c0_11, %c0_12] : memref<32x128xf32, #tpu.memory_space<vmem>>, vector<32x128xf32>
    tpu.vector_store %arg6[%c0_11, %c0_12], %13 {strides = array<i32>} : memref<32x128xf32, #tpu.memory_space<vmem>>, vector<32x128xf32>,
    return
  }
  func.func @transform_0(%arg0: i32) -> (i32, i32) {
    %c0_i32 = arith.constant 0 : i32
    %c0_i32_0 = arith.constant 0 : i32
    return %arg0, %c0_i32 : i32, i32
  }
  func.func @transform_1(%arg0: i32) -> (i32, i32) {
    %c0_i32 = arith.constant 0 : i32
    %c0_i32_0 = arith.constant 0 : i32
    %c0_i32_1 = arith.constant 0 : i32
    return %c0_i32, %c0_i32_0 : i32, i32
  }
  func.func @transform_2(%arg0: i32) -> (i32, i32) {
    %c0_i32 = arith.constant 0 : i32
    %c0_i32_0 = arith.constant 0 : i32
    %c0_i32_1 = arith.constant 0 : i32
    return %c0_i32, %c0_i32_0 : i32, i32
  }
  func.func @transform_3(%arg0: i32) -> (i32, i32) {
    %c0_i32 = arith.constant 0 : i32
    %c0_i32_0 = arith.constant 0 : i32
    %c0_i32_1 = arith.constant 0 : i32
    return %c0_i32, %c0_i32_0 : i32, i32
  }
  func.func @transform_4(%arg0: i32) -> (i32, i32) {
    %c0_i32 = arith.constant 0 : i32
    %c0_i32_0 = arith.constant 0 : i32
    %c0_i32_1 = arith.constant 0 : i32
    return %c0_i32, %c0_i32_0 : i32, i32
  }
  func.func @transform_5(%arg0: i32) -> (i32, i32) {
    %c0_i32 = arith.constant 0 : i32
    %c0_i32_0 = arith.constant 0 : i32
    return %arg0, %c0_i32 : i32, i32
  }
}

</mosaic_0001>

<bundles_post_ra>
// kernel: custom-call.12
= control target key start
LH: loop header
LB: loop body
LE: loop exit
PB: predicated region body
PF: predicated region fallthrough
CT: control target
= control target key end

     0   :  { %s6_s0 = inlined_call_operand.vmem [shape: f32[2,32], index: 0, kind: output, shape index: {}]  }

// kernel: custom-call.13
= control target key start
LH: loop header
LB: loop body
LE: loop exit
PB: predicated region body
PF: predicated region fallthrough
CT: control target
= control target key end

     0   :  { %s6_s0 = inlined_call_operand.vmem [shape: f32[2,8], index: 0, kind: output, shape index: {}]  }

// kernel: _lambda_.9
= control target key start
LH: loop header
LB: loop body
LE: loop exit
PB: predicated region body
PF: predicated region fallthrough
CT: control target
= control target key end

     0   :  { %s535_s12 = smov 0   ;;  %s537_s13 = smov 0   ;;  %s591_s0 = inlined_call_operand.vmem [shape: f32[2,8,3], index: 0, kind: input, shape index: {}]   ;;  %s592_s1 = inlined_call_operand.vmem [shape: f32[2,3,128], index: 1, kind: input, shape index: {}]   ;;  %s593_s2 = inlined_call_operand.vmem [shape: f32[2,1,128], index: 2, kind: input, shape index: {}]   ;;  %s594_s3 = inlined_call_operand.vmem [shape: s32[2,8,8], index: 3, kind: output, shape index: {}]  }
   0x1   :  { %s539_s14 = smov 0  }
   0x2 LB: > { %s25_s15 = sadd.s32 1, %s503_s13  ;;  %p437_p0 = scmp.ge.s32.totalorder %s507_s14, 1  ;;  %s507_s14 = sphi %s539_s14, %s13_s14   ;;  %s503_s13 = sphi %s537_s13, %s598_s13   ;;  %s499_s12 = sphi %s535_s12, %s597_s12  }
   0x3   : > { %p27_p1 = scmp.ge.s32.totalorder %s25_s15, 2  ;;  %p172_p2 = scmp.lt.s32.totalorder %s507_s14, 3 }
   0x5   : > { %s600_s15 = smov (%p27_p1, %s25_s15), 0  ;;  %p173_p3 = pnand %p437_p0, %p172_p2 }
   0x6   : > { %p207_p4 = scmp.lt.s32.totalorder (!%p173_p3), %s499_s12, 1  ;;  %s511_s20 = smov (!%p173_p3), 127  }
   0x7   : > { %176 = sbr.rel (%p173_p3) target bundleno = 1193 (0x4a9), region = 32  ;;  %s513_s24 = smov (!%p173_p3), 126  }
   0xc   : > { %v509_v0 = vmov 0   ;;  %v510_v1 = vmov 2   ;;  %s602_s12 = smov (!%p207_p4, %s499_s12), 1  ;;  %v512_v4 = vmov 1   ;;  %v274_v20 = vlaneseq }
   0xd   : > { %479 = vset.pattern.permute.xlu1 %v509_v0  ;;  %481 = vset.pattern.permute.xlu2 %v510_v1  ;;  %s438_s16 = sshll.u32 %s602_s12, 3  ;;  %s220_s23 = scalar_lea.vmem %s593_s2, %s602_s12  ;;  %v514_v40 = vmov 0.0  }
   0xe   : > { %483 = vset.pattern.permute.xlu0 %v509_v0  ;;  %s213_s19 = scalar_lea.vmem %s591_s0, %s438_s16  ;;  %s439_s25 = sshll.u32 %s602_s12, 2  ;;  %v484_v22 = vld [vmem:[%s220_s23] ss:$0 sm:$0xff]  ;;  %v275_v23 = vand.u32 127, %v274_v20 }
   0xf   : > { %v228_v2 = vld [vmem:[%s213_s19] sm:$0xff]  ;;  %s217_s28 = scalar_lea.vmem %s592_s1, %s439_s25  ;;  %s227_s4 = scalar_lea.vmem %s594_s3, %s438_s16 }
  0x10   : > { %v231_v3 = vmul.f32 %v228_v2, %v228_v2  ;;  %243 = vperm.xlu1 %479, %v228_v2   ;;  %256 = vperm.xlu2 %481, %v228_v2   ;;  %v229_v10 = vld [vmem:[%s217_s28] sm:$0x7]  ;;  %v276_v27 = vcvt.s32.f32 %v275_v23 }
  0x11   : > { %v246_v11 = vperm.slane %v229_v10, 0  ;;  %v252_v12 = vperm.slane %v229_v10, 1  ;;  %v259_v16 = vperm.slane %v229_v10, 2 }
  0x12   : > { %233 = vrot.lane.b32.xlu0 %v231_v3, %s511_s20  ;;  %vm277_vm0 = vcmp.lt.f32.partialorder %v276_v27, 8.0  ;;  %vm287_vm9 = vcmp.eq.f32.partialorder %v276_v27, 0.0  ;;  %vm293_vm10 = vcmp.eq.f32.partialorder %v276_v27, 1.0  ;;  %vm299_vm11 = vcmp.eq.f32.partialorder %v276_v27, 2.0 }
  0x13   : > { %vm305_vm12 = vcmp.eq.f32.partialorder %v276_v27, 3.0  ;;  %vm311_vm13 = vcmp.eq.f32.partialorder %v276_v27, 4.0  ;;  %vm317_vm14 = vcmp.eq.f32.partialorder %v276_v27, 5.0  ;;  %vm323_vm15 = vcmp.eq.f32.partialorder %v276_v27, 6.0 }
  0x18   : > { %480 = vset.pattern.permute.xlu1 %v512_v4  ;;  %482 = vset.pattern.permute.xlu2 %v509_v0 }
  0x19   : > { %249 = vperm.xlu1 %480, %v228_v2  }
  0x1a   : > { %237 = vrot.lane.b32.xlu0 %v231_v3, %s513_s24 }
  0x6a   : > { %v257_v17 = vpop.permute.xlu2 %256 }
  0x6b   : > { %v260_v19 = vmul.f32 %v259_v16, %v257_v17 }
  0x82   : > { %v244_v9 = vpop.permute.xlu1 %243 }
  0x83   : > { %v247_v14 = vmul.f32 %v246_v11, %v244_v9 }
  0x84   : > { %v234_v5 = vpop.permute.xlu0 %233 }
  0x85   : > { %v236_v6 = vadd.f32 %v234_v5, %v231_v3 }
  0x8b   : > { %v250_v13 = vpop.permute.xlu1 %249 }
  0x8c   : > { %v238_v7 = vpop.permute.xlu0 %237  ;;  %v253_v15 = vmul.f32 %v252_v12, %v250_v13 }
  0x8d   : > { %v240_v8 = vadd.f32 %v238_v7, %v236_v6 }
  0x8e   : > { %v254_v18 = vadd.f32 %v253_v15, %v247_v14 }
  0x8f   : > { %264 = vperm.xlu2 %482, %v240_v8  }
  0x90   : > { %v261_v21 = vadd.f32 %v260_v19, %v254_v18 }
  0x92   : > { %v271_v25 = vmul.f32 2.0, %v261_v21 }
  0xe9   : > { %v265_v24 = vpop.permute.xlu2 %264 }
  0xea   : > { %v270_v26 = vadd.f32 %v484_v22, %v265_v24 }
  0xec   : > { %v272_v28 = vsub.f32 %v270_v26, %v271_v25 }
  0xee   : > { %v273_v29 = vmax.f32 %v272_v28, 0.0 }
  0xf0   : > { %vm278_vm1 = vcmp.lt.f32.partialorder %v273_v29, 3.24 }
  0xf1   : > { %vm569_vm2 = vmand %vm277_vm0, %vm278_vm1 }
  0xf2   : > { %v280_v31 = vsel %vm569_vm2, %v276_v27, 1e+09  ;;  %v441_v41 = vsel %vm569_vm2, 1.0, %v514_v40  ;;  %vm329_vm2 = vcmp.eq.f32.partialorder %v276_v27, 7.0 }
  0xf3   : > { %285 = vmin.xlane.f32.xlu0 %v280_v31 }
 0x166   : > { %v286_v32 = vpop.xlane.xlu0 %285 }
 0x167   : > { %vm289_vm3 = vcmp.eq.f32.partialorder %v276_v27, %v286_v32  ;;  %v288_v46 = vsel %vm287_vm9, %v286_v32, 0.0 }
 0x168   : > { %v290_v33 = vsel %vm289_vm3, 1e+09, %v280_v31 }
 0x169   : > { %291 = vmin.xlane.f32.xlu1 %v290_v33 }
 0x1dc   : > { %v292_v34 = vpop.xlane.xlu1 %291 }
 0x1dd   : > { %vm295_vm4 = vcmp.eq.f32.partialorder %v276_v27, %v292_v34  ;;  %v294_v47 = vsel %vm293_vm10, %v292_v34, %v288_v46 }
 0x1de   : > { %v296_v35 = vsel %vm295_vm4, 1e+09, %v290_v33 }
 0x1df   : > { %297 = vmin.xlane.f32.xlu2 %v296_v35 }
 0x252   : > { %v298_v36 = vpop.xlane.xlu2 %297 }
 0x253   : > { %vm301_vm5 = vcmp.eq.f32.partialorder %v276_v27, %v298_v36  ;;  %v300_v48 = vsel %vm299_vm11, %v298_v36, %v294_v47 }
 0x254   : > { %v302_v37 = vsel %vm301_vm5, 1e+09, %v296_v35  ;;  %vm336_vm5 = vcmask 64512  }
 0x255   : > { %303 = vmin.xlane.f32.xlu2 %v302_v37 }
 0x2c8   : > { %v304_v38 = vpop.xlane.xlu2 %303 }
 0x2c9   : > { %vm307_vm6 = vcmp.eq.f32.partialorder %v276_v27, %v304_v38  ;;  %v306_v49 = vsel %vm305_vm12, %v304_v38, %v300_v48 }
 0x2ca   : > { %v308_v39 = vsel %vm307_vm6, 1e+09, %v302_v37 }
 0x2cb   : > { %309 = vmin.xlane.f32.xlu0 %v308_v39 }
 0x2d3   : > { %283 = vadd.xlane.f32.xlu0 %v441_v41 }
 0x33e   : > { %v310_v42 = vpop.xlane.xlu0 %309 }
 0x33f   : > { %vm313_vm7 = vcmp.eq.f32.partialorder %v276_v27, %v310_v42  ;;  %v312_v50 = vsel %vm311_vm13, %v310_v42, %v306_v49 }
 0x340   : > { %v314_v43 = vsel %vm313_vm7, 1e+09, %v308_v39 }
 0x341   : > { %315 = vmin.xlane.f32.xlu1 %v314_v43 }
 0x346   : > { %v284_v55 = vpop.xlane.xlu0 %283 }
 0x347   : > { %vm331_vm1 = vcmp.gt.f32.partialorder %v284_v55, 0.0  ;;  %vm333_vm3 = vcmp.lt.f32.partialorder %v276_v27, %v284_v55 }
 0x348   : > { %v332_v57 = vsel %vm331_vm1, %v286_v32, 0.0 }
 0x3b4   : > { %v316_v44 = vpop.xlane.xlu1 %315 }
 0x3b5   : > { %vm319_vm8 = vcmp.eq.f32.partialorder %v276_v27, %v316_v44  ;;  %v318_v51 = vsel %vm317_vm14, %v316_v44, %v312_v50 }
 0x3b6   : > { %v320_v45 = vsel %vm319_vm8, 1e+09, %v314_v43 }
 0x3b7   : > { %321 = vmin.xlane.f32.xlu2 %v320_v45 }
 0x42a   : > { %v322_v52 = vpop.xlane.xlu2 %321 }
 0x42b   : > { %v324_v53 = vsel %vm323_vm15, %v322_v52, %v318_v51  ;;  %vm325_vm0 = vcmp.eq.f32.partialorder %v276_v27, %v322_v52 }
 0x42c   : > { %v326_v54 = vsel %vm325_vm0, 1e+09, %v320_v45 }
 0x42d   : > { %327 = vmin.xlane.f32.xlu1 %v326_v54 }
 0x4a0   : > { %v328_v56 = vpop.xlane.xlu1 %327 }
 0x4a1   : > { %v330_v58 = vsel %vm329_vm2, %v328_v56, %v324_v53 }
 0x4a2   : > { %v334_v59 = vsel %vm333_vm3, %v330_v58, %v332_v57 }
 0x4a3   : > { %vm444_vm4 = vcmp.lt.s32.totalorder %v334_v59, 0  ;;  %v445_v60 = vceil.f32 %v334_v59  ;;  %v446_v61 = vfloor.f32 %v334_v59 }
 0x4a5   : > { %v447_v62 = vsel %vm444_vm4, %v445_v60, %v446_v61 }
 0x4a6   : > { %v448_v63 = vcvt.f32.s32 %v447_v62 }
 0x4a8   : > { %337 = vst.msk [vmem:[%s227_s4] sm:$0xff] %vm336_vm5, %v448_v63 }
 0x4a9 PF: > { %s13_s14 = sadd.s32 1, %s507_s14   ;;  %s597_s12 = smov %s503_s13 }
 0x4aa   : > { %p10_p5 = scmp.ge.s32.totalorder %s13_s14, 4   ;;  %s598_s13 = smov %s600_s15 }
 0x4ac   :  { %12 = sbr.rel (!%p10_p5) target bundleno = 2 (0x2), region = 68 }

// kernel: _lambda_.7
= control target key start
LH: loop header
LB: loop body
LE: loop exit
PB: predicated region body
PF: predicated region fallthrough
CT: control target
= control target key end

     0   :  { %s535_s12 = smov 0   ;;  %s537_s13 = smov 0   ;;  %s591_s0 = inlined_call_operand.vmem [shape: f32[2,8,3], index: 0, kind: input, shape index: {}]   ;;  %s592_s1 = inlined_call_operand.vmem [shape: f32[2,3,128], index: 1, kind: input, shape index: {}]   ;;  %s593_s2 = inlined_call_operand.vmem [shape: f32[2,1,128], index: 2, kind: input, shape index: {}]   ;;  %s594_s3 = inlined_call_operand.vmem [shape: s32[2,8,8], index: 3, kind: output, shape index: {}]  }
   0x1   :  { %s539_s14 = smov 0  }
   0x2 LB: > { %s25_s15 = sadd.s32 1, %s503_s13  ;;  %p437_p0 = scmp.ge.s32.totalorder %s507_s14, 1  ;;  %s507_s14 = sphi %s539_s14, %s13_s14   ;;  %s503_s13 = sphi %s537_s13, %s598_s13   ;;  %s499_s12 = sphi %s535_s12, %s597_s12  }
   0x3   : > { %p27_p1 = scmp.ge.s32.totalorder %s25_s15, 2  ;;  %p172_p2 = scmp.lt.s32.totalorder %s507_s14, 3 }
   0x5   : > { %s600_s15 = smov (%p27_p1, %s25_s15), 0  ;;  %p173_p3 = pnand %p437_p0, %p172_p2 }
   0x6   : > { %p207_p4 = scmp.lt.s32.totalorder (!%p173_p3), %s499_s12, 1  ;;  %s511_s20 = smov (!%p173_p3), 127  }
   0x7   : > { %176 = sbr.rel (%p173_p3) target bundleno = 1193 (0x4a9), region = 32  ;;  %s513_s24 = smov (!%p173_p3), 126  }
   0xc   : > { %v509_v0 = vmov 0   ;;  %v510_v1 = vmov 2   ;;  %s602_s12 = smov (!%p207_p4, %s499_s12), 1  ;;  %v512_v4 = vmov 1   ;;  %v274_v20 = vlaneseq }
   0xd   : > { %479 = vset.pattern.permute.xlu1 %v509_v0  ;;  %481 = vset.pattern.permute.xlu2 %v510_v1  ;;  %s438_s16 = sshll.u32 %s602_s12, 3  ;;  %s220_s23 = scalar_lea.vmem %s593_s2, %s602_s12  ;;  %v514_v40 = vmov 0.0  }
   0xe   : > { %483 = vset.pattern.permute.xlu0 %v509_v0  ;;  %s213_s19 = scalar_lea.vmem %s591_s0, %s438_s16  ;;  %s439_s25 = sshll.u32 %s602_s12, 2  ;;  %v484_v22 = vld [vmem:[%s220_s23] ss:$0 sm:$0xff]  ;;  %v275_v23 = vand.u32 127, %v274_v20 }
   0xf   : > { %v228_v2 = vld [vmem:[%s213_s19] sm:$0xff]  ;;  %s217_s28 = scalar_lea.vmem %s592_s1, %s439_s25  ;;  %s227_s4 = scalar_lea.vmem %s594_s3, %s438_s16 }
  0x10   : > { %v231_v3 = vmul.f32 %v228_v2, %v228_v2  ;;  %243 = vperm.xlu1 %479, %v228_v2   ;;  %256 = vperm.xlu2 %481, %v228_v2   ;;  %v229_v10 = vld [vmem:[%s217_s28] sm:$0x7]  ;;  %v276_v27 = vcvt.s32.f32 %v275_v23 }
  0x11   : > { %v246_v11 = vperm.slane %v229_v10, 0  ;;  %v252_v12 = vperm.slane %v229_v10, 1  ;;  %v259_v16 = vperm.slane %v229_v10, 2 }
  0x12   : > { %233 = vrot.lane.b32.xlu0 %v231_v3, %s511_s20  ;;  %vm277_vm0 = vcmp.lt.f32.partialorder %v276_v27, 32.0  ;;  %vm287_vm9 = vcmp.eq.f32.partialorder %v276_v27, 0.0  ;;  %vm293_vm10 = vcmp.eq.f32.partialorder %v276_v27, 1.0  ;;  %vm299_vm11 = vcmp.eq.f32.partialorder %v276_v27, 2.0 }
  0x13   : > { %vm305_vm12 = vcmp.eq.f32.partialorder %v276_v27, 3.0  ;;  %vm311_vm13 = vcmp.eq.f32.partialorder %v276_v27, 4.0  ;;  %vm317_vm14 = vcmp.eq.f32.partialorder %v276_v27, 5.0  ;;  %vm323_vm15 = vcmp.eq.f32.partialorder %v276_v27, 6.0 }
  0x18   : > { %480 = vset.pattern.permute.xlu1 %v512_v4  ;;  %482 = vset.pattern.permute.xlu2 %v509_v0 }
  0x19   : > { %249 = vperm.xlu1 %480, %v228_v2  }
  0x1a   : > { %237 = vrot.lane.b32.xlu0 %v231_v3, %s513_s24 }
  0x6a   : > { %v257_v17 = vpop.permute.xlu2 %256 }
  0x6b   : > { %v260_v19 = vmul.f32 %v259_v16, %v257_v17 }
  0x82   : > { %v244_v9 = vpop.permute.xlu1 %243 }
  0x83   : > { %v247_v14 = vmul.f32 %v246_v11, %v244_v9 }
  0x84   : > { %v234_v5 = vpop.permute.xlu0 %233 }
  0x85   : > { %v236_v6 = vadd.f32 %v234_v5, %v231_v3 }
  0x8b   : > { %v250_v13 = vpop.permute.xlu1 %249 }
  0x8c   : > { %v238_v7 = vpop.permute.xlu0 %237  ;;  %v253_v15 = vmul.f32 %v252_v12, %v250_v13 }
  0x8d   : > { %v240_v8 = vadd.f32 %v238_v7, %v236_v6 }
  0x8e   : > { %v254_v18 = vadd.f32 %v253_v15, %v247_v14 }
  0x8f   : > { %264 = vperm.xlu2 %482, %v240_v8  }
  0x90   : > { %v261_v21 = vadd.f32 %v260_v19, %v254_v18 }
  0x92   : > { %v271_v25 = vmul.f32 2.0, %v261_v21 }
  0xe9   : > { %v265_v24 = vpop.permute.xlu2 %264 }
  0xea   : > { %v270_v26 = vadd.f32 %v484_v22, %v265_v24 }
  0xec   : > { %v272_v28 = vsub.f32 %v270_v26, %v271_v25 }
  0xee   : > { %v273_v29 = vmax.f32 %v272_v28, 0.0 }
  0xf0   : > { %vm278_vm1 = vcmp.lt.f32.partialorder %v273_v29, 0.81 }
  0xf1   : > { %vm569_vm2 = vmand %vm277_vm0, %vm278_vm1 }
  0xf2   : > { %v280_v31 = vsel %vm569_vm2, %v276_v27, 1e+09  ;;  %v441_v41 = vsel %vm569_vm2, 1.0, %v514_v40  ;;  %vm329_vm2 = vcmp.eq.f32.partialorder %v276_v27, 7.0 }
  0xf3   : > { %285 = vmin.xlane.f32.xlu0 %v280_v31 }
 0x166   : > { %v286_v32 = vpop.xlane.xlu0 %285 }
 0x167   : > { %vm289_vm3 = vcmp.eq.f32.partialorder %v276_v27, %v286_v32  ;;  %v288_v46 = vsel %vm287_vm9, %v286_v32, 0.0 }
 0x168   : > { %v290_v33 = vsel %vm289_vm3, 1e+09, %v280_v31 }
 0x169   : > { %291 = vmin.xlane.f32.xlu1 %v290_v33 }
 0x1dc   : > { %v292_v34 = vpop.xlane.xlu1 %291 }
 0x1dd   : > { %vm295_vm4 = vcmp.eq.f32.partialorder %v276_v27, %v292_v34  ;;  %v294_v47 = vsel %vm293_vm10, %v292_v34, %v288_v46 }
 0x1de   : > { %v296_v35 = vsel %vm295_vm4, 1e+09, %v290_v33 }
 0x1df   : > { %297 = vmin.xlane.f32.xlu2 %v296_v35 }
 0x252   : > { %v298_v36 = vpop.xlane.xlu2 %297 }
 0x253   : > { %vm301_vm5 = vcmp.eq.f32.partialorder %v276_v27, %v298_v36  ;;  %v300_v48 = vsel %vm299_vm11, %v298_v36, %v294_v47 }
 0x254   : > { %v302_v37 = vsel %vm301_vm5, 1e+09, %v296_v35  ;;  %vm336_vm5 = vcmask 64512  }
 0x255   : > { %303 = vmin.xlane.f32.xlu2 %v302_v37 }
 0x2c8   : > { %v304_v38 = vpop.xlane.xlu2 %303 }
 0x2c9   : > { %vm307_vm6 = vcmp.eq.f32.partialorder %v276_v27, %v304_v38  ;;  %v306_v49 = vsel %vm305_vm12, %v304_v38, %v300_v48 }
 0x2ca   : > { %v308_v39 = vsel %vm307_vm6, 1e+09, %v302_v37 }
 0x2cb   : > { %309 = vmin.xlane.f32.xlu0 %v308_v39 }
 0x2d3   : > { %283 = vadd.xlane.f32.xlu0 %v441_v41 }
 0x33e   : > { %v310_v42 = vpop.xlane.xlu0 %309 }
 0x33f   : > { %vm313_vm7 = vcmp.eq.f32.partialorder %v276_v27, %v310_v42  ;;  %v312_v50 = vsel %vm311_vm13, %v310_v42, %v306_v49 }
 0x340   : > { %v314_v43 = vsel %vm313_vm7, 1e+09, %v308_v39 }
 0x341   : > { %315 = vmin.xlane.f32.xlu1 %v314_v43 }
 0x346   : > { %v284_v55 = vpop.xlane.xlu0 %283 }
 0x347   : > { %vm331_vm1 = vcmp.gt.f32.partialorder %v284_v55, 0.0  ;;  %vm333_vm3 = vcmp.lt.f32.partialorder %v276_v27, %v284_v55 }
 0x348   : > { %v332_v57 = vsel %vm331_vm1, %v286_v32, 0.0 }
 0x3b4   : > { %v316_v44 = vpop.xlane.xlu1 %315 }
 0x3b5   : > { %vm319_vm8 = vcmp.eq.f32.partialorder %v276_v27, %v316_v44  ;;  %v318_v51 = vsel %vm317_vm14, %v316_v44, %v312_v50 }
 0x3b6   : > { %v320_v45 = vsel %vm319_vm8, 1e+09, %v314_v43 }
 0x3b7   : > { %321 = vmin.xlane.f32.xlu2 %v320_v45 }
 0x42a   : > { %v322_v52 = vpop.xlane.xlu2 %321 }
 0x42b   : > { %v324_v53 = vsel %vm323_vm15, %v322_v52, %v318_v51  ;;  %vm325_vm0 = vcmp.eq.f32.partialorder %v276_v27, %v322_v52 }
 0x42c   : > { %v326_v54 = vsel %vm325_vm0, 1e+09, %v320_v45 }
 0x42d   : > { %327 = vmin.xlane.f32.xlu1 %v326_v54 }
 0x4a0   : > { %v328_v56 = vpop.xlane.xlu1 %327 }
 0x4a1   : > { %v330_v58 = vsel %vm329_vm2, %v328_v56, %v324_v53 }
 0x4a2   : > { %v334_v59 = vsel %vm333_vm3, %v330_v58, %v332_v57 }
 0x4a3   : > { %vm444_vm4 = vcmp.lt.s32.totalorder %v334_v59, 0  ;;  %v445_v60 = vceil.f32 %v334_v59  ;;  %v446_v61 = vfloor.f32 %v334_v59 }
 0x4a5   : > { %v447_v62 = vsel %vm444_vm4, %v445_v60, %v446_v61 }
 0x4a6   : > { %v448_v63 = vcvt.f32.s32 %v447_v62 }
 0x4a8   : > { %337 = vst.msk [vmem:[%s227_s4] sm:$0xff] %vm336_vm5, %v448_v63 }
 0x4a9 PF: > { %s13_s14 = sadd.s32 1, %s507_s14   ;;  %s597_s12 = smov %s503_s13 }
 0x4aa   : > { %p10_p5 = scmp.ge.s32.totalorder %s13_s14, 4   ;;  %s598_s13 = smov %s600_s15 }
 0x4ac   :  { %12 = sbr.rel (!%p10_p5) target bundleno = 2 (0x2), region = 68 }

// kernel: _lambda_.8
= control target key start
LH: loop header
LB: loop body
LE: loop exit
PB: predicated region body
PF: predicated region fallthrough
CT: control target
= control target key end

     0   :  { %s1120_s27 = smov 0   ;;  %s1233_s0 = inlined_call_operand.vmem [shape: bf16[16,8,128], index: 0, kind: input, shape index: {}]   ;;  %s1234_s1 = inlined_call_operand.vmem [shape: f32[16,3], index: 1, kind: input, shape index: {}]   ;;  %s1235_s2 = inlined_call_operand.vmem [shape: bf16[128,128], index: 2, kind: input, shape index: {}]   ;;  %s1236_s3 = inlined_call_operand.vmem [shape: f32[1,128], index: 3, kind: input, shape index: {}]   ;;  %s1237_s4 = inlined_call_operand.vmem [shape: bf16[128,128], index: 4, kind: input, shape index: {}]   ;;  %s1238_s5 = inlined_call_operand.vmem [shape: f32[1,128], index: 5, kind: input, shape index: {}]   ;;  %s1239_s6 = inlined_call_operand.vmem [shape: bf16[128,128], index: 6, kind: input, shape index: {}]   ;;  %s1240_s7 = inlined_call_operand.vmem [shape: f32[1,128], index: 7, kind: input, shape index: {}]   ;;  %s1241_s8 = inlined_call_operand.vmem [shape: bf16[16,128], index: 8, kind: output, shape index: {}]  }
   0x1 LB: > { %s1126_s28 = sadd.s32 4294967295, %s1070_s27   ;;  %p891_p0 = scmp.ge.s32.totalorder %s1070_s27, 1  ;;  %s1070_s27 = sphi %s1120_s27, %s18_s27  }
   0x2   : > { %p272_p1 = scmp.lt.s32.totalorder %s1070_s27, 3 }
   0x4   : > { %p273_p2 = pnand %p891_p0, %p272_p1 }
   0x5   : > { %p315_p3 = scmp.lt.s32.totalorder (!%p273_p2), %s1126_s28, 1  ;;  %s892_s20 = sshll.u32 (!%p273_p2), %s1126_s28, 3 }
   0x6   : > { %276 = sbr.rel (%p273_p2) target bundleno = 537 (0x219), region = 52  ;;  %p310_p4 = scmp.lt.s32.totalorder (!%p273_p2), %s892_s20, 15 }
   0xb   : > { %v1021_v0 = vld [vmem:[%s1235_s2 + $0x38] sm:$0xff]  ;;  %v1072_v1 = vmov 0   ;;  %v1020_v2 = vld [vmem:[%s1235_s2 + $0x30] sm:$0xff]  ;;  %s1138_s11 = scalar_select %p315_p3, %s1126_s28, 1  ;;  %v1073_v3 = vmov 2   ;;  %v1019_v4 = vld [vmem:[%s1235_s2 + $0x28] sm:$0xff] }
   0xc   : > { %1057 = vset.pattern.permute.xlu0 %v1072_v1  ;;  %423 = vmatpush.bf16.msra.mxu0 %v1021_v0  ;;  %v1018_v6 = vld [vmem:[%s1235_s2 + $0x20] sm:$0xff]  ;;  %v1017_v7 = vld [vmem:[%s1235_s2 + $0x18] sm:$0xff]  ;;  %v1074_v8 = vmov 1   ;;  %v1016_v9 = vld [vmem:[%s1235_s2 + $0x10] sm:$0xff]  ;;  %s1243_s20 = smov (!%p310_p4, %s892_s20), 15  ;;  %vm805_vm0 = vcmask 1041409  }
   0xd   : > { %1038 = vmatpush.bf16.msra.mxu3 %v1021_v0  ;;  %1059 = vset.pattern.permute.xlu1 %v1073_v3  ;;  %s894_s12 = sshll.u32 %s1138_s11, 3  ;;  %v1015_v10 = vld [vmem:[%s1235_s2 + $0x8] sm:$0xff]  ;;  %s893_s28 = sshll.u32 %s1243_s20, 2  ;;  %v1014_v11 = vld [vmem:[%s1235_s2] sm:$0xff]  ;;  %v1029_v16 = vld [vmem:[%s1237_s4 + $0x38] sm:$0xff]  ;;  %vm807_vm1 = vcmask 1042434  }
   0xe   : > { %s318_s15 = scalar_lea.vmem %s1234_s1, %s894_s12  ;;  %s313_s12 = scalar_lea.vmem %s1233_s0, %s893_s28  ;;  %587 = vmatpush.bf16.msra.mxu1 %v1029_v16  ;;  %v1028_v17 = vld [vmem:[%s1237_s4 + $0x30] sm:$0xff]  ;;  %v1027_v18 = vld [vmem:[%s1237_s4 + $0x28] sm:$0xff]  ;;  %v1026_v19 = vld [vmem:[%s1237_s4 + $0x20] sm:$0xff]  ;;  %vm809_vm2 = vcmask 1043459   ;;  %vm811_vm3 = vcmask 1044484   ;;  %vm813_vm4 = vcmask 1045509  }
   0xf   : > { %v452_v5 = vld [vmem:[%s318_s15] sm:$0xff]  ;;  %v1011_v13 = vld [vmem:[%s313_s12 + $0x8] sm:$0xff]  ;;  %v1012_v14 = vld [vmem:[%s313_s12 + $0x10] sm:$0xff]  ;;  %vm815_vm5 = vcmask 1046534   ;;  %s895_s13 = sshll.u32 %s1138_s11, 2  ;;  %vm817_vm6 = vcmask 1047559  }
  0x10   : > { %424 = vmatpush.bf16.msra.mxu0 %v1020_v2  ;;  %456 = vperm.xlu0 %1057, %v452_v5   ;;  %v1010_v12 = vld [vmem:[%s313_s12] sm:$0xff]  ;;  %v1013_v15 = vld [vmem:[%s313_s12 + $0x18] sm:$0xff]  ;;  %v1024_v21 = vld [vmem:[%s1237_s4 + $0x10] sm:$0xff]  ;;  %s322_s16 = scalar_lea.vmem %s1241_s8, %s895_s13 }
  0x11   : > { %1039 = vmatpush.bf16.msra.mxu3 %v1020_v2  ;;  %469 = vperm.xlu1 %1059, %v452_v5   ;;  %v1025_v20 = vld [vmem:[%s1237_s4 + $0x18] sm:$0xff]  ;;  %v1023_v22 = vld [vmem:[%s1237_s4 + $0x8] sm:$0xff]  ;;  %v1022_v24 = vld [vmem:[%s1237_s4] sm:$0xff] }
  0x12   : > { %588 = vmatpush.bf16.msra.mxu1 %v1028_v17  ;;  %v331_v25 = vld [vmem:[%s1235_s2] sm:$0xf]  ;;  %v1037_v2 = vld [vmem:[%s1239_s6 + $0x38] sm:$0xff] }
  0x13   : > { %v453_v26 = vunpack.c.l.bf16 %v331_v25  ;;  %v1061_v38 = vld [vmem:[%s1236_s3] ss:$0 sm:$0xff]  ;;  %696 = vmatpush.bf16.msra.mxu2 %v1037_v2 }
  0x14   : > { %425 = vmatpush.bf16.msra.mxu0 %v1019_v4  ;;  %v1063_v2 = vld [vmem:[%s1240_s7] ss:$0 sm:$0xff] }
  0x15   : > { %1040 = vmatpush.bf16.msra.mxu3 %v1019_v4  ;;  %v459_v27 = vperm.slane %v453_v26, 0  ;;  %v465_v28 = vperm.slane %v453_v26, 1  ;;  %v472_v32 = vperm.slane %v453_v26, 2 }
  0x16   : > { %589 = vmatpush.bf16.msra.mxu1 %v1027_v18 }
  0x18   : > { %426 = vmatpush.bf16.msra.mxu0 %v1018_v6  ;;  %1058 = vset.pattern.permute.xlu0 %v1074_v8 }
  0x19   : > { %1041 = vmatpush.bf16.msra.mxu3 %v1018_v6  ;;  %462 = vperm.xlu0 %1058, %v452_v5   ;;  %v1036_v5 = vld [vmem:[%s1239_s6 + $0x30] sm:$0xff] }
  0x1a   : > { %590 = vmatpush.bf16.msra.mxu1 %v1026_v19  ;;  %697 = vmatpush.bf16.msra.mxu2 %v1036_v5 }
  0x1c   : > { %427 = vmatpush.bf16.msra.mxu0 %v1017_v7 }
  0x1d   : > { %1042 = vmatpush.bf16.msra.mxu3 %v1017_v7 }
  0x1e   : > { %591 = vmatpush.bf16.msra.mxu1 %v1025_v20 }
  0x20   : > { %428 = vmatpush.bf16.msra.mxu0 %v1016_v9 }
  0x21   : > { %1043 = vmatpush.bf16.msra.mxu3 %v1016_v9  ;;  %1060 = vset.pattern.permute.xlu0 %v1073_v3 }
  0x22   : > { %592 = vmatpush.bf16.msra.mxu1 %v1024_v21 }
  0x24   : > { %429 = vmatpush.bf16.msra.mxu0 %v1015_v10 }
  0x25   : > { %1044 = vmatpush.bf16.msra.mxu3 %v1015_v10 }
  0x26   : > { %593 = vmatpush.bf16.msra.mxu1 %v1023_v22 }
  0x28   : > { %430 = vmatpush.bf16.msra.mxu0 %v1014_v11 }
  0x29   : > { %1045 = vmatpush.bf16.msra.mxu3 %v1014_v11  ;;  %v1035_v11 = vld [vmem:[%s1239_s6 + $0x28] sm:$0xff] }
  0x2a   : > { %594 = vmatpush.bf16.msra.mxu1 %v1022_v24  ;;  %698 = vmatpush.bf16.msra.mxu2 %v1035_v11 }
  0x2b   : > { %431 = vmatmul.bf16.vlgmr.msra.gmra.mxu0 %v1010_v12 }
  0x2c   : > { %436 = vmatmul.bf16.vlgmr.msra.gmra.mxu3 %v1011_v13 }
  0x3c   : > { %441 = vmatmul.bf16.gmra.mxu3 %v1012_v14  ;;  %v1034_v14 = vld [vmem:[%s1239_s6 + $0x20] sm:$0xff] }
  0x3d   : > { %699 = vmatpush.bf16.msra.mxu2 %v1034_v14 }
  0x4c   : > { %446 = vmatmul.bf16.gmra.mxu3 %v1013_v15 }
  0x82   : > { %v457_v23 = vpop.permute.xlu0 %456 }
  0x83   : > { %v460_v30 = vmul.f32 %v459_v27, %v457_v23  ;;  %v470_v33 = vpop.permute.xlu1 %469 }
  0x84   : > { %v473_v35 = vmul.f32 %v472_v32, %v470_v33  ;;  %v1030_v32 = vld [vmem:[%s1239_s6] sm:$0xff] }
  0x8b   : > { %v463_v29 = vpop.permute.xlu0 %462 }
  0x8c   : > { %v466_v31 = vmul.f32 %v465_v28, %v463_v29  ;;  %v1033_v29 = vld [vmem:[%s1239_s6 + $0x18] sm:$0xff] }
  0x8d   : > { %700 = vmatpush.bf16.msra.mxu2 %v1033_v29 }
  0x8e   : > { %v467_v34 = vadd.f32 %v466_v31, %v460_v30  ;;  %v1032_v30 = vld [vmem:[%s1239_s6 + $0x10] sm:$0xff]  ;;  %v1031_v31 = vld [vmem:[%s1239_s6 + $0x8] sm:$0xff] }
  0x90   : > { %v474_v37 = vadd.f32 %v473_v35, %v467_v34  ;;  %v1062_v34 = vld [vmem:[%s1238_s5] ss:$0 sm:$0xff] }
  0x91   : > { %701 = vmatpush.bf16.msra.mxu2 %v1032_v30 }
  0x92   : > { %v476_v40 = vrot.slane %v474_v37, 1  ;;  %v483_v42 = vperm.slane %v474_v37, 0  ;;  %v478_v52 = vrot.slane %v474_v37, 3  ;;  %v477_v53 = vrot.slane %v474_v37, 2 }
  0x93   : > { %v480_v1 = vrot.slane %v474_v37, 5  ;;  %v479_v3 = vrot.slane %v474_v37, 4  ;;  %v482_v18 = vrot.slane %v474_v37, 7  ;;  %v481_v19 = vrot.slane %v474_v37, 6 }
  0x94   : > { %v484_v46 = vperm.slane %v476_v40, 0  ;;  %v486_v56 = vperm.slane %v478_v52, 0  ;;  %v485_v58 = vperm.slane %v477_v53, 0 }
  0x95   : > { %v488_v7 = vperm.slane %v480_v1, 0  ;;  %v487_v9 = vperm.slane %v479_v3, 0  ;;  %v490_v22 = vperm.slane %v482_v18, 0  ;;  %v489_v23 = vperm.slane %v481_v19, 0  ;;  %702 = vmatpush.bf16.msra.mxu2 %v1031_v31 }
  0x99   : > { %703 = vmatpush.bf16.msra.mxu2 %v1030_v32 }
  0xa8   : > { %v432_v36 = vpop.f32.mrf.mxu0 }
  0xa9   : > { %v433_v39 = vadd.f32 %v1061_v38, %v432_v36 }
  0xab   : > { %v499_v44 = vsub.f32 %v433_v39, %v483_v42 }
  0xad   : > { %v507_v48 = vmax.f32 %v499_v44, 0.0 }
  0xaf   : > { %v437_v41 = vpop.f32.mrf.mxu3 }
  0xb0   : > { %v434_v43 = vpop.f32.mrf.mxu0  ;;  %v438_v55 = vadd.f32 %v1061_v38, %v437_v41 }
  0xb1   : > { %v435_v45 = vadd.f32 %v1061_v38, %v434_v43 }
  0xb2   : > { %v501_v60 = vsub.f32 %v438_v55, %v485_v58 }
  0xb3   : > { %v500_v47 = vsub.f32 %v435_v45, %v484_v46 }
  0xb4   : > { %v509_v62 = vmax.f32 %v501_v60, 0.0 }
  0xb5   : > { %v508_v49 = vmax.f32 %v500_v47, 0.0 }
  0xb7   : > { %v439_v50 = vpop.f32.mrf.mxu3  ;;  %v532_v51 = vpack.c.bf16 %v508_v49, %v507_v48 }
  0xb8   : > { %v440_v54 = vadd.f32 %v1061_v38, %v439_v50 }
  0xb9   : > { %595 = vmatmul.bf16.vlgmr.msra.gmra.mxu1 %v532_v51 }
  0xba   : > { %v502_v59 = vsub.f32 %v440_v54, %v486_v56 }
  0xbc   : > { %v510_v61 = vmax.f32 %v502_v59, 0.0 }
  0xbe   : > { %v533_v0 = vpack.c.bf16 %v510_v61, %v509_v62 }
  0xbf   : > { %v442_v57 = vpop.f32.mrf.mxu3 }
  0xc0   : > { %v443_v6 = vadd.f32 %v1061_v38, %v442_v57 }
  0xc2   : > { %v503_v12 = vsub.f32 %v443_v6, %v487_v9 }
  0xc4   : > { %v511_v15 = vmax.f32 %v503_v12, 0.0 }
  0xc7   : > { %v444_v63 = vpop.f32.mrf.mxu3 }
  0xc8   : > { %v445_v4 = vadd.f32 %v1061_v38, %v444_v63 }
  0xc9   : > { %600 = vmatmul.bf16.gmra.mxu1 %v533_v0 }
  0xca   : > { %v504_v10 = vsub.f32 %v445_v4, %v488_v7 }
  0xcc   : > { %v512_v13 = vmax.f32 %v504_v10, 0.0 }
  0xce   : > { %v534_v16 = vpack.c.bf16 %v512_v13, %v511_v15 }
  0xcf   : > { %v447_v8 = vpop.f32.mrf.mxu3 }
  0xd0   : > { %v448_v21 = vadd.f32 %v1061_v38, %v447_v8 }
  0xd2   : > { %v505_v25 = vsub.f32 %v448_v21, %v489_v23 }
  0xd4   : > { %v513_v27 = vmax.f32 %v505_v25, 0.0 }
  0xd7   : > { %v449_v17 = vpop.f32.mrf.mxu3 }
  0xd8   : > { %v450_v20 = vadd.f32 %v1061_v38, %v449_v17 }
  0xd9   : > { %605 = vmatmul.bf16.gmra.mxu1 %v534_v16 }
  0xda   : > { %v506_v24 = vsub.f32 %v450_v20, %v490_v22 }
  0xdc   : > { %v514_v26 = vmax.f32 %v506_v24, 0.0 }
  0xde   : > { %v535_v28 = vpack.c.bf16 %v514_v26, %v513_v27 }
  0xe9   : > { %610 = vmatmul.bf16.gmra.mxu1 %v535_v28 }
 0x136   : > { %v596_v33 = vpop.f32.mrf.mxu1 }
 0x137   : > { %v597_v35 = vadd.f32 %v1062_v34, %v596_v33 }
 0x139   : > { %v616_v38 = vmax.f32 %v597_v35, 0.0 }
 0x13e   : > { %v598_v36 = vpop.f32.mrf.mxu1 }
 0x13f   : > { %v599_v37 = vadd.f32 %v1062_v34, %v598_v36 }
 0x141   : > { %v617_v39 = vmax.f32 %v599_v37, 0.0 }
 0x143   : > { %v641_v40 = vpack.c.bf16 %v617_v39, %v616_v38 }
 0x145   : > { %704 = vmatmul.bf16.vlgmr.msra.gmra.mxu2 %v641_v40 }
 0x146   : > { %v601_v41 = vpop.f32.mrf.mxu1 }
 0x147   : > { %v602_v42 = vadd.f32 %v1062_v34, %v601_v41 }
 0x149   : > { %v618_v45 = vmax.f32 %v602_v42, 0.0 }
 0x14e   : > { %v603_v43 = vpop.f32.mrf.mxu1 }
 0x14f   : > { %v604_v44 = vadd.f32 %v1062_v34, %v603_v43 }
 0x151   : > { %v619_v46 = vmax.f32 %v604_v44, 0.0 }
 0x153   : > { %v642_v47 = vpack.c.bf16 %v619_v46, %v618_v45 }
 0x155   : > { %709 = vmatmul.bf16.gmra.mxu2 %v642_v47 }
 0x156   : > { %v606_v48 = vpop.f32.mrf.mxu1 }
 0x157   : > { %v607_v49 = vadd.f32 %v1062_v34, %v606_v48 }
 0x159   : > { %v620_v52 = vmax.f32 %v607_v49, 0.0 }
 0x15e   : > { %v608_v50 = vpop.f32.mrf.mxu1 }
 0x15f   : > { %v609_v51 = vadd.f32 %v1062_v34, %v608_v50 }
 0x161   : > { %v621_v53 = vmax.f32 %v609_v51, 0.0 }
 0x163   : > { %v643_v54 = vpack.c.bf16 %v621_v53, %v620_v52 }
 0x165   : > { %714 = vmatmul.bf16.gmra.mxu2 %v643_v54 }
 0x166   : > { %v611_v55 = vpop.f32.mrf.mxu1 }
 0x167   : > { %v612_v56 = vadd.f32 %v1062_v34, %v611_v55 }
 0x169   : > { %v622_v59 = vmax.f32 %v612_v56, 0.0 }
 0x16e   : > { %v613_v57 = vpop.f32.mrf.mxu1 }
 0x16f   : > { %v614_v58 = vadd.f32 %v1062_v34, %v613_v57 }
 0x171   : > { %v623_v60 = vmax.f32 %v614_v58, 0.0 }
 0x173   : > { %v644_v61 = vpack.c.bf16 %v623_v60, %v622_v59 }
 0x175   : > { %719 = vmatmul.bf16.gmra.mxu2 %v644_v61 }
 0x1c8   : > { %v705_v62 = vpop.f32.mrf.mxu2 }
 0x1c9   : > { %v706_v6 = vadd.f32 %v1063_v2, %v705_v62 }
 0x1cb   : > { %v725_v11 = vmax.f32 %v706_v6, 0.0 }
 0x1cd   : > { %v733_v17 = vrot.slane %v725_v11, 4 }
 0x1cf   : > { %v734_v24 = vmax.f32 %v725_v11, %v733_v17 }
 0x1d0   : > { %v707_v63 = vpop.f32.mrf.mxu2 }
 0x1d1   : > { %v708_v3 = vadd.f32 %v1063_v2, %v707_v63  ;;  %v735_v32 = vrot.slane %v734_v24, 2 }
 0x1d3   : > { %v726_v9 = vmax.f32 %v708_v3, 0.0  ;;  %v736_v40 = vmax.f32 %v734_v24, %v735_v32 }
 0x1d5   : > { %v739_v14 = vrot.slane %v726_v9, 4  ;;  %v737_v49 = vrot.slane %v736_v40, 1 }
 0x1d7   : > { %v740_v21 = vmax.f32 %v726_v9, %v739_v14  ;;  %v738_v59 = vmax.f32 %v736_v40, %v737_v49 }
 0x1d8   : > { %v710_v0 = vpop.f32.mrf.mxu2 }
 0x1d9   : > { %v711_v4 = vadd.f32 %v1063_v2, %v710_v0  ;;  %v741_v28 = vrot.slane %v740_v21, 2  ;;  %v781_v6 = vpack.c.bf16 %v738_v59, %v738_v59 }
 0x1db   : > { %v727_v10 = vmax.f32 %v711_v4, 0.0  ;;  %v742_v36 = vmax.f32 %v740_v21, %v741_v28  ;;  %v797_v14 = vunpack.c.l.b16 %v781_v6 }
 0x1dd   : > { %v745_v15 = vrot.slane %v727_v10, 4  ;;  %v743_v44 = vrot.slane %v742_v36, 1 }
 0x1df   : > { %v746_v23 = vmax.f32 %v727_v10, %v745_v15  ;;  %v744_v54 = vmax.f32 %v742_v36, %v743_v44 }
 0x1e0   : > { %v712_v1 = vpop.f32.mrf.mxu2 }
 0x1e1   : > { %v713_v7 = vadd.f32 %v1063_v2, %v712_v1  ;;  %v747_v30 = vrot.slane %v746_v23, 2  ;;  %v782_v0 = vpack.c.bf16 %v744_v54, %v744_v54 }
 0x1e3   : > { %v728_v12 = vmax.f32 %v713_v7, 0.0  ;;  %v748_v39 = vmax.f32 %v746_v23, %v747_v30  ;;  %v798_v9 = vunpack.c.l.b16 %v782_v0 }
 0x1e5   : > { %v751_v18 = vrot.slane %v728_v12, 4  ;;  %v749_v47 = vrot.slane %v748_v39, 1 }
 0x1e7   : > { %v752_v25 = vmax.f32 %v728_v12, %v751_v18  ;;  %v750_v58 = vmax.f32 %v748_v39, %v749_v47  ;;  %v806_v18 = vsel %vm805_vm0, %v798_v9, %v797_v14 }
 0x1e8   : > { %v715_v5 = vpop.f32.mrf.mxu2 }
 0x1e9   : > { %v716_v8 = vadd.f32 %v1063_v2, %v715_v5  ;;  %v753_v33 = vrot.slane %v752_v25, 2  ;;  %v783_v4 = vpack.c.bf16 %v750_v58, %v750_v58 }
 0x1eb   : > { %v729_v13 = vmax.f32 %v716_v8, 0.0  ;;  %v754_v41 = vmax.f32 %v752_v25, %v753_v33  ;;  %v799_v12 = vunpack.c.l.b16 %v783_v4 }
 0x1ed   : > { %v757_v20 = vrot.slane %v729_v13, 4  ;;  %v755_v50 = vrot.slane %v754_v41, 1  ;;  %v808_v21 = vsel %vm807_vm1, %v799_v12, %v806_v18 }
 0x1ef   : > { %v758_v27 = vmax.f32 %v729_v13, %v757_v20  ;;  %v756_v60 = vmax.f32 %v754_v41, %v755_v50 }
 0x1f0   : > { %v717_v16 = vpop.f32.mrf.mxu2 }
 0x1f1   : > { %v718_v19 = vadd.f32 %v1063_v2, %v717_v16  ;;  %v759_v35 = vrot.slane %v758_v27, 2  ;;  %v784_v7 = vpack.c.bf16 %v756_v60, %v756_v60 }
 0x1f3   : > { %v730_v22 = vmax.f32 %v718_v19, 0.0  ;;  %v760_v43 = vmax.f32 %v758_v27, %v759_v35  ;;  %v800_v15 = vunpack.c.l.b16 %v784_v7 }
 0x1f5   : > { %v763_v26 = vrot.slane %v730_v22, 4  ;;  %v761_v53 = vrot.slane %v760_v43, 1  ;;  %v810_v23 = vsel %vm809_vm2, %v800_v15, %v808_v21 }
 0x1f7   : > { %v764_v29 = vmax.f32 %v730_v22, %v763_v26  ;;  %v762_v63 = vmax.f32 %v760_v43, %v761_v53 }
 0x1f8   : > { %v720_v31 = vpop.f32.mrf.mxu2 }
 0x1f9   : > { %v721_v34 = vadd.f32 %v1063_v2, %v720_v31  ;;  %v765_v37 = vrot.slane %v764_v29, 2 }
 0x1fb   : > { %v731_v38 = vmax.f32 %v721_v34, 0.0  ;;  %v766_v45 = vmax.f32 %v764_v29, %v765_v37 }
 0x1fd   : > { %v769_v42 = vrot.slane %v731_v38, 4  ;;  %v767_v55 = vrot.slane %v766_v45, 1 }
 0x1ff   : > { %v770_v46 = vmax.f32 %v731_v38, %v769_v42  ;;  %v768_v1 = vmax.f32 %v766_v45, %v767_v55 }
 0x200   : > { %v722_v48 = vpop.f32.mrf.mxu2 }
 0x201   : > { %v771_v51 = vrot.slane %v770_v46, 2  ;;  %v723_v52 = vadd.f32 %v1063_v2, %v722_v48  ;;  %v785_v2 = vpack.c.bf16 %v762_v63, %v762_v63  ;;  %v786_v10 = vpack.c.bf16 %v768_v1, %v768_v1 }
 0x203   : > { %v772_v56 = vmax.f32 %v770_v46, %v771_v51  ;;  %v732_v57 = vmax.f32 %v723_v52, 0.0  ;;  %v801_v17 = vunpack.c.l.b16 %v785_v2  ;;  %v802_v19 = vunpack.c.l.b16 %v786_v10 }
 0x205   : > { %v773_v61 = vrot.slane %v772_v56, 1  ;;  %v775_v62 = vrot.slane %v732_v57, 4  ;;  %v812_v25 = vsel %vm811_vm3, %v801_v17, %v810_v23 }
 0x206   : > { %v814_v26 = vsel %vm813_vm4, %v802_v19, %v812_v25 }
 0x207   : > { %v776_v3 = vmax.f32 %v732_v57, %v775_v62  ;;  %v774_v5 = vmax.f32 %v772_v56, %v773_v61 }
 0x209   : > { %v777_v8 = vrot.slane %v776_v3, 2  ;;  %v787_v13 = vpack.c.bf16 %v774_v5, %v774_v5 }
 0x20b   : > { %v778_v11 = vmax.f32 %v776_v3, %v777_v8  ;;  %v803_v22 = vunpack.c.l.b16 %v787_v13 }
 0x20d   : > { %v779_v16 = vrot.slane %v778_v11, 1  ;;  %v816_v28 = vsel %vm815_vm5, %v803_v22, %v814_v26 }
 0x20f   : > { %v780_v20 = vmax.f32 %v778_v11, %v779_v16 }
 0x211   : > { %v788_v24 = vpack.c.bf16 %v780_v20, %v780_v20 }
 0x213   : > { %v804_v27 = vunpack.c.l.b16 %v788_v24 }
 0x215   : > { %v818_v29 = vsel %vm817_vm6, %v804_v27, %v816_v28 }
 0x216   : > { %v819_v30 = vpack.c.b16 %v818_v29, %v818_v29 }
 0x218   : > { %821 = vst [vmem:[%s322_s16] sm:$0xf] %v819_v30 }
 0x219 PF: > { %s18_s27 = sadd.s32 1, %s1070_s27  }
 0x21a   : > { %p15_p5 = scmp.ge.s32.totalorder %s18_s27, 4  }
 0x21c   :  { %17 = sbr.rel (!%p15_p5) target bundleno = 1 (0x1), region = 85 }

// kernel: _lambda_.10
= control target key start
LH: loop header
LB: loop body
LE: loop exit
PB: predicated region body
PF: predicated region fallthrough
CT: control target
= control target key end

     0   :  { %v690_v1 = vmov 0   ;;  %v691_v4 = vmov 2   ;;  %v692_v7 = vmov 1   ;;  %vm511_vm0 = vcmask 1041409   ;;  %s840_s2 = inlined_call_operand.vmem [shape: bf16[128,128], index: 2, kind: input, shape index: {}]   ;;  %s841_s1 = inlined_call_operand.vmem [shape: f32[8,3], index: 1, kind: input, shape index: {}]   ;;  %s842_s3 = inlined_call_operand.vmem [shape: f32[1,128], index: 3, kind: input, shape index: {}]   ;;  %s843_s0 = inlined_call_operand.vmem [shape: bf16[8,8,128], index: 0, kind: input, shape index: {}]   ;;  %s844_s4 = inlined_call_operand.vmem [shape: bf16[128,128], index: 4, kind: input, shape index: {}]   ;;  %s845_s5 = inlined_call_operand.vmem [shape: f32[1,128], index: 5, kind: input, shape index: {}]   ;;  %s846_s6 = inlined_call_operand.vmem [shape: bf16[128,128], index: 6, kind: input, shape index: {}]   ;;  %s847_s7 = inlined_call_operand.vmem [shape: f32[1,128], index: 7, kind: input, shape index: {}]   ;;  %s848_s8 = inlined_call_operand.vmem [shape: bf16[8,128], index: 8, kind: output, shape index: {}]  }
   0x1   :  { %v655_v0 = vld [vmem:[%s840_s2 + $0x38] sm:$0xff]  ;;  %683 = vset.pattern.permute.xlu0 %v690_v1  ;;  %v654_v2 = vld [vmem:[%s840_s2 + $0x30] sm:$0xff]  ;;  %v158_v3 = vld [vmem:[%s841_s1] sm:$0xff]  ;;  %685 = vset.pattern.permute.xlu1 %v691_v4  ;;  %vm513_vm1 = vcmask 1042434   ;;  %vm515_vm2 = vcmask 1043459   ;;  %vm517_vm3 = vcmask 1044484  }
   0x2   :  { %129 = vmatpush.bf16.msra.mxu0 %v655_v0  ;;  %672 = vmatpush.bf16.msra.mxu3 %v655_v0  ;;  %v653_v5 = vld [vmem:[%s840_s2 + $0x28] sm:$0xff]  ;;  %v652_v6 = vld [vmem:[%s840_s2 + $0x20] sm:$0xff]  ;;  %v651_v8 = vld [vmem:[%s840_s2 + $0x18] sm:$0xff]  ;;  %vm519_vm4 = vcmask 1045509   ;;  %vm521_vm5 = vcmask 1046534   ;;  %vm523_vm6 = vcmask 1047559  }
   0x3   :  { %162 = vperm.xlu0 %683, %v158_v3   ;;  %175 = vperm.xlu1 %685, %v158_v3   ;;  %v650_v9 = vld [vmem:[%s840_s2 + $0x10] sm:$0xff]  ;;  %v649_v10 = vld [vmem:[%s840_s2 + $0x8] sm:$0xff]  ;;  %v648_v11 = vld [vmem:[%s840_s2] sm:$0xff] }
   0x4   :  { %v644_v12 = vld [vmem:[%s843_s0] sm:$0xff]  ;;  %v645_v13 = vld [vmem:[%s843_s0 + $0x8] sm:$0xff]  ;;  %v646_v14 = vld [vmem:[%s843_s0 + $0x10] sm:$0xff] }
   0x5   :  { %v647_v15 = vld [vmem:[%s843_s0 + $0x18] sm:$0xff]  ;;  %v662_v17 = vld [vmem:[%s844_s4 + $0x30] sm:$0xff]  ;;  %v661_v18 = vld [vmem:[%s844_s4 + $0x28] sm:$0xff] }
   0x6   :  { %130 = vmatpush.bf16.msra.mxu0 %v654_v2  ;;  %673 = vmatpush.bf16.msra.mxu3 %v654_v2  ;;  %v663_v16 = vld [vmem:[%s844_s4 + $0x38] sm:$0xff]  ;;  %v660_v19 = vld [vmem:[%s844_s4 + $0x20] sm:$0xff]  ;;  %v658_v21 = vld [vmem:[%s844_s4 + $0x10] sm:$0xff] }
   0x7   :  { %293 = vmatpush.bf16.msra.mxu1 %v663_v16  ;;  %v659_v20 = vld [vmem:[%s844_s4 + $0x18] sm:$0xff]  ;;  %v657_v22 = vld [vmem:[%s844_s4 + $0x8] sm:$0xff]  ;;  %v656_v24 = vld [vmem:[%s844_s4] sm:$0xff] }
   0x8   :  { %v37_v25 = vld [vmem:[%s840_s2] sm:$0xf]  ;;  %v671_v2 = vld [vmem:[%s846_s6 + $0x38] sm:$0xff] }
   0x9   :  { %v159_v26 = vunpack.c.l.bf16 %v37_v25  ;;  %v687_v38 = vld [vmem:[%s842_s3] ss:$0 sm:$0xff]  ;;  %402 = vmatpush.bf16.msra.mxu2 %v671_v2 }
   0xa   :  { %131 = vmatpush.bf16.msra.mxu0 %v653_v5  ;;  %674 = vmatpush.bf16.msra.mxu3 %v653_v5  ;;  %v670_v5 = vld [vmem:[%s846_s6 + $0x30] sm:$0xff]  ;;  %v689_v2 = vld [vmem:[%s847_s7] ss:$0 sm:$0xff] }
   0xb   :  { %684 = vset.pattern.permute.xlu0 %v692_v7  ;;  %294 = vmatpush.bf16.msra.mxu1 %v662_v17  ;;  %v165_v27 = vperm.slane %v159_v26, 0  ;;  %v171_v28 = vperm.slane %v159_v26, 1  ;;  %v178_v32 = vperm.slane %v159_v26, 2 }
   0xc   :  { %168 = vperm.xlu0 %684, %v158_v3  }
   0xd   :  { %403 = vmatpush.bf16.msra.mxu2 %v670_v5 }
   0xe   :  { %132 = vmatpush.bf16.msra.mxu0 %v652_v6  ;;  %675 = vmatpush.bf16.msra.mxu3 %v652_v6 }
   0xf   :  { %295 = vmatpush.bf16.msra.mxu1 %v661_v18 }
  0x12   :  { %133 = vmatpush.bf16.msra.mxu0 %v651_v8  ;;  %676 = vmatpush.bf16.msra.mxu3 %v651_v8 }
  0x13   :  { %296 = vmatpush.bf16.msra.mxu1 %v660_v19 }
  0x14   :  { %686 = vset.pattern.permute.xlu0 %v691_v4 }
  0x16   :  { %134 = vmatpush.bf16.msra.mxu0 %v650_v9  ;;  %677 = vmatpush.bf16.msra.mxu3 %v650_v9 }
  0x17   :  { %297 = vmatpush.bf16.msra.mxu1 %v659_v20 }
  0x1a   :  { %135 = vmatpush.bf16.msra.mxu0 %v649_v10  ;;  %678 = vmatpush.bf16.msra.mxu3 %v649_v10 }
  0x1b   :  { %298 = vmatpush.bf16.msra.mxu1 %v658_v21 }
  0x1e   :  { %136 = vmatpush.bf16.msra.mxu0 %v648_v11  ;;  %679 = vmatpush.bf16.msra.mxu3 %v648_v11  ;;  %v669_v11 = vld [vmem:[%s846_s6 + $0x28] sm:$0xff] }
  0x1f   :  { %299 = vmatpush.bf16.msra.mxu1 %v657_v22  ;;  %404 = vmatpush.bf16.msra.mxu2 %v669_v11 }
  0x21   :  { %137 = vmatmul.bf16.vlgmr.msra.gmra.mxu0 %v644_v12  ;;  %142 = vmatmul.bf16.vlgmr.msra.gmra.mxu3 %v645_v13 }
  0x23   :  { %300 = vmatpush.bf16.msra.mxu1 %v656_v24 }
  0x31   :  { %147 = vmatmul.bf16.gmra.mxu3 %v646_v14  ;;  %v668_v14 = vld [vmem:[%s846_s6 + $0x20] sm:$0xff] }
  0x32   :  { %405 = vmatpush.bf16.msra.mxu2 %v668_v14 }
  0x41   :  { %152 = vmatmul.bf16.gmra.mxu3 %v647_v15 }
  0x75   :  { %v163_v23 = vpop.permute.xlu0 %162  ;;  %v176_v33 = vpop.permute.xlu1 %175 }
  0x76   :  { %v166_v30 = vmul.f32 %v165_v27, %v163_v23  ;;  %v179_v35 = vmul.f32 %v178_v32, %v176_v33  ;;  %v664_v32 = vld [vmem:[%s846_s6] sm:$0xff] }
  0x7e   :  { %v169_v29 = vpop.permute.xlu0 %168 }
  0x7f   :  { %v172_v31 = vmul.f32 %v171_v28, %v169_v29  ;;  %v667_v29 = vld [vmem:[%s846_s6 + $0x18] sm:$0xff] }
  0x80   :  { %406 = vmatpush.bf16.msra.mxu2 %v667_v29 }
  0x81   :  { %v173_v34 = vadd.f32 %v172_v31, %v166_v30  ;;  %v666_v30 = vld [vmem:[%s846_s6 + $0x10] sm:$0xff]  ;;  %v665_v31 = vld [vmem:[%s846_s6 + $0x8] sm:$0xff] }
  0x83   :  { %v180_v37 = vadd.f32 %v179_v35, %v173_v34  ;;  %v688_v34 = vld [vmem:[%s845_s5] ss:$0 sm:$0xff] }
  0x84   :  { %407 = vmatpush.bf16.msra.mxu2 %v666_v30 }
  0x85   :  { %v182_v40 = vrot.slane %v180_v37, 1  ;;  %v189_v42 = vperm.slane %v180_v37, 0  ;;  %v184_v52 = vrot.slane %v180_v37, 3  ;;  %v183_v53 = vrot.slane %v180_v37, 2 }
  0x86   :  { %v186_v1 = vrot.slane %v180_v37, 5  ;;  %v185_v3 = vrot.slane %v180_v37, 4  ;;  %v188_v18 = vrot.slane %v180_v37, 7  ;;  %v187_v19 = vrot.slane %v180_v37, 6 }
  0x87   :  { %v190_v46 = vperm.slane %v182_v40, 0  ;;  %v192_v56 = vperm.slane %v184_v52, 0  ;;  %v191_v58 = vperm.slane %v183_v53, 0 }
  0x88   :  { %v194_v7 = vperm.slane %v186_v1, 0  ;;  %v193_v9 = vperm.slane %v185_v3, 0  ;;  %v196_v22 = vperm.slane %v188_v18, 0  ;;  %v195_v23 = vperm.slane %v187_v19, 0  ;;  %408 = vmatpush.bf16.msra.mxu2 %v665_v31 }
  0x8c   :  { %409 = vmatpush.bf16.msra.mxu2 %v664_v32 }
  0x9e   :  { %v138_v36 = vpop.f32.mrf.mxu0 }
  0x9f   :  { %v139_v39 = vadd.f32 %v687_v38, %v138_v36 }
  0xa1   :  { %v205_v44 = vsub.f32 %v139_v39, %v189_v42 }
  0xa3   :  { %v213_v48 = vmax.f32 %v205_v44, 0.0 }
  0xa4   :  { %v143_v41 = vpop.f32.mrf.mxu3 }
  0xa5   :  { %v144_v55 = vadd.f32 %v687_v38, %v143_v41 }
  0xa6   :  { %v140_v43 = vpop.f32.mrf.mxu0 }
  0xa7   :  { %v141_v45 = vadd.f32 %v687_v38, %v140_v43  ;;  %v207_v60 = vsub.f32 %v144_v55, %v191_v58 }
  0xa9   :  { %v206_v47 = vsub.f32 %v141_v45, %v190_v46  ;;  %v215_v62 = vmax.f32 %v207_v60, 0.0 }
  0xab   :  { %v214_v49 = vmax.f32 %v206_v47, 0.0 }
  0xac   :  { %v145_v50 = vpop.f32.mrf.mxu3 }
  0xad   :  { %v238_v51 = vpack.c.bf16 %v214_v49, %v213_v48  ;;  %v146_v54 = vadd.f32 %v687_v38, %v145_v50 }
  0xaf   :  { %301 = vmatmul.bf16.vlgmr.msra.gmra.mxu1 %v238_v51  ;;  %v208_v59 = vsub.f32 %v146_v54, %v192_v56 }
  0xb1   :  { %v216_v61 = vmax.f32 %v208_v59, 0.0 }
  0xb3   :  { %v239_v0 = vpack.c.bf16 %v216_v61, %v215_v62 }
  0xb4   :  { %v148_v57 = vpop.f32.mrf.mxu3 }
  0xb5   :  { %v149_v6 = vadd.f32 %v687_v38, %v148_v57 }
  0xb7   :  { %v209_v12 = vsub.f32 %v149_v6, %v193_v9 }
  0xb9   :  { %v217_v15 = vmax.f32 %v209_v12, 0.0 }
  0xbc   :  { %v150_v63 = vpop.f32.mrf.mxu3 }
  0xbd   :  { %v151_v4 = vadd.f32 %v687_v38, %v150_v63 }
  0xbf   :  { %306 = vmatmul.bf16.gmra.mxu1 %v239_v0  ;;  %v210_v10 = vsub.f32 %v151_v4, %v194_v7 }
  0xc1   :  { %v218_v13 = vmax.f32 %v210_v10, 0.0 }
  0xc3   :  { %v240_v16 = vpack.c.bf16 %v218_v13, %v217_v15 }
  0xc4   :  { %v153_v8 = vpop.f32.mrf.mxu3 }
  0xc5   :  { %v154_v21 = vadd.f32 %v687_v38, %v153_v8 }
  0xc7   :  { %v211_v25 = vsub.f32 %v154_v21, %v195_v23 }
  0xc9   :  { %v219_v27 = vmax.f32 %v211_v25, 0.0 }
  0xcc   :  { %v155_v17 = vpop.f32.mrf.mxu3 }
  0xcd   :  { %v156_v20 = vadd.f32 %v687_v38, %v155_v17 }
  0xcf   :  { %311 = vmatmul.bf16.gmra.mxu1 %v240_v16  ;;  %v212_v24 = vsub.f32 %v156_v20, %v196_v22 }
  0xd1   :  { %v220_v26 = vmax.f32 %v212_v24, 0.0 }
  0xd3   :  { %v241_v28 = vpack.c.bf16 %v220_v26, %v219_v27 }
  0xdf   :  { %316 = vmatmul.bf16.gmra.mxu1 %v241_v28 }
 0x12c   :  { %v302_v33 = vpop.f32.mrf.mxu1 }
 0x12d   :  { %v303_v35 = vadd.f32 %v688_v34, %v302_v33 }
 0x12f   :  { %v322_v38 = vmax.f32 %v303_v35, 0.0 }
 0x134   :  { %v304_v36 = vpop.f32.mrf.mxu1 }
 0x135   :  { %v305_v37 = vadd.f32 %v688_v34, %v304_v36 }
 0x137   :  { %v323_v39 = vmax.f32 %v305_v37, 0.0 }
 0x139   :  { %v347_v40 = vpack.c.bf16 %v323_v39, %v322_v38 }
 0x13b   :  { %410 = vmatmul.bf16.vlgmr.msra.gmra.mxu2 %v347_v40 }
 0x13c   :  { %v307_v41 = vpop.f32.mrf.mxu1 }
 0x13d   :  { %v308_v42 = vadd.f32 %v688_v34, %v307_v41 }
 0x13f   :  { %v324_v45 = vmax.f32 %v308_v42, 0.0 }
 0x144   :  { %v309_v43 = vpop.f32.mrf.mxu1 }
 0x145   :  { %v310_v44 = vadd.f32 %v688_v34, %v309_v43 }
 0x147   :  { %v325_v46 = vmax.f32 %v310_v44, 0.0 }
 0x149   :  { %v348_v47 = vpack.c.bf16 %v325_v46, %v324_v45 }
 0x14b   :  { %415 = vmatmul.bf16.gmra.mxu2 %v348_v47 }
 0x14c   :  { %v312_v48 = vpop.f32.mrf.mxu1 }
 0x14d   :  { %v313_v49 = vadd.f32 %v688_v34, %v312_v48 }
 0x14f   :  { %v326_v52 = vmax.f32 %v313_v49, 0.0 }
 0x154   :  { %v314_v50 = vpop.f32.mrf.mxu1 }
 0x155   :  { %v315_v51 = vadd.f32 %v688_v34, %v314_v50 }
 0x157   :  { %v327_v53 = vmax.f32 %v315_v51, 0.0 }
 0x159   :  { %v349_v54 = vpack.c.bf16 %v327_v53, %v326_v52 }
 0x15b   :  { %420 = vmatmul.bf16.gmra.mxu2 %v349_v54 }
 0x15c   :  { %v317_v55 = vpop.f32.mrf.mxu1 }
 0x15d   :  { %v318_v56 = vadd.f32 %v688_v34, %v317_v55 }
 0x15f   :  { %v328_v59 = vmax.f32 %v318_v56, 0.0 }
 0x164   :  { %v319_v57 = vpop.f32.mrf.mxu1 }
 0x165   :  { %v320_v58 = vadd.f32 %v688_v34, %v319_v57 }
 0x167   :  { %v329_v60 = vmax.f32 %v320_v58, 0.0 }
 0x169   :  { %v350_v61 = vpack.c.bf16 %v329_v60, %v328_v59 }
 0x16b   :  { %425 = vmatmul.bf16.gmra.mxu2 %v350_v61 }
 0x1be   :  { %v411_v62 = vpop.f32.mrf.mxu2 }
 0x1bf   :  { %v412_v6 = vadd.f32 %v689_v2, %v411_v62 }
 0x1c1   :  { %v431_v11 = vmax.f32 %v412_v6, 0.0 }
 0x1c3   :  { %v439_v17 = vrot.slane %v431_v11, 4 }
 0x1c5   :  { %v440_v24 = vmax.f32 %v431_v11, %v439_v17 }
 0x1c6   :  { %v413_v63 = vpop.f32.mrf.mxu2 }
 0x1c7   :  { %v414_v3 = vadd.f32 %v689_v2, %v413_v63  ;;  %v441_v32 = vrot.slane %v440_v24, 2 }
 0x1c9   :  { %v432_v9 = vmax.f32 %v414_v3, 0.0  ;;  %v442_v40 = vmax.f32 %v440_v24, %v441_v32 }
 0x1cb   :  { %v445_v14 = vrot.slane %v432_v9, 4  ;;  %v443_v49 = vrot.slane %v442_v40, 1 }
 0x1cd   :  { %v446_v21 = vmax.f32 %v432_v9, %v445_v14  ;;  %v444_v59 = vmax.f32 %v442_v40, %v443_v49 }
 0x1ce   :  { %v416_v0 = vpop.f32.mrf.mxu2 }
 0x1cf   :  { %v417_v4 = vadd.f32 %v689_v2, %v416_v0  ;;  %v447_v28 = vrot.slane %v446_v21, 2  ;;  %v487_v6 = vpack.c.bf16 %v444_v59, %v444_v59 }
 0x1d1   :  { %v433_v10 = vmax.f32 %v417_v4, 0.0  ;;  %v448_v36 = vmax.f32 %v446_v21, %v447_v28  ;;  %v503_v14 = vunpack.c.l.b16 %v487_v6 }
 0x1d3   :  { %v451_v15 = vrot.slane %v433_v10, 4  ;;  %v449_v44 = vrot.slane %v448_v36, 1 }
 0x1d5   :  { %v452_v23 = vmax.f32 %v433_v10, %v451_v15  ;;  %v450_v54 = vmax.f32 %v448_v36, %v449_v44 }
 0x1d6   :  { %v418_v1 = vpop.f32.mrf.mxu2 }
 0x1d7   :  { %v419_v7 = vadd.f32 %v689_v2, %v418_v1  ;;  %v453_v30 = vrot.slane %v452_v23, 2  ;;  %v488_v0 = vpack.c.bf16 %v450_v54, %v450_v54 }
 0x1d9   :  { %v434_v12 = vmax.f32 %v419_v7, 0.0  ;;  %v454_v39 = vmax.f32 %v452_v23, %v453_v30  ;;  %v504_v9 = vunpack.c.l.b16 %v488_v0 }
 0x1db   :  { %v457_v18 = vrot.slane %v434_v12, 4  ;;  %v455_v47 = vrot.slane %v454_v39, 1 }
 0x1dd   :  { %v458_v25 = vmax.f32 %v434_v12, %v457_v18  ;;  %v456_v58 = vmax.f32 %v454_v39, %v455_v47  ;;  %v512_v18 = vsel %vm511_vm0, %v504_v9, %v503_v14 }
 0x1de   :  { %v421_v5 = vpop.f32.mrf.mxu2 }
 0x1df   :  { %v422_v8 = vadd.f32 %v689_v2, %v421_v5  ;;  %v459_v33 = vrot.slane %v458_v25, 2  ;;  %v489_v4 = vpack.c.bf16 %v456_v58, %v456_v58 }
 0x1e1   :  { %v435_v13 = vmax.f32 %v422_v8, 0.0  ;;  %v460_v41 = vmax.f32 %v458_v25, %v459_v33  ;;  %v505_v12 = vunpack.c.l.b16 %v489_v4 }
 0x1e3   :  { %v463_v20 = vrot.slane %v435_v13, 4  ;;  %v461_v50 = vrot.slane %v460_v41, 1  ;;  %v514_v21 = vsel %vm513_vm1, %v505_v12, %v512_v18 }
 0x1e5   :  { %v464_v27 = vmax.f32 %v435_v13, %v463_v20  ;;  %v462_v60 = vmax.f32 %v460_v41, %v461_v50 }
 0x1e6   :  { %v423_v16 = vpop.f32.mrf.mxu2 }
 0x1e7   :  { %v424_v19 = vadd.f32 %v689_v2, %v423_v16  ;;  %v465_v35 = vrot.slane %v464_v27, 2  ;;  %v490_v7 = vpack.c.bf16 %v462_v60, %v462_v60 }
 0x1e9   :  { %v436_v22 = vmax.f32 %v424_v19, 0.0  ;;  %v466_v43 = vmax.f32 %v464_v27, %v465_v35  ;;  %v506_v15 = vunpack.c.l.b16 %v490_v7 }
 0x1eb   :  { %v469_v26 = vrot.slane %v436_v22, 4  ;;  %v467_v53 = vrot.slane %v466_v43, 1  ;;  %v516_v23 = vsel %vm515_vm2, %v506_v15, %v514_v21 }
 0x1ed   :  { %v470_v29 = vmax.f32 %v436_v22, %v469_v26  ;;  %v468_v63 = vmax.f32 %v466_v43, %v467_v53 }
 0x1ee   :  { %v426_v31 = vpop.f32.mrf.mxu2 }
 0x1ef   :  { %v427_v34 = vadd.f32 %v689_v2, %v426_v31  ;;  %v471_v37 = vrot.slane %v470_v29, 2 }
 0x1f1   :  { %v437_v38 = vmax.f32 %v427_v34, 0.0  ;;  %v472_v45 = vmax.f32 %v470_v29, %v471_v37 }
 0x1f3   :  { %v475_v42 = vrot.slane %v437_v38, 4  ;;  %v473_v55 = vrot.slane %v472_v45, 1 }
 0x1f5   :  { %v476_v46 = vmax.f32 %v437_v38, %v475_v42  ;;  %v474_v1 = vmax.f32 %v472_v45, %v473_v55 }
 0x1f6   :  { %v428_v48 = vpop.f32.mrf.mxu2 }
 0x1f7   :  { %v477_v51 = vrot.slane %v476_v46, 2  ;;  %v429_v52 = vadd.f32 %v689_v2, %v428_v48  ;;  %v491_v2 = vpack.c.bf16 %v468_v63, %v468_v63  ;;  %v492_v10 = vpack.c.bf16 %v474_v1, %v474_v1 }
 0x1f9   :  { %v478_v56 = vmax.f32 %v476_v46, %v477_v51  ;;  %v438_v57 = vmax.f32 %v429_v52, 0.0  ;;  %v507_v17 = vunpack.c.l.b16 %v491_v2  ;;  %v508_v19 = vunpack.c.l.b16 %v492_v10 }
 0x1fb   :  { %v479_v61 = vrot.slane %v478_v56, 1  ;;  %v481_v62 = vrot.slane %v438_v57, 4  ;;  %v518_v25 = vsel %vm517_vm3, %v507_v17, %v516_v23 }
 0x1fc   :  { %v520_v26 = vsel %vm519_vm4, %v508_v19, %v518_v25 }
 0x1fd   :  { %v482_v3 = vmax.f32 %v438_v57, %v481_v62  ;;  %v480_v5 = vmax.f32 %v478_v56, %v479_v61 }
 0x1ff   :  { %v483_v8 = vrot.slane %v482_v3, 2  ;;  %v493_v13 = vpack.c.bf16 %v480_v5, %v480_v5 }
 0x201   :  { %v484_v11 = vmax.f32 %v482_v3, %v483_v8  ;;  %v509_v22 = vunpack.c.l.b16 %v493_v13 }
 0x203   :  { %v485_v16 = vrot.slane %v484_v11, 1  ;;  %v522_v28 = vsel %vm521_vm5, %v509_v22, %v520_v26 }
 0x205   :  { %v486_v20 = vmax.f32 %v484_v11, %v485_v16 }
 0x207   :  { %v494_v24 = vpack.c.bf16 %v486_v20, %v486_v20 }
 0x209   :  { %v510_v27 = vunpack.c.l.b16 %v494_v24 }
 0x20b   :  { %v524_v29 = vsel %vm523_vm6, %v510_v27, %v522_v28 }
 0x20c   :  { %v525_v30 = vpack.c.b16 %v524_v29, %v524_v29 }
 0x20e   :  { %527 = vst [vmem:[%s848_s8] sm:$0xf] %v525_v30 }

// kernel: _lambda_.11
= control target key start
LH: loop header
LB: loop body
LE: loop exit
PB: predicated region body
PF: predicated region fallthrough
CT: control target
= control target key end

     0   :  { %s1347_s13 = smov 0   ;;  %s1349_s14 = smov 0   ;;  %s1514_s0 = inlined_call_operand.vmem [shape: f32[2,8,3], index: 0, kind: input, shape index: {}]   ;;  %s1515_s1 = inlined_call_operand.vmem [shape: f32[2,3,128], index: 1, kind: input, shape index: {}]   ;;  %s1516_s2 = inlined_call_operand.vmem [shape: f32[2,1,128], index: 2, kind: input, shape index: {}]   ;;  %s1517_s3 = inlined_call_operand.vmem [shape: bf16[2,128,128], index: 3, kind: input, shape index: {}]   ;;  %s1518_s4 = inlined_call_operand.vmem [shape: bf16[2,8,128], index: 4, kind: input, shape index: {}]   ;;  %s1519_s5 = inlined_call_operand.vmem [shape: bf16[128,128], index: 5, kind: input, shape index: {}]   ;;  %s1520_s6 = inlined_call_operand.vmem [shape: bf16[128,128], index: 6, kind: input, shape index: {}]   ;;  %s1521_s7 = inlined_call_operand.vmem [shape: f32[1,128], index: 7, kind: input, shape index: {}]   ;;  %s1522_s8 = inlined_call_operand.vmem [shape: bf16[128,128], index: 8, kind: input, shape index: {}]   ;;  %s1523_s9 = inlined_call_operand.vmem [shape: f32[1,128], index: 9, kind: input, shape index: {}]   ;;  %s1524_s10 = inlined_call_operand.vmem [shape: bf16[2,8,128], index: 10, kind: output, shape index: {}]  }
   0x1   :  { %s1351_s15 = smov 0  }
   0x2 LB: > { %s32_s16 = sadd.s32 1, %s1280_s14  ;;  %p1044_p0 = scmp.ge.s32.totalorder %s1284_s15, 1  ;;  %s1284_s15 = sphi %s1351_s15, %s20_s15   ;;  %s1280_s14 = sphi %s1349_s14, %s1526_s14   ;;  %s1276_s13 = sphi %s1347_s13, %s1525_s13  }
   0x3   : > { %p34_p1 = scmp.ge.s32.totalorder %s32_s16, 2  ;;  %p371_p2 = scmp.lt.s32.totalorder %s1284_s15, 3 }
   0x5   : > { %s1528_s16 = smov (%p34_p1, %s32_s16), 0  ;;  %p372_p3 = pnand %p1044_p0, %p371_p2 }
   0x6   : > { %p432_p4 = scmp.lt.s32.totalorder (!%p372_p3), %s1276_s13, 1  ;;  %s1288_s21 = smov (!%p372_p3), 127  }
   0x7   : > { %375 = sbr.rel (%p372_p3) target bundleno = 1367 (0x557), region = 60  ;;  %s1290_s25 = smov (!%p372_p3), 126  }
   0xc   : > { %v1286_v0 = vmov 0   ;;  %v1287_v1 = vmov 2   ;;  %s1530_s13 = smov (!%p432_p4, %s1276_s13), 1  ;;  %v1289_v4 = vmov 1   ;;  %v511_v18 = vlaneseq }
   0xd   : > { %1246 = vset.pattern.permute.xlu1 %v1286_v0  ;;  %1248 = vset.pattern.permute.xlu2 %v1287_v1  ;;  %s1045_s17 = sshll.u32 %s1530_s13, 3  ;;  %s445_s24 = scalar_lea.vmem %s1516_s2, %s1530_s13  ;;  %v1291_v34 = vmov 0.0  }
   0xe   : > { %1250 = vset.pattern.permute.xlu0 %v1286_v0  ;;  %s438_s20 = scalar_lea.vmem %s1514_s0, %s1045_s17  ;;  %s1376_s26 = sshll.u32 %s1530_s13, 2  ;;  %v512_v21 = vand.u32 127, %v511_v18  ;;  %v1251_v23 = vld [vmem:[%s445_s24] ss:$0 sm:$0xff] }
   0xf   : > { %v465_v2 = vld [vmem:[%s438_s20] sm:$0xff]  ;;  %s442_s29 = scalar_lea.vmem %s1515_s1, %s1376_s26  ;;  %s1152_s30 = sshll.u32 %s1530_s13, 6 }
  0x10   : > { %v468_v3 = vmul.f32 %v465_v2, %v465_v2  ;;  %480 = vperm.xlu1 %1246, %v465_v2   ;;  %493 = vperm.xlu2 %1248, %v465_v2   ;;  %v466_v10 = vld [vmem:[%s442_s29] sm:$0x7]  ;;  %v1382_v25 = vcvt.s32.f32 %v512_v21  ;;  %s1403_s17 = scalar_lea.vmem %s1517_s3, %s1152_s30  ;;  %s457_s13 = scalar_lea.vmem %s1518_s4, %s1376_s26 }
  0x11   : > { %v483_v11 = vperm.slane %v466_v10, 0  ;;  %v489_v12 = vperm.slane %v466_v10, 1  ;;  %v496_v16 = vperm.slane %v466_v10, 2  ;;  %s464_s27 = scalar_lea.vmem %s1524_s10, %s1376_s26 }
  0x12   : > { %470 = vrot.lane.b32.xlu0 %v468_v3, %s1288_s21  ;;  %vm514_vm0 = vcmp.lt.f32.partialorder %v1382_v25, 4.0 }
  0x18   : > { %1247 = vset.pattern.permute.xlu1 %v1289_v4  ;;  %1249 = vset.pattern.permute.xlu2 %v1286_v0  ;;  %v1214_v4 = vld [vmem:[%s1403_s17 + $0x30] sm:$0xff]  }
  0x19   : > { %486 = vperm.xlu1 %1247, %v465_v2  }
  0x1a   : > { %474 = vrot.lane.b32.xlu0 %v468_v3, %s1290_s25 }
  0x6a   : > { %v494_v17 = vpop.permute.xlu2 %493 }
  0x6b   : > { %v497_v20 = vmul.f32 %v496_v16, %v494_v17  ;;  %v1210_v17 = vld [vmem:[%s1403_s17 + $0x10] sm:$0xff]  }
  0x6c   : > { %v1187_v21 = vunpack.c.l.bf16 %v1210_v17 }
  0x82   : > { %v481_v9 = vpop.permute.xlu1 %480 }
  0x83   : > { %v484_v14 = vmul.f32 %v483_v11, %v481_v9  ;;  %v1203_v9 = vunpack.c.l.bf16 %v1214_v4  ;;  %v1212_v11 = vld [vmem:[%s1403_s17 + $0x20] sm:$0xff]  }
  0x84   : > { %v471_v5 = vpop.permute.xlu0 %470 }
  0x85   : > { %v473_v6 = vadd.f32 %v471_v5, %v468_v3  ;;  %v1215_v3 = vld [vmem:[%s1403_s17 + $0x38] sm:$0xff]  }
  0x86   : > { %v1208_v5 = vunpack.c.h.bf16 %v1215_v3 }
  0x88   : > { %651 = vmatpush.msra.mxu0 %v1208_v5 }
  0x8b   : > { %v487_v13 = vpop.permute.xlu1 %486 }
  0x8c   : > { %v475_v7 = vpop.permute.xlu0 %474  ;;  %v490_v15 = vmul.f32 %v489_v12, %v487_v13  ;;  %v1196_v13 = vunpack.c.h.bf16 %v1212_v11 }
  0x8d   : > { %v477_v8 = vadd.f32 %v475_v7, %v473_v6  ;;  %v1207_v6 = vunpack.c.l.bf16 %v1215_v3  ;;  %v1204_v7 = vunpack.c.h.bf16 %v1214_v4 }
  0x8e   : > { %v491_v19 = vadd.f32 %v490_v15, %v484_v14  ;;  %v1211_v14 = vld [vmem:[%s1403_s17 + $0x18] sm:$0xff]   ;;  %v1195_v15 = vunpack.c.l.bf16 %v1212_v11  ;;  %v1175_v11 = vld [vmem:[%s1522_s8 + $0x30] sm:$0xff] }
  0x8f   : > { %501 = vperm.xlu2 %1249, %v477_v8   ;;  %v1213_v8 = vld [vmem:[%s1403_s17 + $0x28] sm:$0xff]   ;;  %652 = vmatpush.msra.mxu0 %v1207_v6  ;;  %v1192_v16 = vunpack.c.h.bf16 %v1211_v14  ;;  %v1191_v18 = vunpack.c.l.bf16 %v1211_v14  ;;  %v1161_v6 = vld [vmem:[%s1520_s6] sm:$0xff] }
  0x90   : > { %v498_v22 = vadd.f32 %v497_v20, %v491_v19  ;;  %v1200_v10 = vunpack.c.h.bf16 %v1213_v8  ;;  %v1199_v12 = vunpack.c.l.bf16 %v1213_v8  ;;  %v1188_v19 = vunpack.c.h.bf16 %v1210_v17  ;;  %v1171_v17 = vld [vmem:[%s1522_s8 + $0x10] sm:$0xff] }
  0x91   : > { %653 = vmatpush.msra.mxu0 %v1204_v7 }
  0x92   : > { %v508_v26 = vmul.f32 2.0, %v498_v22 }
  0x93   : > { %654 = vmatpush.msra.mxu0 %v1203_v9 }
  0x95   : > { %655 = vmatpush.msra.mxu0 %v1200_v10  ;;  %v671_v10 = vld [vmem:[%s457_s13] sm:$0xf] }
  0x97   : > { %656 = vmatpush.msra.mxu0 %v1199_v12  ;;  %v1174_v12 = vld [vmem:[%s1522_s8 + $0x28] sm:$0xff] }
  0x99   : > { %657 = vmatpush.msra.mxu0 %v1196_v13  ;;  %v1173_v13 = vld [vmem:[%s1522_s8 + $0x20] sm:$0xff] }
  0x9b   : > { %658 = vmatpush.msra.mxu0 %v1195_v15 }
  0x9d   : > { %659 = vmatpush.msra.mxu0 %v1192_v16  ;;  %v1172_v16 = vld [vmem:[%s1522_s8 + $0x18] sm:$0xff] }
  0x9f   : > { %660 = vmatpush.msra.mxu0 %v1191_v18 }
  0xa1   : > { %661 = vmatpush.msra.mxu0 %v1188_v19 }
  0xa3   : > { %662 = vmatpush.msra.mxu0 %v1187_v21  ;;  %v1169_v21 = vld [vmem:[%s1522_s8] sm:$0xff] }
  0xe9   : > { %v502_v24 = vpop.permute.xlu2 %501 }
  0xea   : > { %v507_v27 = vadd.f32 %v1251_v23, %v502_v24 }
  0xec   : > { %v509_v28 = vsub.f32 %v507_v27, %v508_v26 }
  0xee   : > { %v510_v29 = vmax.f32 %v509_v28, 0.0 }
  0xf0   : > { %v515_v30 = vsel %vm514_vm0, %v510_v29, 1e+30 }
  0xf1   : > { %516 = vmin.xlane.f32.xlu0 %v515_v30 }
 0x164   : > { %v517_v31 = vpop.xlane.xlu0 %516 }
 0x165   : > { %vm518_vm1 = vcmp.le.f32.partialorder %v515_v30, %v517_v31  ;;  %v525_v39 = vadd.f32 1e-08, %v517_v31 }
 0x166   : > { %v519_v32 = vsel %vm518_vm1, %v1382_v25, 1e+30 }
 0x167   : > { %520 = vmin.xlane.f32.xlu1 %v519_v32  ;;  %1254 = vrcp.f32 %v525_v39  ;;  %vm531_vm7 = vweird.f32 %v525_v39  ;;  %v537_v51 = vand.u32 2147483648, %v525_v39  ;;  %v535_v53 = vand.u32 2147483647, %v525_v39  ;;  %v1209_v32 = vld [vmem:[%s1403_s17 + $0x8] sm:$0xff]  }
 0x169   : > { %v538_v57 = vor.u32 1.1754944e-38, %v537_v51  ;;  %vm536_vm11 = vcmp.eq.f32.partialorder %v535_v53, 8.507059e+37  ;;  %v1157_v53 = vld [vmem:[%s1519_s5 + $0x20] sm:$0xff] }
 0x16d   : > { %v1255_v41 = vpop.eup %1254 }
 0x16e   : > { %v527_v43 = vmul.f32 %v1255_v41, %v525_v39  ;;  %vm532_vm5 = vweird.f32 %v1255_v41  ;;  %v1178_v39 = vld [vmem:[%s1403_s17] sm:$0xff]  }
 0x16f   : > { %vm533_vm8 = vmor %vm531_vm7, %vm532_vm5 }
 0x170   : > { %v528_v45 = vsub.f32 1.0, %v527_v43 }
 0x172   : > { %v529_v47 = vmul.f32 %v1255_v41, %v528_v45  ;;  %v1160_v45 = vld [vmem:[%s1519_s5 + $0x38] sm:$0xff] }
 0x173   : > { %814 = vmatpush.bf16.msra.mxu2 %v1160_v45 }
 0x174   : > { %v530_v49 = vadd.f32 %v1255_v41, %v529_v47  ;;  %v1159_v47 = vld [vmem:[%s1519_s5 + $0x30] sm:$0xff] }
 0x176   : > { %v534_v55 = vsel %vm533_vm8, %v1255_v41, %v530_v49  ;;  %v1180_v41 = vunpack.c.h.bf16 %v1178_v39  ;;  %v1158_v49 = vld [vmem:[%s1519_s5 + $0x28] sm:$0xff] }
 0x177   : > { %v1390_v60 = vsel %vm536_vm11, %v538_v57, %v534_v55  ;;  %815 = vmatpush.bf16.msra.mxu2 %v1159_v47  ;;  %v1164_v55 = vld [vmem:[%s1520_s6 + $0x18] sm:$0xff] }
 0x17b   : > { %816 = vmatpush.bf16.msra.mxu2 %v1158_v49 }
 0x17f   : > { %817 = vmatpush.bf16.msra.mxu2 %v1157_v53 }
 0x1da   : > { %v521_v33 = vpop.xlane.xlu1 %520 }
 0x1db   : > { %vm522_vm2 = vcmp.eq.f32.partialorder %v1382_v25, %v521_v33 }
 0x1dc   : > { %v1051_v35 = vsel %vm522_vm2, 1.0, %v1291_v34 }
 0x1dd   : > { %vm544_vm3 = vcmp.gt.f32.partialorder %v1051_v35, 0.0  ;;  %v541_v63 = vmul.f32 %v1051_v35, %v1390_v60  ;;  %v1184_v35 = vunpack.c.h.bf16 %v1209_v32 }
 0x1de   : > { %v545_v36 = vsel %vm544_vm3, 1e+30, %v515_v30 }
 0x1df   : > { %546 = vmin.xlane.f32.xlu2 %v545_v36  ;;  %663 = vmatpush.msra.mxu0 %v1184_v35 }
 0x252   : > { %v547_v37 = vpop.xlane.xlu2 %546 }
 0x253   : > { %vm548_vm4 = vcmp.le.f32.partialorder %v545_v36, %v547_v37  ;;  %v555_v40 = vadd.f32 1e-08, %v547_v37  ;;  %v1183_v37 = vunpack.c.l.bf16 %v1209_v32 }
 0x254   : > { %v549_v38 = vsel %vm548_vm4, %v1382_v25, 1e+30 }
 0x255   : > { %550 = vmin.xlane.f32.xlu2 %v549_v38  ;;  %1256 = vrcp.f32 %v555_v40  ;;  %v567_v52 = vand.u32 2147483648, %v555_v40  ;;  %vm561_vm9 = vweird.f32 %v555_v40  ;;  %v565_v54 = vand.u32 2147483647, %v555_v40  ;;  %664 = vmatpush.msra.mxu0 %v1183_v37 }
 0x257   : > { %v568_v58 = vor.u32 1.1754944e-38, %v567_v52  ;;  %vm566_vm12 = vcmp.eq.f32.partialorder %v565_v54, 8.507059e+37  ;;  %665 = vmatpush.msra.mxu0 %v1180_v41  ;;  %v1165_v52 = vld [vmem:[%s1520_s6 + $0x20] sm:$0xff] }
 0x25b   : > { %v1257_v42 = vpop.eup %1256 }
 0x25c   : > { %v557_v44 = vmul.f32 %v1257_v42, %v555_v40  ;;  %vm562_vm6 = vweird.f32 %v1257_v42 }
 0x25d   : > { %vm563_vm10 = vmor %vm561_vm9, %vm562_vm6 }
 0x25e   : > { %v558_v46 = vsub.f32 1.0, %v557_v44  ;;  %v1168_v44 = vld [vmem:[%s1520_s6 + $0x38] sm:$0xff] }
 0x25f   : > { %753 = vmatpush.bf16.msra.mxu1 %v1168_v44 }
 0x260   : > { %v559_v48 = vmul.f32 %v1257_v42, %v558_v46  ;;  %v1167_v46 = vld [vmem:[%s1520_s6 + $0x30] sm:$0xff] }
 0x262   : > { %v560_v50 = vadd.f32 %v1257_v42, %v559_v48  ;;  %v1166_v48 = vld [vmem:[%s1520_s6 + $0x28] sm:$0xff] }
 0x263   : > { %754 = vmatpush.bf16.msra.mxu1 %v1167_v46 }
 0x264   : > { %v564_v56 = vsel %vm563_vm10, %v1257_v42, %v560_v50  ;;  %v1179_v42 = vunpack.c.l.bf16 %v1178_v39 }
 0x265   : > { %v1392_v61 = vsel %vm566_vm12, %v568_v58, %v564_v56  ;;  %v1156_v56 = vld [vmem:[%s1519_s5 + $0x18] sm:$0xff]  ;;  %v1163_v58 = vld [vmem:[%s1520_s6 + $0x10] sm:$0xff] }
 0x266   : > { %v573_v40 = vadd.f32 %v1392_v61, %v1390_v60  ;;  %666 = vmatpush.msra.mxu0 %v1179_v42  ;;  %818 = vmatpush.bf16.msra.mxu2 %v1156_v56 }
 0x267   : > { %755 = vmatpush.bf16.msra.mxu1 %v1166_v48 }
 0x26b   : > { %756 = vmatpush.bf16.msra.mxu1 %v1165_v52 }
 0x26f   : > { %757 = vmatpush.bf16.msra.mxu1 %v1164_v55 }
 0x273   : > { %758 = vmatpush.bf16.msra.mxu1 %v1163_v58 }
 0x2c8   : > { %v551_v59 = vpop.xlane.xlu2 %550 }
 0x2c9   : > { %vm552_vm13 = vcmp.eq.f32.partialorder %v1382_v25, %v551_v59  ;;  %v1155_v59 = vld [vmem:[%s1519_s5 + $0x10] sm:$0xff] }
 0x2ca   : > { %v1052_v62 = vsel %vm552_vm13, 1.0, %v1291_v34  ;;  %819 = vmatpush.bf16.msra.mxu2 %v1155_v59 }
 0x2cb   : > { %v571_v0 = vmul.f32 %v1052_v62, %v1392_v61  ;;  %vm574_vm14 = vcmp.gt.f32.partialorder %v1052_v62, 0.0  ;;  %v1162_v61 = vld [vmem:[%s1520_s6 + $0x8] sm:$0xff] }
 0x2cc   : > { %v575_v1 = vsel %vm574_vm14, 1e+30, %v545_v36  ;;  %v1154_v62 = vld [vmem:[%s1519_s5 + $0x8] sm:$0xff]  ;;  %759 = vmatpush.bf16.msra.mxu1 %v1162_v61 }
 0x2cd   : > { %v1397_v2 = vadd.f32 %v571_v0, %v541_v63  ;;  %576 = vmin.xlane.f32.xlu0 %v575_v1 }
 0x2ce   : > { %820 = vmatpush.bf16.msra.mxu2 %v1154_v62 }
 0x2d0   : > { %760 = vmatpush.bf16.msra.mxu1 %v1161_v6 }
 0x2d3   : > { %761 = vmatmul.bf16.vlgmr.msra.gmra.mxu1 %v671_v10 }
 0x340   : > { %v577_v20 = vpop.xlane.xlu0 %576 }
 0x341   : > { %vm578_vm15 = vcmp.le.f32.partialorder %v575_v1, %v577_v20  ;;  %v585_v23 = vadd.f32 1e-08, %v577_v20  ;;  %v1170_v20 = vld [vmem:[%s1522_s8 + $0x8] sm:$0xff] }
 0x342   : > { %v579_v22 = vsel %vm578_vm15, %v1382_v25, 1e+30 }
 0x343   : > { %580 = vmin.xlane.f32.xlu1 %v579_v22  ;;  %1258 = vrcp.f32 %v585_v23  ;;  %v597_v30 = vand.u32 2147483648, %v585_v23  ;;  %vm591_vm1 = vweird.f32 %v585_v23  ;;  %v595_v31 = vand.u32 2147483647, %v585_v23  ;;  %v1252_v22 = vld [vmem:[%s1521_s7] ss:$0 sm:$0xff] }
 0x345   : > { %v598_v36 = vor.u32 1.1754944e-38, %v597_v30  ;;  %vm596_vm3 = vcmp.eq.f32.partialorder %v595_v31, 8.507059e+37  ;;  %v1253_v30 = vld [vmem:[%s1523_s9] ss:$0 sm:$0xff] }
 0x349   : > { %v1259_v24 = vpop.eup %1258 }
 0x34a   : > { %v587_v26 = vmul.f32 %v1259_v24, %v585_v23  ;;  %vm592_vm0 = vweird.f32 %v1259_v24 }
 0x34b   : > { %vm593_vm2 = vmor %vm591_vm1, %vm592_vm0 }
 0x34c   : > { %v588_v27 = vsub.f32 1.0, %v587_v26 }
 0x34e   : > { %v589_v28 = vmul.f32 %v1259_v24, %v588_v27 }
 0x350   : > { %v590_v29 = vadd.f32 %v1259_v24, %v589_v28  ;;  %v762_v18 = vpop.f32.mrf.mxu1 }
 0x352   : > { %v594_v33 = vsel %vm593_vm2, %v1259_v24, %v590_v29 }
 0x353   : > { %v599_v38 = vsel %vm596_vm3, %v598_v36, %v594_v33 }
 0x354   : > { %v603_v43 = vadd.f32 %v599_v38, %v573_v40 }
 0x356   : > { %1260 = vrcp.f32 %v603_v43  ;;  %v615_v0 = vand.u32 2147483648, %v603_v43  ;;  %vm609_vm6 = vweird.f32 %v603_v43  ;;  %v613_v1 = vand.u32 2147483647, %v603_v43 }
 0x358   : > { %v616_v7 = vor.u32 1.1754944e-38, %v615_v0  ;;  %vm614_vm8 = vcmp.eq.f32.partialorder %v613_v1, 8.507059e+37  ;;  %v764_v19 = vpop.f32.mrf.mxu1 }
 0x35c   : > { %v1261_v50 = vpop.eup %1260 }
 0x35d   : > { %v605_v51 = vmul.f32 %v1261_v50, %v603_v43  ;;  %vm610_vm4 = vweird.f32 %v1261_v50 }
 0x35e   : > { %vm611_vm7 = vmor %vm609_vm6, %vm610_vm4 }
 0x35f   : > { %v606_v54 = vsub.f32 1.0, %v605_v51 }
 0x361   : > { %v607_v57 = vmul.f32 %v1261_v50, %v606_v54 }
 0x363   : > { %v608_v60 = vadd.f32 %v1261_v50, %v607_v57 }
 0x365   : > { %v612_v5 = vsel %vm611_vm7, %v1261_v50, %v608_v60 }
 0x366   : > { %v617_v9 = vsel %vm614_vm8, %v616_v7, %v612_v5 }
 0x3b6   : > { %v581_v63 = vpop.xlane.xlu1 %580 }
 0x3b7   : > { %vm582_vm5 = vcmp.eq.f32.partialorder %v1382_v25, %v581_v63 }
 0x3b8   : > { %v1053_v3 = vsel %vm582_vm5, 1.0, %v1291_v34  ;;  %v1153_v34 = vld [vmem:[%s1519_s5] sm:$0xff] }
 0x3b9   : > { %v601_v4 = vmul.f32 %v1053_v3, %v599_v38  ;;  %821 = vmatpush.bf16.msra.mxu2 %v1153_v34 }
 0x3bb   : > { %v602_v8 = vadd.f32 %v601_v4, %v1397_v2  ;;  %v1176_v2 = vld [vmem:[%s1522_s8 + $0x38] sm:$0xff] }
 0x3bc   : > { %902 = vmatpush.bf16.msra.mxu3 %v1176_v2 }
 0x3bd   : > { %v618_v25 = vmul.f32 %v617_v9, %v602_v8 }
 0x3bf   : > { %667 = vmatmul.f32.vlgmr.msra.gmra.mxu0 %v618_v25 }
 0x3c0   : > { %903 = vmatpush.bf16.msra.mxu3 %v1175_v11 }
 0x3c4   : > { %904 = vmatpush.bf16.msra.mxu3 %v1174_v12 }
 0x3c8   : > { %905 = vmatpush.bf16.msra.mxu3 %v1173_v13 }
 0x3cc   : > { %906 = vmatpush.bf16.msra.mxu3 %v1172_v16 }
 0x3d0   : > { %907 = vmatpush.bf16.msra.mxu3 %v1171_v17 }
 0x3d4   : > { %908 = vmatpush.bf16.msra.mxu3 %v1170_v20 }
 0x3d8   : > { %909 = vmatpush.bf16.msra.mxu3 %v1169_v21 }
 0x43c   : > { %v668_v14 = vpop.f32.mrf.mxu0 }
 0x43d   : > { %v672_v15 = vpack.c.bf16 %v668_v14, %v668_v14 }
 0x43f   : > { %822 = vmatmul.bf16.vlgmr.msra.gmra.mxu2 %v672_v15 }
 0x4c2   : > { %v823_v23 = vpop.f32.mrf.mxu2 }
 0x4c3   : > { %v824_v24 = vadd.f32 %v823_v23, %v762_v18 }
 0x4c5   : > { %v831_v26 = vadd.f32 %v1252_v22, %v824_v24 }
 0x4c7   : > { %v832_v27 = vmax.f32 %v831_v26, 0.0 }
 0x4c9   : > { %v850_v28 = vpack.c.bf16 %v832_v27, %v832_v27 }
 0x4ca   : > { %v825_v29 = vpop.f32.mrf.mxu2 }
 0x4cb   : > { %910 = vmatmul.bf16.vlgmr.msra.gmra.mxu3 %v850_v28 }
 0x54e   : > { %v911_v31 = vpop.f32.mrf.mxu3 }
 0x54f   : > { %v912_v32 = vadd.f32 %v1253_v30, %v911_v31 }
 0x551   : > { %v915_v33 = vmax.f32 %v912_v32, 0.0 }
 0x553   : > { %v916_v35 = vpack.c.bf16 %v915_v33, %v915_v33 }
 0x555   : > { %917 = vst [vmem:[%s464_s27] sm:$0xf] %v916_v35 }
 0x556   : > { %v913_v36 = vpop.f32.mrf.mxu3 }
 0x557 PF: > { %s20_s15 = sadd.s32 1, %s1284_s15   ;;  %s1525_s13 = smov %s1280_s14 }
 0x558   : > { %p17_p5 = scmp.ge.s32.totalorder %s20_s15, 4   ;;  %s1526_s14 = smov %s1528_s16 }
 0x55a   :  { %19 = sbr.rel (!%p17_p5) target bundleno = 2 (0x2), region = 102 }

// kernel: _lambda_.12
= control target key start
LH: loop header
LB: loop body
LE: loop exit
PB: predicated region body
PF: predicated region fallthrough
CT: control target
= control target key end

     0   :  { %s1609_s13 = smov 0   ;;  %s1611_s14 = smov 0   ;;  %s1847_s0 = inlined_call_operand.vmem [shape: f32[2,32,3], index: 0, kind: input, shape index: {}]   ;;  %s1848_s1 = inlined_call_operand.vmem [shape: f32[2,3,128], index: 1, kind: input, shape index: {}]   ;;  %s1849_s2 = inlined_call_operand.vmem [shape: f32[2,1,128], index: 2, kind: input, shape index: {}]   ;;  %s1850_s3 = inlined_call_operand.vmem [shape: bf16[2,128,128], index: 3, kind: input, shape index: {}]   ;;  %s1851_s4 = inlined_call_operand.vmem [shape: bf16[2,32,128], index: 4, kind: input, shape index: {}]   ;;  %s1852_s5 = inlined_call_operand.vmem [shape: bf16[128,128], index: 5, kind: input, shape index: {}]   ;;  %s1853_s6 = inlined_call_operand.vmem [shape: bf16[128,128], index: 6, kind: input, shape index: {}]   ;;  %s1854_s7 = inlined_call_operand.vmem [shape: f32[1,128], index: 7, kind: input, shape index: {}]   ;;  %s1855_s8 = inlined_call_operand.vmem [shape: bf16[128,128], index: 8, kind: input, shape index: {}]   ;;  %s1856_s9 = inlined_call_operand.vmem [shape: f32[1,128], index: 9, kind: input, shape index: {}]   ;;  %s1857_s10 = inlined_call_operand.vmem [shape: bf16[2,32,128], index: 10, kind: output, shape index: {}]  }
   0x1   :  { %s1613_s15 = smov 0   ;;  %s1615_s16 = smov 0  }
   0x2   :  { %s1617_s17 = smov 0  }
   0x3 LB: > { %s29_s18 = sadd.s32 1, %s1538_s15  ;;  %s32_s19 = sadd.s32 1, %s1542_s16  ;;  %s1546_s17 = sphi %s1617_s17, %s20_s17   ;;  %s1542_s16 = sphi %s1615_s16, %s1861_s16   ;;  %s1538_s15 = sphi %s1613_s15, %s1860_s15   ;;  %s1534_s14 = sphi %s1611_s14, %s1859_s14   ;;  %s1530_s13 = sphi %s1609_s13, %s1858_s13  }
   0x4   : > { %p30_p0 = scmp.ge.s32.totalorder %s29_s18, 2  ;;  %p1244_p1 = scmp.ge.s32.totalorder %s1546_s17, 1 }
   0x5   : > { %p377_p2 = scmp.lt.s32.totalorder %s1546_s17, 5 }
   0x6   : > { %s1863_s18 = smov (%p30_p0, %s29_s18), 0  ;;  %s1865_s19 = smov (!%p30_p0, %s32_s19), %s1542_s16 }
   0x7   : > { %p378_p3 = pnand %p1244_p1, %p377_p2  ;;  %p34_p4 = scmp.ge.s32.totalorder %s1865_s19, 2 }
   0x8   : > { %s1245_s20 = sshll.u32 (!%p378_p3), %s1530_s13, 1  ;;  %p445_p5 = scmp.lt.s32.totalorder (!%p378_p3), %s1534_s14, 1 }
   0x9   : > { %s1867_s19 = smov (%p34_p4, %s1865_s19), 0  ;;  %381 = sbr.rel (%p378_p3) target bundleno = 1425 (0x591), region = 60 }
   0xa   : > { %p447_p6 = scmp.lt.s32.totalorder (!%p378_p3), %s1245_s20, 3  ;;  %s1549_s27 = smov (!%p378_p3), 127  }
   0xb   : > { %s1550_s28 = smov (!%p378_p3), 126  }
   0xe   : > { %v1548_v0 = vmov 2   ;;  %s1869_s14 = smov (!%p445_p5, %s1534_s14), 1  ;;  %s1871_s20 = smov (!%p447_p6, %s1245_s20), 3  ;;  %v1551_v5 = vmov 0   ;;  %v1552_v6 = vmov 1   ;;  %v570_v24 = vlaneseq }
   0xf   : > { %1483 = vset.pattern.permute.xlu0 %v1548_v0  ;;  %s1246_s21 = sshll.u32 %s1869_s14, 2  ;;  %s460_s11 = scalar_lea.vmem %s1849_s2, %s1869_s14  ;;  %1481 = vset.pattern.permute.xlu2 %v1551_v5  ;;  %v1553_v56 = vmov 0.0  }
  0x10   : > { %s1644_s22 = sadd.s32 %s1246_s21, %s1871_s20  ;;  %1485 = vset.pattern.permute.xlu1 %v1551_v5  ;;  %s457_s20 = scalar_lea.vmem %s1848_s1, %s1246_s21  ;;  %v571_v27 = vand.u32 127, %v570_v24  ;;  %v1489_v29 = vld [vmem:[%s460_s11] ss:$0 sm:$0xff] }
  0x11   : > { %s1247_s23 = sshll.u32 %s1644_s22, 3  ;;  %v488_v16 = vld [vmem:[%s457_s20] sm:$0x7]  ;;  %s1365_s21 = sshll.u32 %s1869_s14, 6 }
  0x12   : > { %s452_s26 = scalar_lea.vmem %s1847_s0, %s1247_s23  ;;  %v520_v17 = vperm.slane %v488_v16, 0  ;;  %v531_v18 = vperm.slane %v488_v16, 1  ;;  %v544_v22 = vperm.slane %v488_v16, 2  ;;  %v1664_v32 = vcvt.s32.f32 %v571_v27  ;;  %s1253_s14 = sshll.u32 %s1644_s22, 2 }
  0x13   : > { %v486_v1 = vld [vmem:[%s452_s26] sm:$0xff]  ;;  %v487_v2 = vld [vmem:[%s452_s26 + $0x8] sm:$0xff]  ;;  %s474_s12 = scalar_lea.vmem %s1851_s4, %s1253_s14  ;;  %s484_s11 = scalar_lea.vmem %s1857_s10, %s1253_s14 }
  0x14   : > { %v490_v3 = vmul.f32 %v486_v1, %v486_v1  ;;  %v491_v4 = vmul.f32 %v487_v2, %v487_v2  ;;  %512 = vperm.xlu2 %1481, %v486_v1   ;;  %vm573_vm0 = vcmp.lt.f32.partialorder %v1664_v32, 8.0 }
  0x16   : > { %494 = vrot.lane.b32.xlu0 %v490_v3, %s1549_s27  ;;  %496 = vrot.lane.b32.xlu1 %v491_v4, %s1549_s27  ;;  %s1721_s27 = scalar_lea.vmem %s1850_s3, %s1365_s21 }
  0x1c   : > { %1482 = vset.pattern.permute.xlu2 %v1552_v6 }
  0x1d   : > { %524 = vperm.xlu2 %1482, %v486_v1  }
  0x1e   : > { %502 = vrot.lane.b32.xlu0 %v490_v3, %s1550_s28  ;;  %504 = vrot.lane.b32.xlu1 %v491_v4, %s1550_s28 }
  0x25   : > { %1484 = vset.pattern.permute.xlu2 %v1551_v5 }
  0x26   : > { %537 = vperm.xlu0 %1483, %v486_v1   ;;  %517 = vperm.xlu2 %1484, %v487_v2  }
  0x2e   : > { %1488 = vset.pattern.permute.xlu0 %v1551_v5  ;;  %1487 = vset.pattern.permute.xlu2 %v1548_v0 }
  0x2f   : > { %541 = vperm.xlu2 %1487, %v487_v2  }
  0x6e   : > { %v513_v15 = vpop.permute.xlu2 %512 }
  0x6f   : > { %v521_v20 = vmul.f32 %v520_v17, %v513_v15 }
  0x77   : > { %v525_v19 = vpop.permute.xlu2 %524 }
  0x78   : > { %v532_v21 = vmul.f32 %v531_v18, %v525_v19 }
  0x7a   : > { %v534_v25 = vadd.f32 %v532_v21, %v521_v20 }
  0x80   : > { %v518_v30 = vpop.permute.xlu2 %517 }
  0x81   : > { %v522_v40 = vmul.f32 %v520_v17, %v518_v30 }
  0x88   : > { %v495_v7 = vpop.permute.xlu0 %494  ;;  %v497_v8 = vpop.permute.xlu1 %496 }
  0x89   : > { %v501_v9 = vadd.f32 %v497_v8, %v491_v4  ;;  %v500_v10 = vadd.f32 %v495_v7, %v490_v3  ;;  %v542_v38 = vpop.permute.xlu2 %541 }
  0x8a   : > { %v546_v42 = vmul.f32 %v544_v22, %v542_v38 }
  0x90   : > { %v503_v11 = vpop.permute.xlu0 %502  ;;  %v505_v12 = vpop.permute.xlu1 %504 }
  0x91   : > { %v508_v13 = vadd.f32 %v503_v11, %v500_v10  ;;  %v509_v14 = vadd.f32 %v505_v12, %v501_v9 }
  0x93   : > { %551 = vperm.xlu1 %1485, %v508_v13   ;;  %556 = vperm.xlu0 %1488, %v509_v14  }
  0x98   : > { %v538_v23 = vpop.permute.xlu0 %537 }
  0x99   : > { %v545_v26 = vmul.f32 %v544_v22, %v538_v23 }
  0x9b   : > { %1486 = vset.pattern.permute.xlu1 %v1552_v6  ;;  %v547_v28 = vadd.f32 %v545_v26, %v534_v25 }
  0x9c   : > { %528 = vperm.xlu1 %1486, %v487_v2  }
  0x9d   : > { %v564_v33 = vmul.f32 2.0, %v547_v28 }
 0x105   : > { %v552_v31 = vpop.permute.xlu1 %551  ;;  %v557_v44 = vpop.permute.xlu0 %556 }
 0x106   : > { %v562_v34 = vadd.f32 %v1489_v29, %v552_v31  ;;  %v563_v46 = vadd.f32 %v1489_v29, %v557_v44 }
 0x108   : > { %v566_v35 = vsub.f32 %v562_v34, %v564_v33 }
 0x10a   : > { %v568_v36 = vmax.f32 %v566_v35, 0.0 }
 0x10c   : > { %v574_v37 = vsel %vm573_vm0, %v568_v36, 1e+30 }
 0x10d   : > { %576 = vmin.xlane.f32.xlu1 %v574_v37 }
 0x10e   : > { %v529_v39 = vpop.permute.xlu1 %528 }
 0x10f   : > { %v533_v41 = vmul.f32 %v531_v18, %v529_v39 }
 0x111   : > { %v535_v43 = vadd.f32 %v533_v41, %v522_v40 }
 0x113   : > { %v548_v45 = vadd.f32 %v546_v42, %v535_v43 }
 0x115   : > { %v565_v47 = vmul.f32 2.0, %v548_v45 }
 0x117   : > { %v567_v48 = vsub.f32 %v563_v46, %v565_v47 }
 0x119   : > { %v569_v49 = vmax.f32 %v567_v48, 0.0 }
 0x11b   : > { %v575_v50 = vsel %vm573_vm0, %v569_v49, 1e+30 }
 0x11c   : > { %578 = vmin.xlane.f32.xlu2 %v575_v50 }
 0x180   : > { %v577_v51 = vpop.xlane.xlu1 %576 }
 0x181   : > { %vm580_vm1 = vcmp.le.f32.partialorder %v574_v37, %v577_v51  ;;  %v594_v2 = vadd.f32 1e-08, %v577_v51 }
 0x182   : > { %v582_v52 = vsel %vm580_vm1, %v1664_v32, 1e+30 }
 0x183   : > { %584 = vmin.xlane.f32.xlu0 %v582_v52  ;;  %1492 = vrcp.f32 %v594_v2  ;;  %v607_v17 = vand.u32 2147483648, %v594_v2  ;;  %vm601_vm11 = vweird.f32 %v594_v2  ;;  %v605_v19 = vand.u32 2147483647, %v594_v2 }
 0x185   : > { %v608_v25 = vor.u32 1.1754944e-38, %v607_v17  ;;  %vm606_vm15 = vcmp.eq.f32.partialorder %v605_v19, 8.507059e+37 }
 0x189   : > { %v1493_v4 = vpop.eup %1492 }
 0x18a   : > { %v597_v6 = vmul.f32 %v1493_v4, %v594_v2  ;;  %vm602_vm9 = vweird.f32 %v1493_v4 }
 0x18b   : > { %vm603_vm12 = vmor %vm601_vm11, %vm602_vm9 }
 0x18c   : > { %v598_v10 = vsub.f32 1.0, %v597_v6  ;;  %v1431_v6 = vld [vmem:[%s1721_s27 + $0x20] sm:$0xff]  }
 0x18e   : > { %v599_v12 = vmul.f32 %v1493_v4, %v598_v10  ;;  %v1409_v10 = vunpack.c.l.bf16 %v1431_v6 }
 0x18f   : > { %v579_v53 = vpop.xlane.xlu2 %578 }
 0x190   : > { %vm581_vm2 = vcmp.le.f32.partialorder %v575_v50, %v579_v53  ;;  %v595_v8 = vadd.f32 1e-08, %v579_v53  ;;  %v600_v15 = vadd.f32 %v1493_v4, %v599_v12  ;;  %v1429_v12 = vld [vmem:[%s1721_s27 + $0x10] sm:$0xff]  }
 0x191   : > { %v583_v54 = vsel %vm581_vm2, %v1664_v32, 1e+30 }
 0x192   : > { %586 = vmin.xlane.f32.xlu2 %v583_v54  ;;  %v604_v23 = vsel %vm603_vm12, %v1493_v4, %v600_v15  ;;  %v622_v43 = vand.u32 2147483648, %v595_v8  ;;  %v620_v45 = vand.u32 2147483647, %v595_v8 }
 0x193   : > { %v1693_v29 = vsel %vm606_vm15, %v608_v25, %v604_v23 }
 0x194   : > { %v623_v49 = vor.u32 1.1754944e-38, %v622_v43  ;;  %vm621_vm9 = vcmp.eq.f32.partialorder %v620_v45, 8.507059e+37 }
 0x1f6   : > { %v585_v55 = vpop.xlane.xlu0 %584 }
 0x1f7   : > { %vm588_vm3 = vcmp.eq.f32.partialorder %v1664_v32, %v585_v55 }
 0x1f8   : > { %v1675_v57 = vsel %vm588_vm3, 1.0, %v1553_v56 }
 0x1f9   : > { %vm632_vm4 = vcmp.gt.f32.partialorder %v1675_v57, 0.0  ;;  %v626_v35 = vmul.f32 %v1675_v57, %v1693_v29 }
 0x1fa   : > { %v1678_v58 = vsel %vm632_vm4, 1e+30, %v574_v37 }
 0x1fb   : > { %636 = vmin.xlane.f32.xlu1 %v1678_v58 }
 0x205   : > { %v587_v59 = vpop.xlane.xlu2 %586 }
 0x206   : > { %vm589_vm5 = vcmp.eq.f32.partialorder %v1664_v32, %v587_v59 }
 0x207   : > { %v1683_v60 = vsel %vm589_vm5, 1.0, %v1553_v56  ;;  %vm616_vm5 = vweird.f32 %v595_v8 }
 0x208   : > { %vm633_vm6 = vcmp.gt.f32.partialorder %v1683_v60, 0.0 }
 0x209   : > { %v1686_v61 = vsel %vm633_vm6, 1e+30, %v575_v50 }
 0x20a   : > { %638 = vmin.xlane.f32.xlu2 %v1686_v61 }
 0x26e   : > { %v637_v62 = vpop.xlane.xlu1 %636 }
 0x26f   : > { %vm640_vm7 = vcmp.le.f32.partialorder %v1678_v58, %v637_v62  ;;  %v654_v3 = vadd.f32 1e-08, %v637_v62  ;;  %v1434_v62 = vld [vmem:[%s1721_s27 + $0x38] sm:$0xff]  }
 0x270   : > { %v642_v63 = vsel %vm640_vm7, %v1664_v32, 1e+30 }
 0x271   : > { %644 = vmin.xlane.f32.xlu1 %v642_v63  ;;  %1494 = vrcp.f32 %v654_v3  ;;  %v667_v20 = vand.u32 2147483648, %v654_v3  ;;  %vm661_vm13 = vweird.f32 %v654_v3  ;;  %v665_v21 = vand.u32 2147483647, %v654_v3 }
 0x272   : > { %1496 = vrcp.f32 %v595_v8  ;;  %v1422_v63 = vunpack.c.h.bf16 %v1434_v62 }
 0x273   : > { %v668_v27 = vor.u32 1.1754944e-38, %v667_v20  ;;  %vm666_vm0 = vcmp.eq.f32.partialorder %v665_v21, 8.507059e+37 }
 0x274   : > { %814 = vmatpush.msra.mxu0 %v1422_v63  ;;  %v1380_v63 = vld [vmem:[%s1853_s6 + $0x28] sm:$0xff] }
 0x277   : > { %v1495_v5 = vpop.eup %1494 }
 0x278   : > { %v657_v7 = vmul.f32 %v1495_v5, %v654_v3  ;;  %v1497_v14 = vpop.eup %1496  ;;  %vm662_vm10 = vweird.f32 %v1495_v5 }
 0x279   : > { %v612_v22 = vmul.f32 %v1497_v14, %v595_v8  ;;  %vm663_vm14 = vmor %vm661_vm13, %vm662_vm10  ;;  %vm617_vm3 = vweird.f32 %v1497_v14  ;;  %v1410_v8 = vunpack.c.h.bf16 %v1431_v6 }
 0x27a   : > { %v658_v11 = vsub.f32 1.0, %v657_v7  ;;  %vm618_vm6 = vmor %vm616_vm5, %vm617_vm3 }
 0x27b   : > { %v613_v30 = vsub.f32 1.0, %v612_v22 }
 0x27c   : > { %v659_v13 = vmul.f32 %v1495_v5, %v658_v11 }
 0x27d   : > { %v639_v0 = vpop.xlane.xlu2 %638  ;;  %v614_v39 = vmul.f32 %v1497_v14, %v613_v30 }
 0x27e   : > { %vm641_vm8 = vcmp.le.f32.partialorder %v1686_v61, %v639_v0  ;;  %v655_v9 = vadd.f32 1e-08, %v639_v0  ;;  %v660_v18 = vadd.f32 %v1495_v5, %v659_v13  ;;  %v1421_v0 = vunpack.c.l.bf16 %v1434_v62  ;;  %v1374_v62 = vld [vmem:[%s1852_s5 + $0x38] sm:$0xff] }
 0x27f   : > { %v643_v1 = vsel %vm641_vm8, %v1664_v32, 1e+30  ;;  %v615_v41 = vadd.f32 %v1497_v14, %v614_v39  ;;  %988 = vmatpush.bf16.msra.mxu2 %v1374_v62 }
 0x280   : > { %646 = vmin.xlane.f32.xlu2 %v643_v1  ;;  %1498 = vrcp.f32 %v655_v9  ;;  %v664_v26 = vsel %vm663_vm14, %v1495_v5, %v660_v18  ;;  %v682_v44 = vand.u32 2147483648, %v655_v9  ;;  %vm676_vm7 = vweird.f32 %v655_v9  ;;  %v1432_v1 = vld [vmem:[%s1721_s27 + $0x28] sm:$0xff]   ;;  %815 = vmatpush.msra.mxu0 %v1421_v0 }
 0x281   : > { %v1696_v31 = vsel %vm666_vm0, %v668_v27, %v664_v26  ;;  %v680_v46 = vand.u32 2147483647, %v655_v9  ;;  %v619_v47 = vsel %vm618_vm6, %v1497_v14, %v615_v41  ;;  %v1414_v5 = vunpack.c.h.bf16 %v1432_v1  ;;  %v1372_v0 = vld [vmem:[%s1852_s5 + $0x28] sm:$0xff] }
 0x282   : > { %v683_v50 = vor.u32 1.1754944e-38, %v682_v44  ;;  %v1706_v52 = vsel %vm621_vm9, %v623_v49, %v619_v47  ;;  %v1413_v7 = vunpack.c.l.bf16 %v1432_v1  ;;  %v1402_v14 = vunpack.c.h.bf16 %v1429_v12 }
 0x283   : > { %vm681_vm10 = vcmp.eq.f32.partialorder %v680_v46, 8.507059e+37  ;;  %v627_v55 = vmul.f32 %v1683_v60, %v1706_v52  ;;  %v1433_v60 = vld [vmem:[%s1721_s27 + $0x30] sm:$0xff]   ;;  %v690_v41 = vadd.f32 %v1696_v31, %v1693_v29 }
 0x284   : > { %v1417_v3 = vunpack.c.l.bf16 %v1433_v60 }
 0x286   : > { %v1499_v16 = vpop.eup %1498 }
 0x287   : > { %v672_v24 = vmul.f32 %v1499_v16, %v655_v9  ;;  %vm677_vm4 = vweird.f32 %v1499_v16  ;;  %v1430_v9 = vld [vmem:[%s1721_s27 + $0x18] sm:$0xff]  }
 0x288   : > { %vm678_vm8 = vmor %vm676_vm7, %vm677_vm4  ;;  %v1406_v11 = vunpack.c.h.bf16 %v1430_v9  ;;  %v1405_v13 = vunpack.c.l.bf16 %v1430_v9 }
 0x289   : > { %v673_v34 = vsub.f32 1.0, %v672_v24 }
 0x28b   : > { %v674_v40 = vmul.f32 %v1499_v16, %v673_v34 }
 0x28d   : > { %v675_v42 = vadd.f32 %v1499_v16, %v674_v40  ;;  %v1392_v40 = vld [vmem:[%s1721_s27] sm:$0xff]  }
 0x28e   : > { %v1393_v43 = vunpack.c.l.bf16 %v1392_v40 }
 0x28f   : > { %v679_v48 = vsel %vm678_vm8, %v1499_v16, %v675_v42  ;;  %v1401_v16 = vunpack.c.l.bf16 %v1429_v12  ;;  %v1394_v42 = vunpack.c.h.bf16 %v1392_v40 }
 0x290   : > { %v1708_v53 = vsel %vm681_vm10, %v683_v50, %v679_v48 }
 0x291   : > { %v691_v29 = vadd.f32 %v1708_v53, %v1706_v52  ;;  %v1373_v52 = vld [vmem:[%s1852_s5 + $0x30] sm:$0xff] }
 0x292   : > { %989 = vmatpush.bf16.msra.mxu2 %v1373_v52 }
 0x296   : > { %990 = vmatpush.bf16.msra.mxu2 %v1372_v0 }
 0x2e4   : > { %v645_v28 = vpop.xlane.xlu1 %644 }
 0x2e5   : > { %vm648_vm1 = vcmp.eq.f32.partialorder %v1664_v32, %v645_v28 }
 0x2e6   : > { %v1259_v33 = vsel %vm648_vm1, 1.0, %v1553_v56 }
 0x2e7   : > { %v686_v36 = vmul.f32 %v1259_v33, %v1696_v31  ;;  %vm692_vm2 = vcmp.gt.f32.partialorder %v1259_v33, 0.0  ;;  %v1428_v33 = vld [vmem:[%s1721_s27 + $0x8] sm:$0xff]  }
 0x2e8   : > { %v694_v37 = vsel %vm692_vm2, 1e+30, %v1678_v58  ;;  %v1397_v39 = vunpack.c.l.bf16 %v1428_v33 }
 0x2e9   : > { %v1703_v38 = vadd.f32 %v686_v36, %v626_v35  ;;  %696 = vmin.xlane.f32.xlu0 %v694_v37  ;;  %v1398_v35 = vunpack.c.h.bf16 %v1428_v33  ;;  %v1375_v33 = vld [vmem:[%s1853_s6] sm:$0xff] }
 0x2f3   : > { %v647_v51 = vpop.xlane.xlu2 %646 }
 0x2f4   : > { %vm649_vm11 = vcmp.eq.f32.partialorder %v1664_v32, %v647_v51 }
 0x2f5   : > { %v1260_v54 = vsel %vm649_vm11, 1.0, %v1553_v56 }
 0x2f6   : > { %v687_v57 = vmul.f32 %v1260_v54, %v1708_v53  ;;  %vm693_vm12 = vcmp.gt.f32.partialorder %v1260_v54, 0.0 }
 0x2f7   : > { %v695_v58 = vsel %vm693_vm12, 1e+30, %v1686_v61  ;;  %v1418_v61 = vunpack.c.h.bf16 %v1433_v60  ;;  %v1381_v60 = vld [vmem:[%s1853_s6 + $0x30] sm:$0xff] }
 0x2f8   : > { %v1715_v59 = vadd.f32 %v687_v57, %v627_v55  ;;  %698 = vmin.xlane.f32.xlu1 %v695_v58 }
 0x2f9   : > { %816 = vmatpush.msra.mxu0 %v1418_v61 }
 0x2fb   : > { %817 = vmatpush.msra.mxu0 %v1417_v3 }
 0x2fd   : > { %818 = vmatpush.msra.mxu0 %v1414_v5 }
 0x2ff   : > { %819 = vmatpush.msra.mxu0 %v1413_v7  ;;  %v1379_v7 = vld [vmem:[%s1853_s6 + $0x20] sm:$0xff] }
 0x301   : > { %820 = vmatpush.msra.mxu0 %v1410_v8  ;;  %v1371_v8 = vld [vmem:[%s1852_s5 + $0x20] sm:$0xff] }
 0x302   : > { %991 = vmatpush.bf16.msra.mxu2 %v1371_v8 }
 0x303   : > { %821 = vmatpush.msra.mxu0 %v1409_v10 }
 0x305   : > { %822 = vmatpush.msra.mxu0 %v1406_v11 }
 0x307   : > { %823 = vmatpush.msra.mxu0 %v1405_v13 }
 0x309   : > { %824 = vmatpush.msra.mxu0 %v1402_v14 }
 0x30b   : > { %825 = vmatpush.msra.mxu0 %v1401_v16 }
 0x30d   : > { %826 = vmatpush.msra.mxu0 %v1398_v35  ;;  %v1366_v35 = vld [vmem:[%s474_s12] sm:$0xff] }
 0x30f   : > { %827 = vmatpush.msra.mxu0 %v1397_v39 }
 0x311   : > { %828 = vmatpush.msra.mxu0 %v1394_v42  ;;  %v1388_v42 = vld [vmem:[%s1855_s8 + $0x28] sm:$0xff] }
 0x313   : > { %829 = vmatpush.msra.mxu0 %v1393_v43  ;;  %v1387_v43 = vld [vmem:[%s1855_s8 + $0x20] sm:$0xff] }
 0x35c   : > { %v697_v2 = vpop.xlane.xlu0 %696 }
 0x35d   : > { %vm700_vm13 = vcmp.le.f32.partialorder %v694_v37, %v697_v2  ;;  %v714_v18 = vadd.f32 1e-08, %v697_v2 }
 0x35e   : > { %v702_v4 = vsel %vm700_vm13, %v1664_v32, 1e+30 }
 0x35f   : > { %704 = vmin.xlane.f32.xlu2 %v702_v4  ;;  %1500 = vrcp.f32 %v714_v18  ;;  %v727_v26 = vand.u32 2147483648, %v714_v18  ;;  %vm721_vm0 = vweird.f32 %v714_v18  ;;  %v725_v27 = vand.u32 2147483647, %v714_v18 }
 0x361   : > { %v728_v34 = vor.u32 1.1754944e-38, %v727_v26  ;;  %vm726_vm2 = vcmp.eq.f32.partialorder %v725_v27, 8.507059e+37  ;;  %v1377_v27 = vld [vmem:[%s1853_s6 + $0x10] sm:$0xff] }
 0x365   : > { %v1501_v19 = vpop.eup %1500 }
 0x366   : > { %v717_v20 = vmul.f32 %v1501_v19, %v714_v18  ;;  %vm722_vm15 = vweird.f32 %v1501_v19 }
 0x367   : > { %vm723_vm1 = vmor %vm721_vm0, %vm722_vm15 }
 0x368   : > { %v718_v22 = vsub.f32 1.0, %v717_v20 }
 0x36a   : > { %v719_v23 = vmul.f32 %v1501_v19, %v718_v22 }
 0x36b   : > { %v699_v15 = vpop.xlane.xlu1 %698 }
 0x36c   : > { %vm701_vm14 = vcmp.le.f32.partialorder %v695_v58, %v699_v15  ;;  %v715_v21 = vadd.f32 1e-08, %v699_v15  ;;  %v720_v25 = vadd.f32 %v1501_v19, %v719_v23  ;;  %v1382_v58 = vld [vmem:[%s1853_s6 + $0x38] sm:$0xff] }
 0x36d   : > { %v703_v17 = vsel %vm701_vm14, %v1664_v32, 1e+30  ;;  %926 = vmatpush.bf16.msra.mxu1 %v1382_v58 }
 0x36e   : > { %706 = vmin.xlane.f32.xlu0 %v703_v17  ;;  %1502 = vrcp.f32 %v715_v21  ;;  %v724_v30 = vsel %vm723_vm1, %v1501_v19, %v720_v25  ;;  %v742_v47 = vand.u32 2147483648, %v715_v21  ;;  %vm736_vm4 = vweird.f32 %v715_v21 }
 0x36f   : > { %v729_v37 = vsel %vm726_vm2, %v728_v34, %v724_v30  ;;  %v740_v48 = vand.u32 2147483647, %v715_v21  ;;  %v1368_v30 = vld [vmem:[%s1852_s5 + $0x8] sm:$0xff]  ;;  %v1367_v34 = vld [vmem:[%s1852_s5] sm:$0xff] }
 0x370   : > { %v750_v44 = vadd.f32 %v729_v37, %v690_v41  ;;  %v743_v51 = vor.u32 1.1754944e-38, %v742_v47  ;;  %v1383_v47 = vld [vmem:[%s1855_s8] sm:$0xff] }
 0x371   : > { %vm741_vm6 = vcmp.eq.f32.partialorder %v740_v48, 8.507059e+37  ;;  %927 = vmatpush.bf16.msra.mxu1 %v1381_v60 }
 0x372   : > { %1504 = vrcp.f32 %v750_v44  ;;  %v763_v3 = vand.u32 2147483648, %v750_v44  ;;  %vm757_vm9 = vweird.f32 %v750_v44  ;;  %v761_v4 = vand.u32 2147483647, %v750_v44 }
 0x374   : > { %v1503_v24 = vpop.eup %1502  ;;  %v764_v11 = vor.u32 1.1754944e-38, %v763_v3  ;;  %vm762_vm11 = vcmp.eq.f32.partialorder %v761_v4, 8.507059e+37 }
 0x375   : > { %v732_v28 = vmul.f32 %v1503_v24, %v715_v21  ;;  %vm737_vm3 = vweird.f32 %v1503_v24  ;;  %928 = vmatpush.bf16.msra.mxu1 %v1380_v63 }
 0x376   : > { %vm738_vm5 = vmor %vm736_vm4, %vm737_vm3 }
 0x377   : > { %v733_v36 = vsub.f32 1.0, %v732_v28  ;;  %v1376_v28 = vld [vmem:[%s1853_s6 + $0x8] sm:$0xff] }
 0x378   : > { %v1505_v50 = vpop.eup %1504 }
 0x379   : > { %v734_v45 = vmul.f32 %v1503_v24, %v733_v36  ;;  %v753_v31 = vmul.f32 %v1505_v50, %v750_v44  ;;  %vm758_vm7 = vweird.f32 %v1505_v50  ;;  %929 = vmatpush.bf16.msra.mxu1 %v1379_v7  ;;  %v1390_v36 = vld [vmem:[%s1855_s8 + $0x38] sm:$0xff] }
 0x37a   : > { %vm759_vm10 = vmor %vm757_vm9, %vm758_vm7  ;;  %1079 = vmatpush.bf16.msra.mxu3 %v1390_v36  ;;  %v1386_v44 = vld [vmem:[%s1855_s8 + $0x18] sm:$0xff] }
 0x37b   : > { %v735_v46 = vadd.f32 %v1503_v24, %v734_v45  ;;  %v754_v57 = vsub.f32 1.0, %v753_v31  ;;  %v1385_v45 = vld [vmem:[%s1855_s8 + $0x10] sm:$0xff] }
 0x37d   : > { %v739_v49 = vsel %vm738_vm5, %v1503_v24, %v735_v46  ;;  %v755_v53 = vmul.f32 %v1505_v50, %v754_v57  ;;  %v1384_v46 = vld [vmem:[%s1855_s8 + $0x8] sm:$0xff] }
 0x37e   : > { %v744_v54 = vsel %vm741_vm6, %v743_v51, %v739_v49  ;;  %v1490_v51 = vld [vmem:[%s1854_s7] ss:$0 sm:$0xff] }
 0x37f   : > { %v751_v55 = vadd.f32 %v744_v54, %v691_v29  ;;  %v756_v1 = vadd.f32 %v1505_v50, %v755_v53  ;;  %v1491_v53 = vld [vmem:[%s1856_s9] ss:$0 sm:$0xff] }
 0x381   : > { %1506 = vrcp.f32 %v751_v55  ;;  %v760_v10 = vsel %vm759_vm10, %v1505_v50, %v756_v1  ;;  %v778_v19 = vand.u32 2147483648, %v751_v55  ;;  %vm772_vm14 = vweird.f32 %v751_v55 }
 0x382   : > { %v765_v13 = vsel %vm762_vm11, %v764_v11, %v760_v10  ;;  %v776_v20 = vand.u32 2147483647, %v751_v55 }
 0x383   : > { %v779_v23 = vor.u32 1.1754944e-38, %v778_v19 }
 0x384   : > { %vm777_vm0 = vcmp.eq.f32.partialorder %v776_v20, 8.507059e+37 }
 0x387   : > { %v1507_v61 = vpop.eup %1506 }
 0x388   : > { %v768_v6 = vmul.f32 %v1507_v61, %v751_v55  ;;  %vm773_vm12 = vweird.f32 %v1507_v61 }
 0x389   : > { %vm774_vm15 = vmor %vm772_vm14, %vm773_vm12 }
 0x38a   : > { %v769_v14 = vsub.f32 1.0, %v768_v6 }
 0x38c   : > { %v770_v16 = vmul.f32 %v1507_v61, %v769_v14 }
 0x38e   : > { %v771_v17 = vadd.f32 %v1507_v61, %v770_v16 }
 0x390   : > { %v775_v22 = vsel %vm774_vm15, %v1507_v61, %v771_v17 }
 0x391   : > { %v780_v25 = vsel %vm777_vm0, %v779_v23, %v775_v22 }
 0x3d2   : > { %v705_v2 = vpop.xlane.xlu2 %704 }
 0x3d3   : > { %vm708_vm8 = vcmp.eq.f32.partialorder %v1664_v32, %v705_v2 }
 0x3d4   : > { %v1261_v5 = vsel %vm708_vm8, 1.0, %v1553_v56 }
 0x3d5   : > { %v746_v9 = vmul.f32 %v1261_v5, %v729_v37  ;;  %v1389_v37 = vld [vmem:[%s1855_s8 + $0x30] sm:$0xff] }
 0x3d6   : > { %1080 = vmatpush.bf16.msra.mxu3 %v1389_v37 }
 0x3d7   : > { %v748_v12 = vadd.f32 %v746_v9, %v1703_v38 }
 0x3d9   : > { %v766_v15 = vmul.f32 %v765_v13, %v748_v12 }
 0x3da   : > { %1081 = vmatpush.bf16.msra.mxu3 %v1388_v42 }
 0x3db   : > { %830 = vmatmul.f32.vlgmr.msra.gmra.mxu0 %v766_v15 }
 0x3de   : > { %1082 = vmatpush.bf16.msra.mxu3 %v1387_v43 }
 0x3e1   : > { %v707_v18 = vpop.xlane.xlu0 %706 }
 0x3e2   : > { %vm709_vm13 = vcmp.eq.f32.partialorder %v1664_v32, %v707_v18  ;;  %v1378_v32 = vld [vmem:[%s1853_s6 + $0x18] sm:$0xff]  ;;  %1083 = vmatpush.bf16.msra.mxu3 %v1386_v44 }
 0x3e3   : > { %v1262_v21 = vsel %vm709_vm13, 1.0, %v1553_v56  ;;  %v1370_v56 = vld [vmem:[%s1852_s5 + $0x18] sm:$0xff]  ;;  %930 = vmatpush.bf16.msra.mxu1 %v1378_v32 }
 0x3e4   : > { %v747_v38 = vmul.f32 %v1262_v21, %v744_v54  ;;  %992 = vmatpush.bf16.msra.mxu2 %v1370_v56 }
 0x3e6   : > { %v749_v24 = vadd.f32 %v747_v38, %v1715_v59  ;;  %v1369_v59 = vld [vmem:[%s1852_s5 + $0x10] sm:$0xff]  ;;  %1084 = vmatpush.bf16.msra.mxu3 %v1385_v45 }
 0x3e7   : > { %931 = vmatpush.bf16.msra.mxu1 %v1377_v27 }
 0x3e8   : > { %v781_v26 = vmul.f32 %v780_v25, %v749_v24  ;;  %993 = vmatpush.bf16.msra.mxu2 %v1369_v59 }
 0x3ea   : > { %833 = vmatmul.f32.gmra.mxu0 %v781_v26  ;;  %1085 = vmatpush.bf16.msra.mxu3 %v1384_v46 }
 0x3eb   : > { %932 = vmatpush.bf16.msra.mxu1 %v1376_v28 }
 0x3ec   : > { %994 = vmatpush.bf16.msra.mxu2 %v1368_v30 }
 0x3ee   : > { %1086 = vmatpush.bf16.msra.mxu3 %v1383_v47 }
 0x3ef   : > { %933 = vmatpush.bf16.msra.mxu1 %v1375_v33 }
 0x3f0   : > { %995 = vmatpush.bf16.msra.mxu2 %v1367_v34 }
 0x3f2   : > { %934 = vmatmul.bf16.vlgmr.msra.gmra.mxu1 %v1366_v35 }
 0x458   : > { %v831_v39 = vpop.f32.mrf.mxu0 }
 0x467   : > { %v834_v40 = vpop.f32.mrf.mxu0 }
 0x468   : > { %v839_v41 = vpack.c.bf16 %v834_v40, %v831_v39 }
 0x46a   : > { %996 = vmatmul.bf16.vlgmr.msra.gmra.mxu2 %v839_v41 }
 0x46f   : > { %v935_v48 = vpop.f32.mrf.mxu1 }
 0x477   : > { %v937_v54 = vpop.f32.mrf.mxu1 }
 0x4ed   : > { %v997_v49 = vpop.f32.mrf.mxu2 }
 0x4ee   : > { %v998_v50 = vadd.f32 %v997_v49, %v935_v48 }
 0x4f0   : > { %v1006_v31 = vadd.f32 %v1490_v51, %v998_v50 }
 0x4f2   : > { %v1008_v58 = vmax.f32 %v1006_v31, 0.0 }
 0x4f5   : > { %v999_v29 = vpop.f32.mrf.mxu2 }
 0x4f6   : > { %v1000_v55 = vadd.f32 %v999_v29, %v937_v54 }
 0x4f8   : > { %v1007_v57 = vadd.f32 %v1490_v51, %v1000_v55 }
 0x4fa   : > { %v1009_v62 = vmax.f32 %v1007_v57, 0.0 }
 0x4fc   : > { %v1027_v60 = vpack.c.bf16 %v1009_v62, %v1008_v58 }
 0x4fe   : > { %1087 = vmatmul.bf16.vlgmr.msra.gmra.mxu3 %v1027_v60 }
 0x581   : > { %v1088_v52 = vpop.f32.mrf.mxu3 }
 0x582   : > { %v1089_v63 = vadd.f32 %v1491_v53, %v1088_v52 }
 0x584   : > { %v1093_v1 = vmax.f32 %v1089_v63, 0.0 }
 0x589   : > { %v1090_v0 = vpop.f32.mrf.mxu3 }
 0x58a   : > { %v1091_v61 = vadd.f32 %v1491_v53, %v1090_v0 }
 0x58c   : > { %v1094_v2 = vmax.f32 %v1091_v61, 0.0 }
 0x58e   : > { %v1426_v3 = vpack.c.bf16 %v1094_v2, %v1093_v1 }
 0x590   : > { %1427 = vst [vmem:[%s484_s11] sm:$0xff] %v1426_v3  }
 0x591 PF: > { %s20_s17 = sadd.s32 1, %s1546_s17   ;;  %s1858_s13 = smov %s1538_s15 }
 0x592   : > { %p17_p7 = scmp.ge.s32.totalorder %s20_s17, 6   ;;  %s1859_s14 = smov %s1542_s16 }
 0x593   : > { %s1860_s15 = smov %s1863_s18  ;;  %s1861_s16 = smov %s1867_s19 }
 0x594   :  { %19 = sbr.rel (!%p17_p7) target bundleno = 3 (0x3), region = 102 }

// kernel: _lambda_.13
= control target key start
LH: loop header
LB: loop body
LE: loop exit
PB: predicated region body
PF: predicated region fallthrough
CT: control target
= control target key end

     0   :  { %s649_s18 = smov 0   ;;  %s724_s0 = inlined_call_operand.vmem [shape: bf16[64,128], index: 0, kind: input, shape index: {}]   ;;  %s725_s1 = inlined_call_operand.vmem [shape: bf16[128,128], index: 1, kind: input, shape index: {}]   ;;  %s726_s2 = inlined_call_operand.vmem [shape: f32[1,128], index: 2, kind: input, shape index: {}]   ;;  %s727_s3 = inlined_call_operand.vmem [shape: bf16[128,128], index: 3, kind: input, shape index: {}]   ;;  %s728_s4 = inlined_call_operand.vmem [shape: f32[1,128], index: 4, kind: input, shape index: {}]   ;;  %s729_s5 = inlined_call_operand.vmem [shape: f32[64,128], index: 5, kind: output, shape index: {}]  }
   0x1 LB: > { %s484_s19 = sadd.s32 4294967295, %s617_s18   ;;  %p488_p0 = scmp.ge.s32.totalorder %s617_s18, 1  ;;  %s617_s18 = sphi %s649_s18, %s15_s18  }
   0x2   : > { %p188_p1 = scmp.lt.s32.totalorder %s617_s18, 3 }
   0x4   : > { %p189_p2 = pnand %p488_p0, %p188_p1 }
   0x5   : > { %s489_s9 = sshll.u32 (!%p189_p2), %s484_s19, 2 }
   0x6   : > { %192 = sbr.rel (%p189_p2) target bundleno = 332 (0x14c), region = 40  ;;  %p217_p3 = scmp.lt.s32.totalorder (!%p189_p2), %s489_s9, 7 }
   0xb   : > { %v576_v0 = vld [vmem:[%s725_s1 + $0x38] sm:$0xff]  ;;  %v575_v1 = vld [vmem:[%s725_s1 + $0x30] sm:$0xff]  ;;  %v574_v4 = vld [vmem:[%s725_s1 + $0x28] sm:$0xff]  ;;  %s731_s9 = smov (!%p217_p3, %s489_s9), 7 }
   0xc   : > { %312 = vmatpush.bf16.msra.mxu0 %v576_v0  ;;  %585 = vmatpush.bf16.msra.mxu2 %v576_v0  ;;  %v584_v2 = vld [vmem:[%s727_s3 + $0x38] sm:$0xff]  ;;  %v583_v3 = vld [vmem:[%s727_s3 + $0x30] sm:$0xff]  ;;  %v582_v5 = vld [vmem:[%s727_s3 + $0x28] sm:$0xff]  ;;  %s490_s19 = sshll.u32 %s731_s9, 2  ;;  %s492_s11 = sshll.u32 %s731_s9, 3 }
   0xd   : > { %405 = vmatpush.bf16.msra.mxu1 %v584_v2  ;;  %593 = vmatpush.bf16.msra.mxu3 %v584_v2  ;;  %v573_v6 = vld [vmem:[%s725_s1 + $0x20] sm:$0xff]  ;;  %v572_v8 = vld [vmem:[%s725_s1 + $0x18] sm:$0xff]  ;;  %v571_v9 = vld [vmem:[%s725_s1 + $0x10] sm:$0xff]  ;;  %s220_s24 = scalar_lea.vmem %s724_s0, %s490_s19  ;;  %s226_s16 = scalar_lea.vmem %s729_s5, %s492_s11 }
   0xe   : > { %v581_v7 = vld [vmem:[%s727_s3 + $0x20] sm:$0xff]  ;;  %v570_v10 = vld [vmem:[%s725_s1 + $0x8] sm:$0xff]  ;;  %v580_v14 = vld [vmem:[%s727_s3 + $0x18] sm:$0xff] }
   0xf   : > { %v569_v11 = vld [vmem:[%s725_s1] sm:$0xff]  ;;  %v568_v13 = vld [vmem:[%s220_s24 + $0x8] sm:$0xff]  ;;  %v579_v15 = vld [vmem:[%s727_s3 + $0x10] sm:$0xff] }
  0x10   : > { %313 = vmatpush.bf16.msra.mxu0 %v575_v1  ;;  %586 = vmatpush.bf16.msra.mxu2 %v575_v1  ;;  %v567_v12 = vld [vmem:[%s220_s24] sm:$0xff]  ;;  %v578_v16 = vld [vmem:[%s727_s3 + $0x8] sm:$0xff] }
  0x11   : > { %406 = vmatpush.bf16.msra.mxu1 %v583_v3  ;;  %594 = vmatpush.bf16.msra.mxu3 %v583_v3  ;;  %v577_v17 = vld [vmem:[%s727_s3] sm:$0xff] }
  0x12   : > { %v609_v19 = vld [vmem:[%s726_s2] ss:$0 sm:$0xff] }
  0x13   : > { %v610_v33 = vld [vmem:[%s728_s4] ss:$0 sm:$0xff] }
  0x14   : > { %314 = vmatpush.bf16.msra.mxu0 %v574_v4  ;;  %587 = vmatpush.bf16.msra.mxu2 %v574_v4 }
  0x15   : > { %407 = vmatpush.bf16.msra.mxu1 %v582_v5  ;;  %595 = vmatpush.bf16.msra.mxu3 %v582_v5 }
  0x18   : > { %315 = vmatpush.bf16.msra.mxu0 %v573_v6  ;;  %588 = vmatpush.bf16.msra.mxu2 %v573_v6 }
  0x19   : > { %408 = vmatpush.bf16.msra.mxu1 %v581_v7  ;;  %596 = vmatpush.bf16.msra.mxu3 %v581_v7 }
  0x1c   : > { %316 = vmatpush.bf16.msra.mxu0 %v572_v8  ;;  %589 = vmatpush.bf16.msra.mxu2 %v572_v8 }
  0x1d   : > { %409 = vmatpush.bf16.msra.mxu1 %v580_v14  ;;  %597 = vmatpush.bf16.msra.mxu3 %v580_v14 }
  0x20   : > { %317 = vmatpush.bf16.msra.mxu0 %v571_v9  ;;  %590 = vmatpush.bf16.msra.mxu2 %v571_v9 }
  0x21   : > { %410 = vmatpush.bf16.msra.mxu1 %v579_v15  ;;  %598 = vmatpush.bf16.msra.mxu3 %v579_v15 }
  0x24   : > { %318 = vmatpush.bf16.msra.mxu0 %v570_v10  ;;  %591 = vmatpush.bf16.msra.mxu2 %v570_v10 }
  0x25   : > { %411 = vmatpush.bf16.msra.mxu1 %v578_v16  ;;  %599 = vmatpush.bf16.msra.mxu3 %v578_v16 }
  0x28   : > { %319 = vmatpush.bf16.msra.mxu0 %v569_v11  ;;  %592 = vmatpush.bf16.msra.mxu2 %v569_v11 }
  0x29   : > { %412 = vmatpush.bf16.msra.mxu1 %v577_v17  ;;  %600 = vmatpush.bf16.msra.mxu3 %v577_v17 }
  0x2b   : > { %320 = vmatmul.bf16.vlgmr.msra.gmra.mxu0 %v567_v12  ;;  %325 = vmatmul.bf16.vlgmr.msra.gmra.mxu2 %v568_v13 }
  0xa8   : > { %v321_v18 = vpop.f32.mrf.mxu0 }
  0xa9   : > { %v322_v20 = vadd.f32 %v609_v19, %v321_v18 }
  0xab   : > { %v331_v23 = vmax.f32 %v322_v20, 0.0 }
  0xae   : > { %v326_v21 = vpop.f32.mrf.mxu2 }
  0xaf   : > { %v327_v26 = vadd.f32 %v609_v19, %v326_v21 }
  0xb0   : > { %v323_v22 = vpop.f32.mrf.mxu0 }
  0xb1   : > { %v324_v24 = vadd.f32 %v609_v19, %v323_v22  ;;  %v333_v30 = vmax.f32 %v327_v26, 0.0 }
  0xb3   : > { %v332_v25 = vmax.f32 %v324_v24, 0.0 }
  0xb5   : > { %v352_v27 = vpack.c.bf16 %v332_v25, %v331_v23 }
  0xb6   : > { %v328_v28 = vpop.f32.mrf.mxu2 }
  0xb7   : > { %v329_v29 = vadd.f32 %v609_v19, %v328_v28  ;;  %413 = vmatmul.bf16.vlgmr.msra.gmra.mxu1 %v352_v27 }
  0xb9   : > { %v334_v31 = vmax.f32 %v329_v29, 0.0 }
  0xbb   : > { %v353_v32 = vpack.c.bf16 %v334_v31, %v333_v30 }
  0xbd   : > { %418 = vmatmul.bf16.vlgmr.msra.gmra.mxu3 %v353_v32 }
 0x134   : > { %v414_v34 = vpop.f32.mrf.mxu1 }
 0x135   : > { %v415_v35 = vadd.f32 %v610_v33, %v414_v34 }
 0x137   : > { %424 = vst [vmem:[%s226_s16] sm:$0xff] %v415_v35 }
 0x13c   : > { %v416_v36 = vpop.f32.mrf.mxu1 }
 0x13d   : > { %v417_v37 = vadd.f32 %v610_v33, %v416_v36 }
 0x13f   : > { %425 = vst [vmem:[%s226_s16 + $0x8] sm:$0xff] %v417_v37 }
 0x140   : > { %v419_v38 = vpop.f32.mrf.mxu3 }
 0x141   : > { %v420_v39 = vadd.f32 %v610_v33, %v419_v38 }
 0x143   : > { %426 = vst [vmem:[%s226_s16 + $0x10] sm:$0xff] %v420_v39 }
 0x148   : > { %v421_v40 = vpop.f32.mrf.mxu3 }
 0x149   : > { %v422_v41 = vadd.f32 %v610_v33, %v421_v40 }
 0x14b   : > { %427 = vst [vmem:[%s226_s16 + $0x18] sm:$0xff] %v422_v41 }
 0x14c PF: > { %s15_s18 = sadd.s32 1, %s617_s18  }
 0x14d   : > { %p12_p4 = scmp.ge.s32.totalorder %s15_s18, 4  }
 0x14f   :  { %14 = sbr.rel (!%p12_p4) target bundleno = 1 (0x1), region = 70 }

</bundles_post_ra>
